<compile_context>
chip_gen: v7x
topology: tpu7x:2x2x1
jax: 0.10.0
libtpu: 0.0.40
codegen_flags: <defaults>
</compile_context>

<pallas_src>
import functools

import jax
import jax.numpy as jnp
from jax.experimental import pallas as pl
from jax.experimental.pallas import tpu as pltpu

NEG_SLOPE = 0.1      # nn.LeakyReLU(negative_slope=0.1)
BN_EPS = 1e-5        # PyTorch BatchNorm2d default eps
LANE = 128           # TPU lane width
VMEM_LIMIT = 48 * 1024 * 1024   # under v7x 64 MiB physical, above default scoped limit


def _leaky(x):
    return jnp.where(x > 0, x, NEG_SLOPE * x)


def _round_up(v, m):
    return (v + m - 1) // m * m


def _pad_last(a, target):
    d = target - a.shape[-1]
    if d == 0:
        return a
    return jnp.pad(a, [(0, 0)] * (a.ndim - 1) + [(0, d)])


# ----------------------------------------------------------------------------
# Fused conv kernel:  out = epilogue( sum_t  prologue(x)[tap_t] @ W_t ) (+ res)
# ----------------------------------------------------------------------------
def _conv_taps_kernel(*refs, taps, rows_out, has_pro, has_epi, has_res):
    idx = 0
    x_ref = refs[idx]; idx += 1            # (1, R, Cin_p)      bf16
    w_ref = refs[idx]; idx += 1            # (T, Cin_p, Cout_p) bf16
    if has_pro:
        ps_ref = refs[idx]                 # (1, Cin_p) f32  (folded bn1 scale)
        pb_ref = refs[idx + 1]             # (1, Cin_p) f32  (folded bn1 bias)
        mk_ref = refs[idx + 2]             # (R, 1)     f32  (0 on conv zero-pad rows)
        idx += 3
    if has_epi:
        es_ref = refs[idx]                 # (1, Cout_p) f32 (folded bn2 scale)
        eb_ref = refs[idx + 1]             # (1, Cout_p) f32 (folded bn2 bias)
        idx += 2
    if has_res:
        res_ref = refs[idx]                # (1, rows_out, Cout_p) f32
        idx += 1
    o_ref = refs[idx]; idx += 1            # (1, rows_out, Cout_p)
    if has_pro:
        act_ref = refs[idx]                # VMEM scratch (R, Cin_p) bf16

    cout_p = w_ref.shape[2]

    if has_pro:
        # bn1 + LeakyReLU prologue over the whole slab, computed once in f32.
        # The mask keeps the spatial zero-padding ring at exactly 0 (PyTorch
        # pads the activated tensor with zeros).
        xa = x_ref[0].astype(jnp.float32)
        act = _leaky(xa * ps_ref[...] + pb_ref[...]) * mk_ref[...]
        act_ref[...] = act.astype(jnp.bfloat16)

    acc = jnp.zeros((rows_out, cout_p), jnp.float32)
    for t, off in enumerate(taps):         # statically unrolled: T bf16 MXU matmuls
        if has_pro:
            a = act_ref[pl.ds(off, rows_out), :]
        else:
            a = x_ref[0, pl.ds(off, rows_out), :]
        acc = acc + jnp.dot(a, w_ref[t], preferred_element_type=jnp.float32)

    if has_epi:                            # bn2 + LeakyReLU epilogue (f32)
        acc = _leaky(acc * es_ref[...] + eb_ref[...])
    if has_res:                            # fused residual add (f32)
        acc = acc + res_ref[0].astype(jnp.float32)
    o_ref[0] = acc.astype(o_ref.dtype)


def _conv_taps(planes, w_taps, *, taps, rows_out, prologue=None, epilogue_bn=None,
               residual=None, out_dtype=jnp.float32):
    n, r_tot, cin_p = planes.shape
    t, _, cout_p = w_taps.shape
    has_pro = prologue is not None
    has_epi = epilogue_bn is not None
    has_res = residual is not None

    args = [planes, w_taps]
    in_specs = [
        pl.BlockSpec((1, r_tot, cin_p), lambda i: (i, 0, 0)),
        pl.BlockSpec((t, cin_p, cout_p), lambda i: (0, 0, 0)),
    ]
    if has_pro:
        ps, pb, mask = prologue
        args += [ps, pb, mask]
        in_specs += [
            pl.BlockSpec((1, cin_p), lambda i: (0, 0)),
            pl.BlockSpec((1, cin_p), lambda i: (0, 0)),
            pl.BlockSpec((r_tot, 1), lambda i: (0, 0)),
        ]
    if has_epi:
        es, eb = epilogue_bn
        args += [es, eb]
        in_specs += [
            pl.BlockSpec((1, cout_p), lambda i: (0, 0)),
            pl.BlockSpec((1, cout_p), lambda i: (0, 0)),
        ]
    if has_res:
        args.append(residual)
        in_specs.append(pl.BlockSpec((1, rows_out, cout_p), lambda i: (i, 0, 0)))

    scratch = [pltpu.VMEM((r_tot, cin_p), jnp.bfloat16)] if has_pro else []

    kernel = functools.partial(
        _conv_taps_kernel, taps=tuple(taps), rows_out=rows_out,
        has_pro=has_pro, has_epi=has_epi, has_res=has_res)

    return pl.pallas_call(
        kernel,
        out_shape=jax.ShapeDtypeStruct((n, rows_out, cout_p), out_dtype),
        grid=(n,),
        in_specs=in_specs,
        out_specs=pl.BlockSpec((1, rows_out, cout_p), lambda i: (i, 0, 0)),
        scratch_shapes=scratch,
        compiler_params=pltpu.CompilerParams(
            dimension_semantics=("parallel",),
            vmem_limit_bytes=VMEM_LIMIT,
        ),
    )(*args)


# ----------------------------------------------------------------------------
# Layout glue (pure XLA data movement, no K*K expansion)
# ----------------------------------------------------------------------------
def _prep_conv_input(x_nhwc, ksize, stride, c_target, dtype):
    """Lay out a conv input as an (N, R, C) row slab + static per-tap offsets.

    Tap t of the conv reads rows [taps[t], taps[t] + ho*wrow) of the slab.
    Columns [wo, wrow) of each output row are garbage (windows straddling the
    pad ring) and are sliced off by the caller.
    """
    n, h, w, c = x_nhwc.shape
    if c_target is not None and c_target > c:
        x_nhwc = _pad_last(x_nhwc, c_target)
        c = c_target

    if ksize == 1:
        if stride > 1:
            x_nhwc = x_nhwc[:, ::stride, ::stride, :]
        ho, wo = x_nhwc.shape[1], x_nhwc.shape[2]
        wrow = wo
        flat = x_nhwc.reshape(n, ho * wo, c)
        taps = (0,)
    elif ksize == 3:
        xp = jnp.pad(x_nhwc, ((0, 0), (1, 1), (1, 1), (0, 0)))
        hp, wp = h + 2, w + 2
        if stride == 1:
            ho, wo, wrow = h, w, wp
            flat = xp.reshape(n, hp * wp, c)
            taps = tuple(kh * wp + kw for kh in range(3) for kw in range(3))
        elif stride == 2:
            assert h % 2 == 0 and w % 2 == 0, "stride-2 path assumes even H, W"
            hh, wh = hp // 2, wp // 2
            ho, wo, wrow = h // 2, w // 2, wh
            # space-to-depth: 4 parity planes, each (hh, wh); a stride-2 tap is
            # a stride-1 shifted read inside one parity plane.
            par = xp.reshape(n, hh, 2, wh, 2, c).transpose(0, 2, 4, 1, 3, 5)
            r_plane0 = hh * wh
            max_local = wh + 1                        # max of (kh//2)*wh + (kw//2)
            r_plane = _round_up(max(r_plane0, max_local + ho * wh), 8)
            par = par.reshape(n, 4, r_plane0, c)
            par = jnp.pad(par, ((0, 0), (0, 0), (0, r_plane - r_plane0), (0, 0)))
            flat = par.reshape(n, 4 * r_plane, c)
            taps = tuple(((kh % 2) * 2 + (kw % 2)) * r_plane
                         + (kh // 2) * wh + (kw // 2)
                         for kh in range(3) for kw in range(3))
        else:
            raise NotImplementedError("stride must be 1 or 2")
    else:
        raise NotImplementedError("ksize must be 1 or 3")

    rows_out = ho * wrow
    need = max(taps) + rows_out
    r_tot = _round_up(max(flat.shape[1], need), 8)
    if r_tot > flat.shape[1]:
        flat = jnp.pad(flat, ((0, 0), (0, r_tot - flat.shape[1]), (0, 0)))
    return flat.astype(dtype), taps, ho, wo, wrow


def _pad_mask(h, w, ksize, stride):
    # 1 on real pixels, 0 on conv zero-padding / layout-padding rows.
    ones = jnp.ones((1, h, w, 1), jnp.float32)
    planes, _, _, _, _ = _prep_conv_input(ones, ksize, stride, None, jnp.float32)
    return planes[0]     # (R, 1)


def _w_taps(w_oihw, cin_p, cout_p):
    # (Cout, Cin, Kh, Kw) -> (Kh*Kw, Cin_p, Cout_p), tap t = kh*Kw + kw, bf16.
    cout, cin, kh, kw = w_oihw.shape
    wt = jnp.transpose(w_oihw, (2, 3, 1, 0)).reshape(kh * kw, cin, cout)
    wt = jnp.pad(wt, ((0, 0), (0, cin_p - cin), (0, cout_p - cout)))
    return wt.astype(jnp.bfloat16)


def _fold_bn(bn, c_target):
    gamma, beta, mean, var = bn
    scale = gamma / jnp.sqrt(var + BN_EPS)
    bias = beta - mean * scale
    return (_pad_last(scale.reshape(1, -1), c_target).astype(jnp.float32),
            _pad_last(bias.reshape(1, -1), c_target).astype(jnp.float32))


# ----------------------------------------------------------------------------
# BasicBlock forward (Pallas version)
# ----------------------------------------------------------------------------
@functools.partial(jax.jit,
                   static_argnames=("stride", "activate_before_residual", "drop_rate"))
def basic_block_forward(x_nchw, params, *, stride, activate_before_residual,
                        drop_rate=0.0):
    # TODO(synk): drop_rate > 0 (training-time dropout) not implemented; 0 -> identity.
    n, cin, h, w = x_nchw.shape
    cout = params["conv1_w"].shape[0]
    equal = cin == cout
    if equal:
        assert stride == 1, "identity shortcut requires stride == 1 (as in PyTorch)"
    cin_p = _round_up(cin, LANE)
    cout_p = _round_up(cout, LANE)

    x = jnp.transpose(x_nchw, (0, 2, 3, 1)).astype(jnp.float32)   # NHWC, f32

    scale1, bias1 = _fold_bn(params["bn1"], cin_p)
    scale2, bias2 = _fold_bn(params["bn2"], cout_p)

    # ---- conv1 (3x3, stride) fused with optional bn1+lrelu prologue and
    #      bn2+lrelu epilogue.  In the (not equal, not abr) branch conv1 gets
    #      the RAW x and relu1(bn1(x)) is never computed (it would be unused).
    apply_pro1 = equal or activate_before_residual
    planes1, taps1, ho, wo, wrow1 = _prep_conv_input(x, 3, stride, cin_p, jnp.bfloat16)
    w1 = _w_taps(params["conv1_w"], cin_p, cout_p)
    pro1 = (scale1, bias1, _pad_mask(h, w, 3, stride)) if apply_pro1 else None
    out1 = _conv_taps(planes1, w1, taps=taps1, rows_out=ho * wrow1,
                      prologue=pro1, epilogue_bn=(scale2, bias2),
                      residual=None, out_dtype=jnp.bfloat16)
    out1_img = out1.reshape(n, ho, wrow1, cout_p)[:, :, :wo, :]   # (n, ho, wo, cout_p)

    # ---- shortcut branch
    if equal:
        shortcut = _pad_last(x, cout_p)                           # raw x (identity)
    else:
        planes_s, taps_s, sh_h, sh_w, sh_wrow = _prep_conv_input(
            x, 1, stride, cin_p, jnp.bfloat16)
        w_s = _w_taps(params["convs_w"], cin_p, cout_p)
        pro_s = ((scale1, bias1, _pad_mask(h, w, 1, stride))
                 if activate_before_residual else None)
        sc = _conv_taps(planes_s, w_s, taps=taps_s, rows_out=sh_h * sh_wrow,
                        prologue=pro_s, epilogue_bn=None, residual=None,
                        out_dtype=jnp.float32)
        shortcut = sc.reshape(n, sh_h, sh_wrow, cout_p)[:, :, :sh_w, :]

    # ---- conv2 (3x3, stride 1) fused with the residual add
    planes2, taps2, ho2, wo2, wrow2 = _prep_conv_input(out1_img, 3, 1, cout_p,
                                                       jnp.bfloat16)
    w2 = _w_taps(params["conv2_w"], cout_p, cout_p)
    res = jnp.pad(shortcut.astype(jnp.float32),
                  ((0, 0), (0, 0), (0, wrow2 - wo2), (0, 0)))
    res = res.reshape(n, ho2 * wrow2, cout_p)
    y = _conv_taps(planes2, w2, taps=taps2, rows_out=ho2 * wrow2,
                   prologue=None, epilogue_bn=None, residual=res,
                   out_dtype=jnp.float32)
    y = y.reshape(n, ho2, wrow2, cout_p)[:, :, :wo2, :cout]
    return jnp.transpose(y, (0, 3, 1, 2))                         # back to NCHW


# ----------------------------------------------------------------------------
# Pure-JAX reference (mirrors the PyTorch forward exactly, eval-mode BN, f32)
# ----------------------------------------------------------------------------
def ref_forward(x, params, *, stride, activate_before_residual):
    in_planes = x.shape[1]
    out_planes = params["conv1_w"].shape[0]
    equal = in_planes == out_planes

    def bn(xx, p):
        gamma, beta, mean, var = p
        scale = gamma / jnp.sqrt(var + BN_EPS)
        bias = beta - mean * scale
        return xx * scale[None, :, None, None] + bias[None, :, None, None]

    def conv(xx, wgt, s, p):
        return jax.lax.conv_general_dilated(
            xx, wgt, (s, s), ((p, p), (p, p)),
            dimension_numbers=("NCHW", "OIHW", "NCHW"))

    if (not equal) and activate_before_residual:
        x = _leaky(bn(x, params["bn1"]))
        out = x
    else:
        out = _leaky(bn(x, params["bn1"]))
    out = _leaky(bn(conv(out if equal else x, params["conv1_w"], stride, 1),
                    params["bn2"]))
    out = conv(out, params["conv2_w"], 1, 1)
    shortcut = x if equal else conv(x, params["convs_w"], stride, 0)
    return shortcut + out


# ----------------------------------------------------------------------------
# Deterministic parameter init
# ----------------------------------------------------------------------------
def init_params(key, in_planes, out_planes):
    ks = jax.random.split(key, 5)

    def bn_params(k, ch):
        k1, k2, k3, k4 = jax.random.split(k, 4)
        gamma = 1.0 + 0.1 * jax.random.normal(k1, (ch,), jnp.float32)
        beta = 0.1 * jax.random.normal(k2, (ch,), jnp.float32)
        mean = 0.1 * jax.random.normal(k3, (ch,), jnp.float32)
        var = jnp.abs(jax.random.normal(k4, (ch,), jnp.float32)) + 0.5
        return (gamma, beta, mean, var)

    params = {
        "bn1": bn_params(ks[0], in_planes),
        "conv1_w": 0.1 * jax.random.normal(ks[1], (out_planes, in_planes, 3, 3),
                                           jnp.float32),
        "bn2": bn_params(ks[2], out_planes),
        "conv2_w": 0.1 * jax.random.normal(ks[3], (out_planes, out_planes, 3, 3),
                                           jnp.float32),
    }
    if in_planes != out_planes:
        params["convs_w"] = 0.1 * jax.random.normal(
            ks[4], (out_planes, in_planes, 1, 1), jnp.float32)
    return params


if __name__ == "__main__":
    root = jax.random.PRNGKey(0)
    k_x1, k_p1, k_x2, k_p2, k_x3, k_p3 = jax.random.split(root, 6)

    # bf16 MXU operands with f32 accumulation -> compare at 5e-2 tolerances.
    TOL = dict(atol=5e-2, rtol=5e-2)

    # Config 1: in != out, stride 2, activate_before_residual=True
    #           (convShortcut + stride-2 parity path, fused bn1 prologue on both)
    x1 = jax.random.normal(k_x1, (2, 4, 16, 16), jnp.float32)
    p1 = init_params(k_p1, 4, 8)
    y1 = jax.block_until_ready(
        basic_block_forward(x1, p1, stride=2, activate_before_residual=True))
    r1 = ref_forward(x1, p1, stride=2, activate_before_residual=True)
    assert y1.shape == (2, 8, 8, 8)
    assert jnp.allclose(y1, r1, **TOL), "config1 mismatch"

    # Config 2: in == out, stride 1 (identity shortcut, fused residual add)
    x2 = jax.random.normal(k_x2, (2, 8, 16, 16), jnp.float32)
    p2 = init_params(k_p2, 8, 8)
    y2 = jax.block_until_ready(
        basic_block_forward(x2, p2, stride=1, activate_before_residual=False))
    r2 = ref_forward(x2, p2, stride=1, activate_before_residual=False)
    assert y2.shape == (2, 8, 16, 16)
    assert jnp.allclose(y2, r2, **TOL), "config2 mismatch"

    # Config 3: in != out, stride 1, activate_before_residual=False
    #           (conv1 and the 1x1 shortcut both consume the RAW x; relu1(bn1)
    #            is dead in the original module and is skipped here)
    x3 = jax.random.normal(k_x3, (2, 4, 16, 16), jnp.float32)
    p3 = init_params(k_p3, 4, 8)
    y3 = jax.block_until_ready(
        basic_block_forward(x3, p3, stride=1, activate_before_residual=False))
    r3 = ref_forward(x3, p3, stride=1, activate_before_residual=False)
    assert y3.shape == (2, 8, 16, 16)
    assert jnp.allclose(y3, r3, **TOL), "config3 mismatch"

    print("KERNEL_OK")
</pallas_src>

<mosaic_0001>
module attributes {stable_mosaic.version = 11 : i64} {
  func.func @_conv_taps_kernel(%arg0: i32, %arg1: memref<1x352x128xbf16, #tpu.memory_space<vmem>>, %arg2: memref<9x128x128xbf16, #tpu.memory_space<vmem>>, %arg3: memref<1x128xf32, #tpu.memory_space<vmem>>, %arg4: memref<1x128xf32, #tpu.memory_space<vmem>>, %arg5: memref<352x1xf32, #tpu.memory_space<vmem>>, %arg6: memref<1x128xf32, #tpu.memory_space<vmem>>, %arg7: memref<1x128xf32, #tpu.memory_space<vmem>>, %arg8: memref<1x72x128xbf16, #tpu.memory_space<vmem>>, %arg9: memref<352x128xbf16, #tpu.memory_space<vmem>>) attributes {dimension_semantics = [#tpu.dimension_semantics<parallel>], iteration_bounds = array<i64: 2>, scalar_prefetch = 0 : i64, scratch_operands = 1 : i64, tpu.core_type = #tpu.core_type<tc>, window_params = [{transform_indices = @transform_0, window_bounds = array<i64: 1, 352, 128>}, {pipeline_mode = #tpu.pipeline_mode<synchronous>, transform_indices = @transform_1, window_bounds = array<i64: 9, 128, 128>}, {pipeline_mode = #tpu.pipeline_mode<synchronous>, transform_indices = @transform_2, window_bounds = array<i64: 1, 128>}, {pipeline_mode = #tpu.pipeline_mode<synchronous>, transform_indices = @transform_3, window_bounds = array<i64: 1, 128>}, {pipeline_mode = #tpu.pipeline_mode<synchronous>, transform_indices = @transform_4, window_bounds = array<i64: 352, 1>}, {pipeline_mode = #tpu.pipeline_mode<synchronous>, transform_indices = @transform_5, window_bounds = array<i64: 1, 128>}, {pipeline_mode = #tpu.pipeline_mode<synchronous>, transform_indices = @transform_6, window_bounds = array<i64: 1, 128>}, {transform_indices = @transform_7, window_bounds = array<i64: 1, 72, 128>}]} {
    %c0 = arith.constant 0 : index
    %c0_0 = arith.constant 0 : index
    %c0_1 = arith.constant 0 : index
    %0 = vector.load %arg1[%c0, %c0_0, %c0_1] : memref<1x352x128xbf16, #tpu.memory_space<vmem>>, vector<1x352x128xbf16>
    %1 = vector.shape_cast %0 : vector<1x352x128xbf16> to vector<352x128xbf16>
    %2 = arith.extf %1 : vector<352x128xbf16> to vector<352x128xf32>
    %c0_2 = arith.constant 0 : index
    %c0_3 = arith.constant 0 : index
    %3 = vector.load %arg3[%c0_2, %c0_3] : memref<1x128xf32, #tpu.memory_space<vmem>>, vector<1x128xf32>
    %4 = vector.broadcast %3 : vector<1x128xf32> to vector<352x128xf32>
    %5 = arith.mulf %2, %4 : vector<352x128xf32>
    %c0_4 = arith.constant 0 : index
    %c0_5 = arith.constant 0 : index
    %6 = vector.load %arg4[%c0_4, %c0_5] : memref<1x128xf32, #tpu.memory_space<vmem>>, vector<1x128xf32>
    %7 = vector.broadcast %6 : vector<1x128xf32> to vector<352x128xf32>
    %8 = arith.addf %5, %7 : vector<352x128xf32>
    %cst = arith.constant 0.000000e+00 : f32
    %9 = vector.broadcast %cst : f32 to vector<352x128xf32>
    %10 = arith.cmpf ogt, %8, %9 : vector<352x128xf32>
    %cst_6 = arith.constant 1.000000e-01 : f32
    %11 = vector.broadcast %cst_6 : f32 to vector<352x128xf32>
    %12 = arith.mulf %11, %8 : vector<352x128xf32>
    %13 = arith.select %10, %8, %12 : vector<352x128xi1>, vector<352x128xf32>
    %c0_7 = arith.constant 0 : index
    %c0_8 = arith.constant 0 : index
    %14 = vector.load %arg5[%c0_7, %c0_8] : memref<352x1xf32, #tpu.memory_space<vmem>>, vector<352x1xf32>
    %15 = vector.broadcast %14 : vector<352x1xf32> to vector<352x128xf32>
    %16 = arith.mulf %13, %15 : vector<352x128xf32>
    %17 = arith.truncf %16 : vector<352x128xf32> to vector<352x128xbf16>
    %c0_9 = arith.constant 0 : index
    %c0_10 = arith.constant 0 : index
    %18 = vector.load %arg9[%c0_9, %c0_10] : memref<352x128xbf16, #tpu.memory_space<vmem>>, vector<352x128xbf16>
    tpu.vector_store %arg9[%c0_9, %c0_10], %17 {strides = array<i32>} : memref<352x128xbf16, #tpu.memory_space<vmem>>, vector<352x128xbf16>,
    %cst_11 = arith.constant 0.000000e+00 : f32
    %19 = vector.broadcast %cst_11 : f32 to vector<72x128xf32>
    %c0_12 = arith.constant 0 : index
    %c0_13 = arith.constant 0 : index
    %20 = vector.load %arg9[%c0_12, %c0_13] : memref<352x128xbf16, #tpu.memory_space<vmem>>, vector<72x128xbf16>
    %c0_14 = arith.constant 0 : index
    %c0_15 = arith.constant 0 : index
    %c0_16 = arith.constant 0 : index
    %21 = vector.load %arg2[%c0_14, %c0_15, %c0_16] : memref<9x128x128xbf16, #tpu.memory_space<vmem>>, vector<1x128x128xbf16>
    %22 = vector.shape_cast %21 : vector<1x128x128xbf16> to vector<128x128xbf16>
    %cst_17 = arith.constant dense<0.000000e+00> : vector<72x128xf32>
    %23 = tpu.matmul %20, %22, %cst_17 {dimension_numbers = #tpu.dot_dimension_numbers<[1], [0], [0], [1], [0, 0, 1, 1], [], []>} : vector<72x128xbf16>, vector<128x128xbf16>, vector<72x128xf32> -> vector<72x128xf32>
    %24 = arith.addf %19, %23 : vector<72x128xf32>
    %c88 = arith.constant 88 : index
    %c0_18 = arith.constant 0 : index
    %25 = vector.load %arg9[%c88, %c0_18] : memref<352x128xbf16, #tpu.memory_space<vmem>>, vector<72x128xbf16>
    %c1 = arith.constant 1 : index
    %c0_19 = arith.constant 0 : index
    %c0_20 = arith.constant 0 : index
    %26 = vector.load %arg2[%c1, %c0_19, %c0_20] : memref<9x128x128xbf16, #tpu.memory_space<vmem>>, vector<1x128x128xbf16>
    %27 = vector.shape_cast %26 : vector<1x128x128xbf16> to vector<128x128xbf16>
    %cst_21 = arith.constant dense<0.000000e+00> : vector<72x128xf32>
    %28 = tpu.matmul %25, %27, %cst_21 {dimension_numbers = #tpu.dot_dimension_numbers<[1], [0], [0], [1], [0, 0, 1, 1], [], []>} : vector<72x128xbf16>, vector<128x128xbf16>, vector<72x128xf32> -> vector<72x128xf32>
    %29 = arith.addf %24, %28 : vector<72x128xf32>
    %c1_22 = arith.constant 1 : index
    %c0_23 = arith.constant 0 : index
    %30 = vector.load %arg9[%c1_22, %c0_23] : memref<352x128xbf16, #tpu.memory_space<vmem>>, vector<72x128xbf16>
    %c2 = arith.constant 2 : index
    %c0_24 = arith.constant 0 : index
    %c0_25 = arith.constant 0 : index
    %31 = vector.load %arg2[%c2, %c0_24, %c0_25] : memref<9x128x128xbf16, #tpu.memory_space<vmem>>, vector<1x128x128xbf16>
    %32 = vector.shape_cast %31 : vector<1x128x128xbf16> to vector<128x128xbf16>
    %cst_26 = arith.constant dense<0.000000e+00> : vector<72x128xf32>
    %33 = tpu.matmul %30, %32, %cst_26 {dimension_numbers = #tpu.dot_dimension_numbers<[1], [0], [0], [1], [0, 0, 1, 1], [], []>} : vector<72x128xbf16>, vector<128x128xbf16>, vector<72x128xf32> -> vector<72x128xf32>
    %34 = arith.addf %29, %33 : vector<72x128xf32>
    %c176 = arith.constant 176 : index
    %c0_27 = arith.constant 0 : index
    %35 = vector.load %arg9[%c176, %c0_27] : memref<352x128xbf16, #tpu.memory_space<vmem>>, vector<72x128xbf16>
    %c3 = arith.constant 3 : index
    %c0_28 = arith.constant 0 : index
    %c0_29 = arith.constant 0 : index
    %36 = vector.load %arg2[%c3, %c0_28, %c0_29] : memref<9x128x128xbf16, #tpu.memory_space<vmem>>, vector<1x128x128xbf16>
    %37 = vector.shape_cast %36 : vector<1x128x128xbf16> to vector<128x128xbf16>
    %cst_30 = arith.constant dense<0.000000e+00> : vector<72x128xf32>
    %38 = tpu.matmul %35, %37, %cst_30 {dimension_numbers = #tpu.dot_dimension_numbers<[1], [0], [0], [1], [0, 0, 1, 1], [], []>} : vector<72x128xbf16>, vector<128x128xbf16>, vector<72x128xf32> -> vector<72x128xf32>
    %39 = arith.addf %34, %38 : vector<72x128xf32>
    %c264 = arith.constant 264 : index
    %c0_31 = arith.constant 0 : index
    %40 = vector.load %arg9[%c264, %c0_31] : memref<352x128xbf16, #tpu.memory_space<vmem>>, vector<72x128xbf16>
    %c4 = arith.constant 4 : index
    %c0_32 = arith.constant 0 : index
    %c0_33 = arith.constant 0 : index
    %41 = vector.load %arg2[%c4, %c0_32, %c0_33] : memref<9x128x128xbf16, #tpu.memory_space<vmem>>, vector<1x128x128xbf16>
    %42 = vector.shape_cast %41 : vector<1x128x128xbf16> to vector<128x128xbf16>
    %cst_34 = arith.constant dense<0.000000e+00> : vector<72x128xf32>
    %43 = tpu.matmul %40, %42, %cst_34 {dimension_numbers = #tpu.dot_dimension_numbers<[1], [0], [0], [1], [0, 0, 1, 1], [], []>} : vector<72x128xbf16>, vector<128x128xbf16>, vector<72x128xf32> -> vector<72x128xf32>
    %44 = arith.addf %39, %43 : vector<72x128xf32>
    %c177 = arith.constant 177 : index
    %c0_35 = arith.constant 0 : index
    %45 = vector.load %arg9[%c177, %c0_35] : memref<352x128xbf16, #tpu.memory_space<vmem>>, vector<72x128xbf16>
    %c5 = arith.constant 5 : index
    %c0_36 = arith.constant 0 : index
    %c0_37 = arith.constant 0 : index
    %46 = vector.load %arg2[%c5, %c0_36, %c0_37] : memref<9x128x128xbf16, #tpu.memory_space<vmem>>, vector<1x128x128xbf16>
    %47 = vector.shape_cast %46 : vector<1x128x128xbf16> to vector<128x128xbf16>
    %cst_38 = arith.constant dense<0.000000e+00> : vector<72x128xf32>
    %48 = tpu.matmul %45, %47, %cst_38 {dimension_numbers = #tpu.dot_dimension_numbers<[1], [0], [0], [1], [0, 0, 1, 1], [], []>} : vector<72x128xbf16>, vector<128x128xbf16>, vector<72x128xf32> -> vector<72x128xf32>
    %49 = arith.addf %44, %48 : vector<72x128xf32>
    %c9 = arith.constant 9 : index
    %c0_39 = arith.constant 0 : index
    %50 = vector.load %arg9[%c9, %c0_39] : memref<352x128xbf16, #tpu.memory_space<vmem>>, vector<72x128xbf16>
    %c6 = arith.constant 6 : index
    %c0_40 = arith.constant 0 : index
    %c0_41 = arith.constant 0 : index
    %51 = vector.load %arg2[%c6, %c0_40, %c0_41] : memref<9x128x128xbf16, #tpu.memory_space<vmem>>, vector<1x128x128xbf16>
    %52 = vector.shape_cast %51 : vector<1x128x128xbf16> to vector<128x128xbf16>
    %cst_42 = arith.constant dense<0.000000e+00> : vector<72x128xf32>
    %53 = tpu.matmul %50, %52, %cst_42 {dimension_numbers = #tpu.dot_dimension_numbers<[1], [0], [0], [1], [0, 0, 1, 1], [], []>} : vector<72x128xbf16>, vector<128x128xbf16>, vector<72x128xf32> -> vector<72x128xf32>
    %54 = arith.addf %49, %53 : vector<72x128xf32>
    %c97 = arith.constant 97 : index
    %c0_43 = arith.constant 0 : index
    %55 = vector.load %arg9[%c97, %c0_43] : memref<352x128xbf16, #tpu.memory_space<vmem>>, vector<72x128xbf16>
    %c7 = arith.constant 7 : index
    %c0_44 = arith.constant 0 : index
    %c0_45 = arith.constant 0 : index
    %56 = vector.load %arg2[%c7, %c0_44, %c0_45] : memref<9x128x128xbf16, #tpu.memory_space<vmem>>, vector<1x128x128xbf16>
    %57 = vector.shape_cast %56 : vector<1x128x128xbf16> to vector<128x128xbf16>
    %cst_46 = arith.constant dense<0.000000e+00> : vector<72x128xf32>
    %58 = tpu.matmul %55, %57, %cst_46 {dimension_numbers = #tpu.dot_dimension_numbers<[1], [0], [0], [1], [0, 0, 1, 1], [], []>} : vector<72x128xbf16>, vector<128x128xbf16>, vector<72x128xf32> -> vector<72x128xf32>
    %59 = arith.addf %54, %58 : vector<72x128xf32>
    %c10 = arith.constant 10 : index
    %c0_47 = arith.constant 0 : index
    %60 = vector.load %arg9[%c10, %c0_47] : memref<352x128xbf16, #tpu.memory_space<vmem>>, vector<72x128xbf16>
    %c8 = arith.constant 8 : index
    %c0_48 = arith.constant 0 : index
    %c0_49 = arith.constant 0 : index
    %61 = vector.load %arg2[%c8, %c0_48, %c0_49] : memref<9x128x128xbf16, #tpu.memory_space<vmem>>, vector<1x128x128xbf16>
    %62 = vector.shape_cast %61 : vector<1x128x128xbf16> to vector<128x128xbf16>
    %cst_50 = arith.constant dense<0.000000e+00> : vector<72x128xf32>
    %63 = tpu.matmul %60, %62, %cst_50 {dimension_numbers = #tpu.dot_dimension_numbers<[1], [0], [0], [1], [0, 0, 1, 1], [], []>} : vector<72x128xbf16>, vector<128x128xbf16>, vector<72x128xf32> -> vector<72x128xf32>
    %64 = arith.addf %59, %63 : vector<72x128xf32>
    %c0_51 = arith.constant 0 : index
    %c0_52 = arith.constant 0 : index
    %65 = vector.load %arg6[%c0_51, %c0_52] : memref<1x128xf32, #tpu.memory_space<vmem>>, vector<1x128xf32>
    %66 = vector.broadcast %65 : vector<1x128xf32> to vector<72x128xf32>
    %67 = arith.mulf %64, %66 : vector<72x128xf32>
    %c0_53 = arith.constant 0 : index
    %c0_54 = arith.constant 0 : index
    %68 = vector.load %arg7[%c0_53, %c0_54] : memref<1x128xf32, #tpu.memory_space<vmem>>, vector<1x128xf32>
    %69 = vector.broadcast %68 : vector<1x128xf32> to vector<72x128xf32>
    %70 = arith.addf %67, %69 : vector<72x128xf32>
    %cst_55 = arith.constant 0.000000e+00 : f32
    %71 = vector.broadcast %cst_55 : f32 to vector<72x128xf32>
    %72 = arith.cmpf ogt, %70, %71 : vector<72x128xf32>
    %cst_56 = arith.constant 1.000000e-01 : f32
    %73 = vector.broadcast %cst_56 : f32 to vector<72x128xf32>
    %74 = arith.mulf %73, %70 : vector<72x128xf32>
    %75 = arith.select %72, %70, %74 : vector<72x128xi1>, vector<72x128xf32>
    %76 = arith.truncf %75 : vector<72x128xf32> to vector<72x128xbf16>
    %c0_57 = arith.constant 0 : index
    %c0_58 = arith.constant 0 : index
    %c0_59 = arith.constant 0 : index
    %77 = vector.load %arg8[%c0_57, %c0_58, %c0_59] : memref<1x72x128xbf16, #tpu.memory_space<vmem>>, vector<1x72x128xbf16>
    %78 = vector.shape_cast %77 : vector<1x72x128xbf16> to vector<72x128xbf16>
    %79 = vector.shape_cast %76 : vector<72x128xbf16> to vector<1x72x128xbf16>
    tpu.vector_store %arg8[%c0_57, %c0_58, %c0_59], %79 {strides = array<i32>} : memref<1x72x128xbf16, #tpu.memory_space<vmem>>, vector<1x72x128xbf16>,
    return
  }
  func.func @transform_0(%arg0: i32) -> (i32, i32, i32) {
    %c0_i32 = arith.constant 0 : i32
    %c0_i32_0 = arith.constant 0 : i32
    %c0_i32_1 = arith.constant 0 : i32
    return %arg0, %c0_i32, %c0_i32_0 : i32, i32, i32
  }
  func.func @transform_1(%arg0: i32) -> (i32, i32, i32) {
    %c0_i32 = arith.constant 0 : i32
    %c0_i32_0 = arith.constant 0 : i32
    %c0_i32_1 = arith.constant 0 : i32
    %c0_i32_2 = arith.constant 0 : i32
    return %c0_i32, %c0_i32_0, %c0_i32_1 : i32, i32, i32
  }
  func.func @transform_2(%arg0: i32) -> (i32, i32) {
    %c0_i32 = arith.constant 0 : i32
    %c0_i32_0 = arith.constant 0 : i32
    %c0_i32_1 = arith.constant 0 : i32
    return %c0_i32, %c0_i32_0 : i32, i32
  }
  func.func @transform_3(%arg0: i32) -> (i32, i32) {
    %c0_i32 = arith.constant 0 : i32
    %c0_i32_0 = arith.constant 0 : i32
    %c0_i32_1 = arith.constant 0 : i32
    return %c0_i32, %c0_i32_0 : i32, i32
  }
  func.func @transform_4(%arg0: i32) -> (i32, i32) {
    %c0_i32 = arith.constant 0 : i32
    %c0_i32_0 = arith.constant 0 : i32
    %c0_i32_1 = arith.constant 0 : i32
    return %c0_i32, %c0_i32_0 : i32, i32
  }
  func.func @transform_5(%arg0: i32) -> (i32, i32) {
    %c0_i32 = arith.constant 0 : i32
    %c0_i32_0 = arith.constant 0 : i32
    %c0_i32_1 = arith.constant 0 : i32
    return %c0_i32, %c0_i32_0 : i32, i32
  }
  func.func @transform_6(%arg0: i32) -> (i32, i32) {
    %c0_i32 = arith.constant 0 : i32
    %c0_i32_0 = arith.constant 0 : i32
    %c0_i32_1 = arith.constant 0 : i32
    return %c0_i32, %c0_i32_0 : i32, i32
  }
  func.func @transform_7(%arg0: i32) -> (i32, i32, i32) {
    %c0_i32 = arith.constant 0 : i32
    %c0_i32_0 = arith.constant 0 : i32
    %c0_i32_1 = arith.constant 0 : i32
    return %arg0, %c0_i32, %c0_i32_0 : i32, i32, i32
  }
}

module attributes {stable_mosaic.version = 11 : i64} {
  func.func @_conv_taps_kernel(%arg0: i32, %arg1: memref<1x64x128xbf16, #tpu.memory_space<vmem>>, %arg2: memref<1x128x128xbf16, #tpu.memory_space<vmem>>, %arg3: memref<1x128xf32, #tpu.memory_space<vmem>>, %arg4: memref<1x128xf32, #tpu.memory_space<vmem>>, %arg5: memref<64x1xf32, #tpu.memory_space<vmem>>, %arg6: memref<1x64x128xf32, #tpu.memory_space<vmem>>, %arg7: memref<64x128xbf16, #tpu.memory_space<vmem>>) attributes {dimension_semantics = [#tpu.dimension_semantics<parallel>], iteration_bounds = array<i64: 2>, scalar_prefetch = 0 : i64, scratch_operands = 1 : i64, tpu.core_type = #tpu.core_type<tc>, window_params = [{transform_indices = @transform_0, window_bounds = array<i64: 1, 64, 128>}, {pipeline_mode = #tpu.pipeline_mode<synchronous>, transform_indices = @transform_1, window_bounds = array<i64: 1, 128, 128>}, {pipeline_mode = #tpu.pipeline_mode<synchronous>, transform_indices = @transform_2, window_bounds = array<i64: 1, 128>}, {pipeline_mode = #tpu.pipeline_mode<synchronous>, transform_indices = @transform_3, window_bounds = array<i64: 1, 128>}, {pipeline_mode = #tpu.pipeline_mode<synchronous>, transform_indices = @transform_4, window_bounds = array<i64: 64, 1>}, {transform_indices = @transform_5, window_bounds = array<i64: 1, 64, 128>}]} {
    %c0 = arith.constant 0 : index
    %c0_0 = arith.constant 0 : index
    %c0_1 = arith.constant 0 : index
    %0 = vector.load %arg1[%c0, %c0_0, %c0_1] : memref<1x64x128xbf16, #tpu.memory_space<vmem>>, vector<1x64x128xbf16>
    %1 = vector.shape_cast %0 : vector<1x64x128xbf16> to vector<64x128xbf16>
    %2 = arith.extf %1 : vector<64x128xbf16> to vector<64x128xf32>
    %c0_2 = arith.constant 0 : index
    %c0_3 = arith.constant 0 : index
    %3 = vector.load %arg3[%c0_2, %c0_3] : memref<1x128xf32, #tpu.memory_space<vmem>>, vector<1x128xf32>
    %4 = vector.broadcast %3 : vector<1x128xf32> to vector<64x128xf32>
    %5 = arith.mulf %2, %4 : vector<64x128xf32>
    %c0_4 = arith.constant 0 : index
    %c0_5 = arith.constant 0 : index
    %6 = vector.load %arg4[%c0_4, %c0_5] : memref<1x128xf32, #tpu.memory_space<vmem>>, vector<1x128xf32>
    %7 = vector.broadcast %6 : vector<1x128xf32> to vector<64x128xf32>
    %8 = arith.addf %5, %7 : vector<64x128xf32>
    %cst = arith.constant 0.000000e+00 : f32
    %9 = vector.broadcast %cst : f32 to vector<64x128xf32>
    %10 = arith.cmpf ogt, %8, %9 : vector<64x128xf32>
    %cst_6 = arith.constant 1.000000e-01 : f32
    %11 = vector.broadcast %cst_6 : f32 to vector<64x128xf32>
    %12 = arith.mulf %11, %8 : vector<64x128xf32>
    %13 = arith.select %10, %8, %12 : vector<64x128xi1>, vector<64x128xf32>
    %c0_7 = arith.constant 0 : index
    %c0_8 = arith.constant 0 : index
    %14 = vector.load %arg5[%c0_7, %c0_8] : memref<64x1xf32, #tpu.memory_space<vmem>>, vector<64x1xf32>
    %15 = vector.broadcast %14 : vector<64x1xf32> to vector<64x128xf32>
    %16 = arith.mulf %13, %15 : vector<64x128xf32>
    %17 = arith.truncf %16 : vector<64x128xf32> to vector<64x128xbf16>
    %c0_9 = arith.constant 0 : index
    %c0_10 = arith.constant 0 : index
    %18 = vector.load %arg7[%c0_9, %c0_10] : memref<64x128xbf16, #tpu.memory_space<vmem>>, vector<64x128xbf16>
    tpu.vector_store %arg7[%c0_9, %c0_10], %17 {strides = array<i32>} : memref<64x128xbf16, #tpu.memory_space<vmem>>, vector<64x128xbf16>,
    %cst_11 = arith.constant 0.000000e+00 : f32
    %19 = vector.broadcast %cst_11 : f32 to vector<64x128xf32>
    %c0_12 = arith.constant 0 : index
    %c0_13 = arith.constant 0 : index
    %20 = vector.load %arg7[%c0_12, %c0_13] : memref<64x128xbf16, #tpu.memory_space<vmem>>, vector<64x128xbf16>
    %c0_14 = arith.constant 0 : index
    %c0_15 = arith.constant 0 : index
    %c0_16 = arith.constant 0 : index
    %21 = vector.load %arg2[%c0_14, %c0_15, %c0_16] : memref<1x128x128xbf16, #tpu.memory_space<vmem>>, vector<1x128x128xbf16>
    %22 = vector.shape_cast %21 : vector<1x128x128xbf16> to vector<128x128xbf16>
    %cst_17 = arith.constant dense<0.000000e+00> : vector<64x128xf32>
    %23 = tpu.matmul %20, %22, %cst_17 {dimension_numbers = #tpu.dot_dimension_numbers<[1], [0], [0], [1], [0, 0, 1, 1], [], []>} : vector<64x128xbf16>, vector<128x128xbf16>, vector<64x128xf32> -> vector<64x128xf32>
    %24 = arith.addf %19, %23 : vector<64x128xf32>
    %c0_18 = arith.constant 0 : index
    %c0_19 = arith.constant 0 : index
    %c0_20 = arith.constant 0 : index
    %25 = vector.load %arg6[%c0_18, %c0_19, %c0_20] : memref<1x64x128xf32, #tpu.memory_space<vmem>>, vector<1x64x128xf32>
    %26 = vector.shape_cast %25 : vector<1x64x128xf32> to vector<64x128xf32>
    %27 = vector.shape_cast %24 : vector<64x128xf32> to vector<1x64x128xf32>
    tpu.vector_store %arg6[%c0_18, %c0_19, %c0_20], %27 {strides = array<i32>} : memref<1x64x128xf32, #tpu.memory_space<vmem>>, vector<1x64x128xf32>,
    return
  }
  func.func @transform_0(%arg0: i32) -> (i32, i32, i32) {
    %c0_i32 = arith.constant 0 : i32
    %c0_i32_0 = arith.constant 0 : i32
    %c0_i32_1 = arith.constant 0 : i32
    return %arg0, %c0_i32, %c0_i32_0 : i32, i32, i32
  }
  func.func @transform_1(%arg0: i32) -> (i32, i32, i32) {
    %c0_i32 = arith.constant 0 : i32
    %c0_i32_0 = arith.constant 0 : i32
    %c0_i32_1 = arith.constant 0 : i32
    %c0_i32_2 = arith.constant 0 : i32
    return %c0_i32, %c0_i32_0, %c0_i32_1 : i32, i32, i32
  }
  func.func @transform_2(%arg0: i32) -> (i32, i32) {
    %c0_i32 = arith.constant 0 : i32
    %c0_i32_0 = arith.constant 0 : i32
    %c0_i32_1 = arith.constant 0 : i32
    return %c0_i32, %c0_i32_0 : i32, i32
  }
  func.func @transform_3(%arg0: i32) -> (i32, i32) {
    %c0_i32 = arith.constant 0 : i32
    %c0_i32_0 = arith.constant 0 : i32
    %c0_i32_1 = arith.constant 0 : i32
    return %c0_i32, %c0_i32_0 : i32, i32
  }
  func.func @transform_4(%arg0: i32) -> (i32, i32) {
    %c0_i32 = arith.constant 0 : i32
    %c0_i32_0 = arith.constant 0 : i32
    %c0_i32_1 = arith.constant 0 : i32
    return %c0_i32, %c0_i32_0 : i32, i32
  }
  func.func @transform_5(%arg0: i32) -> (i32, i32, i32) {
    %c0_i32 = arith.constant 0 : i32
    %c0_i32_0 = arith.constant 0 : i32
    %c0_i32_1 = arith.constant 0 : i32
    return %arg0, %c0_i32, %c0_i32_0 : i32, i32, i32
  }
}

module attributes {stable_mosaic.version = 11 : i64} {
  func.func @_conv_taps_kernel(%arg0: i32, %arg1: memref<1x104x128xbf16, #tpu.memory_space<vmem>>, %arg2: memref<9x128x128xbf16, #tpu.memory_space<vmem>>, %arg3: memref<1x80x128xf32, #tpu.memory_space<vmem>>, %arg4: memref<1x80x128xf32, #tpu.memory_space<vmem>>) attributes {dimension_semantics = [#tpu.dimension_semantics<parallel>], iteration_bounds = array<i64: 2>, scalar_prefetch = 0 : i64, scratch_operands = 0 : i64, tpu.core_type = #tpu.core_type<tc>, window_params = [{transform_indices = @transform_0, window_bounds = array<i64: 1, 104, 128>}, {pipeline_mode = #tpu.pipeline_mode<synchronous>, transform_indices = @transform_1, window_bounds = array<i64: 9, 128, 128>}, {transform_indices = @transform_2, window_bounds = array<i64: 1, 80, 128>}, {transform_indices = @transform_3, window_bounds = array<i64: 1, 80, 128>}]} {
    %cst = arith.constant 0.000000e+00 : f32
    %0 = vector.broadcast %cst : f32 to vector<80x128xf32>
    %c0 = arith.constant 0 : index
    %c0_0 = arith.constant 0 : index
    %c0_1 = arith.constant 0 : index
    %1 = vector.load %arg1[%c0, %c0_0, %c0_1] : memref<1x104x128xbf16, #tpu.memory_space<vmem>>, vector<1x80x128xbf16>
    %2 = vector.shape_cast %1 : vector<1x80x128xbf16> to vector<80x128xbf16>
    %c0_2 = arith.constant 0 : index
    %c0_3 = arith.constant 0 : index
    %c0_4 = arith.constant 0 : index
    %3 = vector.load %arg2[%c0_2, %c0_3, %c0_4] : memref<9x128x128xbf16, #tpu.memory_space<vmem>>, vector<1x128x128xbf16>
    %4 = vector.shape_cast %3 : vector<1x128x128xbf16> to vector<128x128xbf16>
    %cst_5 = arith.constant dense<0.000000e+00> : vector<80x128xf32>
    %5 = tpu.matmul %2, %4, %cst_5 {dimension_numbers = #tpu.dot_dimension_numbers<[1], [0], [0], [1], [0, 0, 1, 1], [], []>} : vector<80x128xbf16>, vector<128x128xbf16>, vector<80x128xf32> -> vector<80x128xf32>
    %6 = arith.addf %0, %5 : vector<80x128xf32>
    %c0_6 = arith.constant 0 : index
    %c1 = arith.constant 1 : index
    %c0_7 = arith.constant 0 : index
    %7 = vector.load %arg1[%c0_6, %c1, %c0_7] : memref<1x104x128xbf16, #tpu.memory_space<vmem>>, vector<1x80x128xbf16>
    %8 = vector.shape_cast %7 : vector<1x80x128xbf16> to vector<80x128xbf16>
    %c1_8 = arith.constant 1 : index
    %c0_9 = arith.constant 0 : index
    %c0_10 = arith.constant 0 : index
    %9 = vector.load %arg2[%c1_8, %c0_9, %c0_10] : memref<9x128x128xbf16, #tpu.memory_space<vmem>>, vector<1x128x128xbf16>
    %10 = vector.shape_cast %9 : vector<1x128x128xbf16> to vector<128x128xbf16>
    %cst_11 = arith.constant dense<0.000000e+00> : vector<80x128xf32>
    %11 = tpu.matmul %8, %10, %cst_11 {dimension_numbers = #tpu.dot_dimension_numbers<[1], [0], [0], [1], [0, 0, 1, 1], [], []>} : vector<80x128xbf16>, vector<128x128xbf16>, vector<80x128xf32> -> vector<80x128xf32>
    %12 = arith.addf %6, %11 : vector<80x128xf32>
    %c0_12 = arith.constant 0 : index
    %c2 = arith.constant 2 : index
    %c0_13 = arith.constant 0 : index
    %13 = vector.load %arg1[%c0_12, %c2, %c0_13] : memref<1x104x128xbf16, #tpu.memory_space<vmem>>, vector<1x80x128xbf16>
    %14 = vector.shape_cast %13 : vector<1x80x128xbf16> to vector<80x128xbf16>
    %c2_14 = arith.constant 2 : index
    %c0_15 = arith.constant 0 : index
    %c0_16 = arith.constant 0 : index
    %15 = vector.load %arg2[%c2_14, %c0_15, %c0_16] : memref<9x128x128xbf16, #tpu.memory_space<vmem>>, vector<1x128x128xbf16>
    %16 = vector.shape_cast %15 : vector<1x128x128xbf16> to vector<128x128xbf16>
    %cst_17 = arith.constant dense<0.000000e+00> : vector<80x128xf32>
    %17 = tpu.matmul %14, %16, %cst_17 {dimension_numbers = #tpu.dot_dimension_numbers<[1], [0], [0], [1], [0, 0, 1, 1], [], []>} : vector<80x128xbf16>, vector<128x128xbf16>, vector<80x128xf32> -> vector<80x128xf32>
    %18 = arith.addf %12, %17 : vector<80x128xf32>
    %c0_18 = arith.constant 0 : index
    %c10 = arith.constant 10 : index
    %c0_19 = arith.constant 0 : index
    %19 = vector.load %arg1[%c0_18, %c10, %c0_19] : memref<1x104x128xbf16, #tpu.memory_space<vmem>>, vector<1x80x128xbf16>
    %20 = vector.shape_cast %19 : vector<1x80x128xbf16> to vector<80x128xbf16>
    %c3 = arith.constant 3 : index
    %c0_20 = arith.constant 0 : index
    %c0_21 = arith.constant 0 : index
    %21 = vector.load %arg2[%c3, %c0_20, %c0_21] : memref<9x128x128xbf16, #tpu.memory_space<vmem>>, vector<1x128x128xbf16>
    %22 = vector.shape_cast %21 : vector<1x128x128xbf16> to vector<128x128xbf16>
    %cst_22 = arith.constant dense<0.000000e+00> : vector<80x128xf32>
    %23 = tpu.matmul %20, %22, %cst_22 {dimension_numbers = #tpu.dot_dimension_numbers<[1], [0], [0], [1], [0, 0, 1, 1], [], []>} : vector<80x128xbf16>, vector<128x128xbf16>, vector<80x128xf32> -> vector<80x128xf32>
    %24 = arith.addf %18, %23 : vector<80x128xf32>
    %c0_23 = arith.constant 0 : index
    %c11 = arith.constant 11 : index
    %c0_24 = arith.constant 0 : index
    %25 = vector.load %arg1[%c0_23, %c11, %c0_24] : memref<1x104x128xbf16, #tpu.memory_space<vmem>>, vector<1x80x128xbf16>
    %26 = vector.shape_cast %25 : vector<1x80x128xbf16> to vector<80x128xbf16>
    %c4 = arith.constant 4 : index
    %c0_25 = arith.constant 0 : index
    %c0_26 = arith.constant 0 : index
    %27 = vector.load %arg2[%c4, %c0_25, %c0_26] : memref<9x128x128xbf16, #tpu.memory_space<vmem>>, vector<1x128x128xbf16>
    %28 = vector.shape_cast %27 : vector<1x128x128xbf16> to vector<128x128xbf16>
    %cst_27 = arith.constant dense<0.000000e+00> : vector<80x128xf32>
    %29 = tpu.matmul %26, %28, %cst_27 {dimension_numbers = #tpu.dot_dimension_numbers<[1], [0], [0], [1], [0, 0, 1, 1], [], []>} : vector<80x128xbf16>, vector<128x128xbf16>, vector<80x128xf32> -> vector<80x128xf32>
    %30 = arith.addf %24, %29 : vector<80x128xf32>
    %c0_28 = arith.constant 0 : index
    %c12 = arith.constant 12 : index
    %c0_29 = arith.constant 0 : index
    %31 = vector.load %arg1[%c0_28, %c12, %c0_29] : memref<1x104x128xbf16, #tpu.memory_space<vmem>>, vector<1x80x128xbf16>
    %32 = vector.shape_cast %31 : vector<1x80x128xbf16> to vector<80x128xbf16>
    %c5 = arith.constant 5 : index
    %c0_30 = arith.constant 0 : index
    %c0_31 = arith.constant 0 : index
    %33 = vector.load %arg2[%c5, %c0_30, %c0_31] : memref<9x128x128xbf16, #tpu.memory_space<vmem>>, vector<1x128x128xbf16>
    %34 = vector.shape_cast %33 : vector<1x128x128xbf16> to vector<128x128xbf16>
    %cst_32 = arith.constant dense<0.000000e+00> : vector<80x128xf32>
    %35 = tpu.matmul %32, %34, %cst_32 {dimension_numbers = #tpu.dot_dimension_numbers<[1], [0], [0], [1], [0, 0, 1, 1], [], []>} : vector<80x128xbf16>, vector<128x128xbf16>, vector<80x128xf32> -> vector<80x128xf32>
    %36 = arith.addf %30, %35 : vector<80x128xf32>
    %c0_33 = arith.constant 0 : index
    %c20 = arith.constant 20 : index
    %c0_34 = arith.constant 0 : index
    %37 = vector.load %arg1[%c0_33, %c20, %c0_34] : memref<1x104x128xbf16, #tpu.memory_space<vmem>>, vector<1x80x128xbf16>
    %38 = vector.shape_cast %37 : vector<1x80x128xbf16> to vector<80x128xbf16>
    %c6 = arith.constant 6 : index
    %c0_35 = arith.constant 0 : index
    %c0_36 = arith.constant 0 : index
    %39 = vector.load %arg2[%c6, %c0_35, %c0_36] : memref<9x128x128xbf16, #tpu.memory_space<vmem>>, vector<1x128x128xbf16>
    %40 = vector.shape_cast %39 : vector<1x128x128xbf16> to vector<128x128xbf16>
    %cst_37 = arith.constant dense<0.000000e+00> : vector<80x128xf32>
    %41 = tpu.matmul %38, %40, %cst_37 {dimension_numbers = #tpu.dot_dimension_numbers<[1], [0], [0], [1], [0, 0, 1, 1], [], []>} : vector<80x128xbf16>, vector<128x128xbf16>, vector<80x128xf32> -> vector<80x128xf32>
    %42 = arith.addf %36, %41 : vector<80x128xf32>
    %c0_38 = arith.constant 0 : index
    %c21 = arith.constant 21 : index
    %c0_39 = arith.constant 0 : index
    %43 = vector.load %arg1[%c0_38, %c21, %c0_39] : memref<1x104x128xbf16, #tpu.memory_space<vmem>>, vector<1x80x128xbf16>
    %44 = vector.shape_cast %43 : vector<1x80x128xbf16> to vector<80x128xbf16>
    %c7 = arith.constant 7 : index
    %c0_40 = arith.constant 0 : index
    %c0_41 = arith.constant 0 : index
    %45 = vector.load %arg2[%c7, %c0_40, %c0_41] : memref<9x128x128xbf16, #tpu.memory_space<vmem>>, vector<1x128x128xbf16>
    %46 = vector.shape_cast %45 : vector<1x128x128xbf16> to vector<128x128xbf16>
    %cst_42 = arith.constant dense<0.000000e+00> : vector<80x128xf32>
    %47 = tpu.matmul %44, %46, %cst_42 {dimension_numbers = #tpu.dot_dimension_numbers<[1], [0], [0], [1], [0, 0, 1, 1], [], []>} : vector<80x128xbf16>, vector<128x128xbf16>, vector<80x128xf32> -> vector<80x128xf32>
    %48 = arith.addf %42, %47 : vector<80x128xf32>
    %c0_43 = arith.constant 0 : index
    %c22 = arith.constant 22 : index
    %c0_44 = arith.constant 0 : index
    %49 = vector.load %arg1[%c0_43, %c22, %c0_44] : memref<1x104x128xbf16, #tpu.memory_space<vmem>>, vector<1x80x128xbf16>
    %50 = vector.shape_cast %49 : vector<1x80x128xbf16> to vector<80x128xbf16>
    %c8 = arith.constant 8 : index
    %c0_45 = arith.constant 0 : index
    %c0_46 = arith.constant 0 : index
    %51 = vector.load %arg2[%c8, %c0_45, %c0_46] : memref<9x128x128xbf16, #tpu.memory_space<vmem>>, vector<1x128x128xbf16>
    %52 = vector.shape_cast %51 : vector<1x128x128xbf16> to vector<128x128xbf16>
    %cst_47 = arith.constant dense<0.000000e+00> : vector<80x128xf32>
    %53 = tpu.matmul %50, %52, %cst_47 {dimension_numbers = #tpu.dot_dimension_numbers<[1], [0], [0], [1], [0, 0, 1, 1], [], []>} : vector<80x128xbf16>, vector<128x128xbf16>, vector<80x128xf32> -> vector<80x128xf32>
    %54 = arith.addf %48, %53 : vector<80x128xf32>
    %c0_48 = arith.constant 0 : index
    %c0_49 = arith.constant 0 : index
    %c0_50 = arith.constant 0 : index
    %55 = vector.load %arg3[%c0_48, %c0_49, %c0_50] : memref<1x80x128xf32, #tpu.memory_space<vmem>>, vector<1x80x128xf32>
    %56 = vector.shape_cast %55 : vector<1x80x128xf32> to vector<80x128xf32>
    %57 = arith.addf %54, %56 : vector<80x128xf32>
    %c0_51 = arith.constant 0 : index
    %c0_52 = arith.constant 0 : index
    %c0_53 = arith.constant 0 : index
    %58 = vector.load %arg4[%c0_51, %c0_52, %c0_53] : memref<1x80x128xf32, #tpu.memory_space<vmem>>, vector<1x80x128xf32>
    %59 = vector.shape_cast %58 : vector<1x80x128xf32> to vector<80x128xf32>
    %60 = vector.shape_cast %57 : vector<80x128xf32> to vector<1x80x128xf32>
    tpu.vector_store %arg4[%c0_51, %c0_52, %c0_53], %60 {strides = array<i32>} : memref<1x80x128xf32, #tpu.memory_space<vmem>>, vector<1x80x128xf32>,
    return
  }
  func.func @transform_0(%arg0: i32) -> (i32, i32, i32) {
    %c0_i32 = arith.constant 0 : i32
    %c0_i32_0 = arith.constant 0 : i32
    %c0_i32_1 = arith.constant 0 : i32
    return %arg0, %c0_i32, %c0_i32_0 : i32, i32, i32
  }
  func.func @transform_1(%arg0: i32) -> (i32, i32, i32) {
    %c0_i32 = arith.constant 0 : i32
    %c0_i32_0 = arith.constant 0 : i32
    %c0_i32_1 = arith.constant 0 : i32
    %c0_i32_2 = arith.constant 0 : i32
    return %c0_i32, %c0_i32_0, %c0_i32_1 : i32, i32, i32
  }
  func.func @transform_2(%arg0: i32) -> (i32, i32, i32) {
    %c0_i32 = arith.constant 0 : i32
    %c0_i32_0 = arith.constant 0 : i32
    %c0_i32_1 = arith.constant 0 : i32
    return %arg0, %c0_i32, %c0_i32_0 : i32, i32, i32
  }
  func.func @transform_3(%arg0: i32) -> (i32, i32, i32) {
    %c0_i32 = arith.constant 0 : i32
    %c0_i32_0 = arith.constant 0 : i32
    %c0_i32_1 = arith.constant 0 : i32
    return %arg0, %c0_i32, %c0_i32_0 : i32, i32, i32
  }
}

</mosaic_0001>

<bundles_post_ra>
// kernel: basic_block_forward.3
= control target key start
LH: loop header
LB: loop body
LE: loop exit
PB: predicated region body
PF: predicated region fallthrough
CT: control target
= control target key end

     0   :  { %s3795_s24 = smov 0   ;;  %s4778_s0 = inlined_call_operand.vmem [shape: bf16[2,352,128], index: 0, kind: input, shape index: {}]   ;;  %s4779_s1 = inlined_call_operand.vmem [shape: bf16[9,128,128], index: 1, kind: input, shape index: {}]   ;;  %s4780_s2 = inlined_call_operand.vmem [shape: f32[1,128], index: 2, kind: input, shape index: {}]   ;;  %s4781_s3 = inlined_call_operand.vmem [shape: f32[1,128], index: 3, kind: input, shape index: {}]   ;;  %s4782_s4 = inlined_call_operand.vmem [shape: f32[352,1], index: 4, kind: input, shape index: {}]   ;;  %s4783_s5 = inlined_call_operand.vmem [shape: f32[1,128], index: 5, kind: input, shape index: {}]   ;;  %s4784_s6 = inlined_call_operand.vmem [shape: f32[1,128], index: 6, kind: input, shape index: {}]   ;;  %s4785_s7 = inlined_call_operand.vmem [shape: bf16[2,72,128], index: 7, kind: output, shape index: {}]  }
   0x1 LB: > { %s2693_s25 = sadd.s32 4294967295, %s3750_s24   ;;  %p2697_p0 = scmp.ge.s32.totalorder %s3750_s24, 1  ;;  %s3750_s24 = sphi %s3795_s24, %s17_s24  }
   0x2   : > { %p237_p1 = scmp.lt.s32.totalorder %s3750_s24, 3 }
   0x4   : > { %p238_p2 = pnand %p2697_p0, %p237_p1 }
   0x5   : > { %v636_v0 = vld [vmem:[%s4782_s4 + $0x110] sm:$0xff] (!%p238_p2)  ;;  %v634_v1 = vld [vmem:[%s4782_s4 + $0x100] sm:$0xff] (!%p238_p2)  ;;  %v3752_v2 = vmov (!%p238_p2), 0   ;;  %v637_v3 = vld [vmem:[%s4782_s4 + $0x118] sm:$0xff] (!%p238_p2)  ;;  %v3753_v5 = vmov (!%p238_p2), 0.0   ;;  %vm3754_vm0 = vmmov (!%p238_p2), 0  }
   0x6   : > { %241 = sbr.rel (%p238_p2) target bundleno = 556 (0x22c), region = 48  ;;  %3671 = vset.pattern.permute.xlu1 (!%p238_p2), %v3752_v2  ;;  %3670 = vset.pattern.permute.xlu0 (!%p238_p2), %v3752_v2  ;;  %v635_v4 = vld [vmem:[%s4782_s4 + $0x108] sm:$0xff] (!%p238_p2)  ;;  %v638_v7 = vld [vmem:[%s4782_s4 + $0x120] sm:$0xff] (!%p238_p2)  ;;  %v613_v8 = vld [vmem:[%s4782_s4 + $0x58] sm:$0xff] (!%p238_p2)  ;;  %p269_p3 = scmp.lt.s32.totalorder (!%p238_p2), %s2693_s25, 1  ;;  %vm1002_vm12 = vcmask (!%p238_p2), 1043456  }
   0x7   : > { %818 = vperm.xlu1 (!%p238_p2), %3671, %v636_v0   ;;  %808 = vperm.xlu0 (!%p238_p2), %3670, %v634_v1   ;;  %v639_v6 = vld [vmem:[%s4782_s4 + $0x128] sm:$0xff] (!%p238_p2)  ;;  %v612_v9 = vld [vmem:[%s4782_s4 + $0x50] sm:$0xff] (!%p238_p2)  ;;  %v614_v11 = vld [vmem:[%s4782_s4 + $0x60] sm:$0xff] (!%p238_p2) }
   0x8   : > { %3317 = vmatprep.subr.bf16.mxu0 (!%p238_p2), %v3753_v5  ;;  %3173 = vmatprep.subr.bf16.mxu1 (!%p238_p2), %v3753_v5  ;;  %v615_v10 = vld [vmem:[%s4782_s4 + $0x68] sm:$0xff] (!%p238_p2)  ;;  %v3672_v12 = vld [vmem:[%s4779_s1 + $0x100] sm:$0xff] (!%p238_p2)   ;;  %v641_v15 = vld [vmem:[%s4782_s4 + $0x138] sm:$0xff] (!%p238_p2) }
   0x9   : > { %3318 = vmatpush3.bf16.msra.mxu0 (!%p238_p2), %v3672_v12  ;;  %v3673_v13 = vld [vmem:[%s4779_s1 + $0x108] sm:$0xff] (!%p238_p2)   ;;  %v3675_v14 = vld [vmem:[%s4779_s1 + $0x40] sm:$0xff] (!%p238_p2)   ;;  %v640_v16 = vld [vmem:[%s4782_s4 + $0x130] sm:$0xff] (!%p238_p2)  ;;  %3333 = vmatprep.mubr.msk.bf16.mxu0 (!%p238_p2), %vm3754_vm0, %v3753_v5 }
   0xa   : > { %3319 = vmatprep.subr.bf16.mxu0 (!%p238_p2), %v3753_v5  ;;  %v3674_v17 = vld [vmem:[%s4779_s1 + $0x110] sm:$0xff] (!%p238_p2)   ;;  %3174 = vmatpush3.bf16.msra.mxu1 (!%p238_p2), %v3675_v14  ;;  %v3677_v18 = vld [vmem:[%s4779_s1 + $0x48] sm:$0xff] (!%p238_p2)   ;;  %v617_v19 = vld [vmem:[%s4782_s4 + $0x78] sm:$0xff] (!%p238_p2) }
   0xb   : > { %823 = vperm.xlu1 (!%p238_p2), %3671, %v637_v3   ;;  %813 = vperm.xlu0 (!%p238_p2), %3670, %v635_v4   ;;  %v616_v20 = vld [vmem:[%s4782_s4 + $0x70] sm:$0xff] (!%p238_p2)  ;;  %v3676_v22 = vld [vmem:[%s4779_s1 + $0x118] sm:$0xff] (!%p238_p2)   ;;  %v643_v23 = vld [vmem:[%s4782_s4 + $0x148] sm:$0xff] (!%p238_p2) }
   0xc   : > { %3175 = vmatprep.subr.bf16.mxu1 (!%p238_p2), %v3753_v5  ;;  %3189 = vmatprep.mubr.msk.bf16.mxu1 (!%p238_p2), %vm3754_vm0, %v3753_v5  ;;  %v3679_v21 = vld [vmem:[%s4779_s1 + $0x50] sm:$0xff] (!%p238_p2)   ;;  %v642_v24 = vld [vmem:[%s4782_s4 + $0x140] sm:$0xff] (!%p238_p2)  ;;  %v3681_v25 = vld [vmem:[%s4779_s1 + $0x58] sm:$0xff] (!%p238_p2)  }
   0xd   : > { %3320 = vmatpush3.bf16.msra.mxu0 %v3673_v13  ;;  %v3678_v26 = vld [vmem:[%s4779_s1 + $0x120] sm:$0xff]   ;;  %v619_v27 = vld [vmem:[%s4782_s4 + $0x88] sm:$0xff]  ;;  %v621_v31 = vld [vmem:[%s4782_s4 + $0x98] sm:$0xff]  ;;  %s4787_s25 = smov (!%p269_p3, %s2693_s25), 1 }
   0xe   : > { %3321 = vmatprep.subr.bf16.mxu0 %v3753_v5  ;;  %3176 = vmatpush3.bf16.msra.mxu1 %v3677_v18  ;;  %v618_v28 = vld [vmem:[%s4782_s4 + $0x80] sm:$0xff]  ;;  %v3680_v30 = vld [vmem:[%s4779_s1 + $0x128] sm:$0xff]   ;;  %v620_v32 = vld [vmem:[%s4782_s4 + $0x90] sm:$0xff]  ;;  %s3657_s19 = smul.u32 176, %s4787_s25 }
   0xf   : > { %833 = vperm.xlu1 %3671, %v639_v6   ;;  %828 = vperm.xlu0 %3670, %v638_v7   ;;  %v3683_v29 = vld [vmem:[%s4779_s1 + $0x60] sm:$0xff]   ;;  %v3685_v33 = vld [vmem:[%s4779_s1 + $0x68] sm:$0xff]   ;;  %v3682_v34 = vld [vmem:[%s4779_s1 + $0x130] sm:$0xff]   ;;  %s3658_s17 = smul.u32 36, %s4787_s25 }
  0x10   : > { %3177 = vmatprep.subr.bf16.mxu1 %v3753_v5  ;;  %v625_v35 = vld [vmem:[%s4782_s4 + $0xb8] sm:$0xff]  ;;  %v624_v36 = vld [vmem:[%s4782_s4 + $0xb0] sm:$0xff]  ;;  %v627_v39 = vld [vmem:[%s4782_s4 + $0xc8] sm:$0xff]  ;;  %s3991_s28 = scalar_lea.vmem %s4778_s0, %s3657_s19 }
  0x11   : > { %3322 = vmatpush3.bf16.msra.mxu0 %v3674_v17  ;;  %v3687_v37 = vld [vmem:[%s4779_s1 + $0x70] sm:$0xff]   ;;  %v3684_v38 = vld [vmem:[%s4779_s1 + $0x138] sm:$0xff]   ;;  %v626_v40 = vld [vmem:[%s4782_s4 + $0xc0] sm:$0xff]  ;;  %s4751_s20 = scalar_lea.vmem %s4785_s7, %s3658_s17 }
  0x12   : > { %3323 = vmatprep.subr.bf16.mxu0 %v3753_v5  ;;  %3178 = vmatpush3.bf16.msra.mxu1 %v3679_v21  ;;  %v3689_v41 = vld [vmem:[%s4779_s1 + $0x78] sm:$0xff]   ;;  %v628_v43 = vld [vmem:[%s4782_s4 + $0xd0] sm:$0xff]  ;;  %v603_v44 = vld [vmem:[%s4782_s4 + $0x8] sm:$0xff] }
  0x13   : > { %703 = vperm.xlu1 %3671, %v613_v8   ;;  %698 = vperm.xlu0 %3670, %v612_v9   ;;  %v629_v42 = vld [vmem:[%s4782_s4 + $0xd8] sm:$0xff]  ;;  %v602_v45 = vld [vmem:[%s4782_s4] sm:$0xff]  ;;  %v631_v46 = vld [vmem:[%s4782_s4 + $0xe8] sm:$0xff] }
  0x14   : > { %3179 = vmatprep.subr.bf16.mxu1 %v3753_v5  ;;  %v630_v47 = vld [vmem:[%s4782_s4 + $0xe0] sm:$0xff]  ;;  %v605_v48 = vld [vmem:[%s4782_s4 + $0x18] sm:$0xff]  ;;  %v604_v49 = vld [vmem:[%s4782_s4 + $0x10] sm:$0xff] }
  0x15   : > { %3324 = vmatpush3.bf16.msra.mxu0 %v3676_v22  ;;  %v633_v50 = vld [vmem:[%s4782_s4 + $0xf8] sm:$0xff]  ;;  %v632_v51 = vld [vmem:[%s4782_s4 + $0xf0] sm:$0xff]  ;;  %v607_v52 = vld [vmem:[%s4782_s4 + $0x28] sm:$0xff] }
  0x16   : > { %3325 = vmatprep.subr.bf16.mxu0 %v3753_v5  ;;  %3180 = vmatpush3.bf16.msra.mxu1 %v3681_v25  ;;  %v606_v53 = vld [vmem:[%s4782_s4 + $0x20] sm:$0xff]  ;;  %v3033_v54 = vld [vmem:[%s3991_s28 + $0x10] sm:$0xff]   ;;  %v3034_v55 = vld [vmem:[%s3991_s28 + $0x18] sm:$0xff]  }
  0x17   : > { %713 = vperm.xlu1 %3671, %v615_v10   ;;  %708 = vperm.xlu0 %3670, %v614_v11   ;;  %v609_v56 = vld [vmem:[%s4782_s4 + $0x38] sm:$0xff]  ;;  %v608_v57 = vld [vmem:[%s4782_s4 + $0x30] sm:$0xff]  ;;  %v2935_v58 = vunpack.c.h.bf16 %v3033_v54  ;;  %v2934_v59 = vunpack.c.l.bf16 %v3033_v54  ;;  %v2939_v60 = vunpack.c.h.bf16 %v3034_v55  ;;  %v611_v61 = vld [vmem:[%s4782_s4 + $0x48] sm:$0xff]  ;;  %v2938_v4 = vunpack.c.l.bf16 %v3034_v55 }
  0x18   : > { %3181 = vmatprep.subr.bf16.mxu1 %v3753_v5  ;;  %v610_v62 = vld [vmem:[%s4782_s4 + $0x40] sm:$0xff]  ;;  %v3041_v8 = vld [vmem:[%s3991_s28 + $0x50] sm:$0xff]   ;;  %v623_v9 = vld [vmem:[%s4782_s4 + $0xa8] sm:$0xff] }
  0x19   : > { %3326 = vmatpush3.bf16.msra.mxu0 %v3678_v26  ;;  %v4010_v63 = vld [vmem:[%s4780_s2] ss:$0 sm:$0xff]  ;;  %v2967_v13 = vunpack.c.h.bf16 %v3041_v8  ;;  %v2966_v14 = vunpack.c.l.bf16 %v3041_v8 }
  0x1a   : > { %3327 = vmatprep.subr.bf16.mxu0 %v3753_v5  ;;  %3182 = vmatpush3.bf16.msra.mxu1 %v3683_v29  ;;  %v3035_v0 = vld [vmem:[%s3991_s28 + $0x20] sm:$0xff]   ;;  %v4014_v1 = vmul.f32 %v2935_v58, %v4010_v63  ;;  %v4017_v2 = vmul.f32 %v2934_v59, %v4010_v63  ;;  %v4020_v3 = vmul.f32 %v2939_v60, %v4010_v63  ;;  %v3038_v58 = vld [vmem:[%s3991_s28 + $0x38] sm:$0xff]  }
  0x1b   : > { %843 = vperm.xlu1 %3671, %v641_v15   ;;  %838 = vperm.xlu0 %3670, %v640_v16   ;;  %v4023_v6 = vmul.f32 %v2938_v4, %v4010_v63  ;;  %v2943_v7 = vunpack.c.h.bf16 %v3035_v0  ;;  %v622_v10 = vld [vmem:[%s4782_s4 + $0xa0] sm:$0xff]  ;;  %v2942_v12 = vunpack.c.l.bf16 %v3035_v0  ;;  %v645_v15 = vld [vmem:[%s4782_s4 + $0x158] sm:$0xff]  ;;  %v644_v16 = vld [vmem:[%s4782_s4 + $0x150] sm:$0xff]  ;;  %v4045_v18 = vmul.f32 %v2967_v13, %v4010_v63 }
  0x1c   : > { %3183 = vmatprep.subr.bf16.mxu1 %v3753_v5  ;;  %v3047_v21 = vld [vmem:[%s3991_s28 + $0x80] sm:$0xff]  }
  0x1d   : > { %3328 = vmatpush3.bf16.msra.mxu0 %v3680_v30  ;;  %v4033_v11 = vmul.f32 %v2943_v7, %v4010_v63  ;;  %v4042_v17 = vmul.f32 %v2942_v12, %v4010_v63  ;;  %v2991_v26 = vunpack.c.h.bf16 %v3047_v21  ;;  %v2955_v12 = vunpack.c.h.bf16 %v3038_v58  ;;  %v3051_v13 = vld [vmem:[%s3991_s28 + $0xa0] sm:$0xff]  }
  0x1e   : > { %3329 = vmatprep.subr.bf16.mxu0 %v3753_v5  ;;  %3184 = vmatpush3.bf16.msra.mxu1 %v3685_v33  ;;  %v4060_v33 = vld [vmem:[%s4781_s3] ss:$0 sm:$0xff] }
  0x1f   : > { %723 = vperm.xlu1 %3671, %v617_v19   ;;  %718 = vperm.xlu0 %3670, %v616_v20   ;;  %v4048_v19 = vmul.f32 %v2966_v14, %v4010_v63  ;;  %v3048_v20 = vld [vmem:[%s3991_s28 + $0x88] sm:$0xff]  }
  0x20   : > { %3185 = vmatprep.subr.bf16.mxu1 %v3753_v5  ;;  %v2994_v22 = vunpack.c.l.bf16 %v3048_v20  ;;  %v2995_v25 = vunpack.c.h.bf16 %v3048_v20 }
  0x21   : > { %3330 = vmatpush3.bf16.msra.mxu0 %v3682_v34  ;;  %v408_v34 = vmul.f32 %v2991_v26, %v4010_v63  ;;  %v3007_v26 = vunpack.c.h.bf16 %v3051_v13 }
  0x22   : > { %3331 = vmatprep.subr.bf16.mxu0 %v3753_v5  ;;  %3186 = vmatpush3.bf16.msra.mxu1 %v3687_v37  ;;  %v409_v29 = vmul.f32 %v2994_v22, %v4010_v63 }
  0x23   : > { %853 = vperm.xlu1 %3671, %v643_v23   ;;  %848 = vperm.xlu0 %3670, %v642_v24   ;;  %v3049_v23 = vld [vmem:[%s3991_s28 + $0x90] sm:$0xff]   ;;  %v2990_v24 = vunpack.c.l.bf16 %v3047_v21 }
  0x24   : > { %3187 = vmatprep.subr.bf16.mxu1 %v3753_v5  ;;  %v460_v37 = vadd.f32 %v4060_v33, %v409_v29 }
  0x25   : > { %3332 = vmatpush3.bf16.msra.mxu0 %v3684_v38  ;;  %v407_v30 = vmul.f32 %v2990_v24, %v4010_v63 }
  0x26   : > { %3353 = vmatprep.subr.bf16.mxu0 %v3753_v5  ;;  %3188 = vmatpush3.bf16.msra.mxu1 %v3689_v41  ;;  %vm504_vm1 = vcmp.gt.f32.partialorder %v460_v37, 0.0 }
  0x27   : > { %733 = vperm.xlu1 %3671, %v619_v27   ;;  %728 = vperm.xlu0 %3670, %v618_v28   ;;  %v2999_v27 = vunpack.c.h.bf16 %v3049_v23  ;;  %v2998_v28 = vunpack.c.l.bf16 %v3049_v23  ;;  %v2954_v23 = vunpack.c.l.bf16 %v3038_v58 }
  0x28   : > { %3209 = vmatprep.subr.bf16.mxu1 %v3753_v5 }
  0x2b   : > { %743 = vperm.xlu1 %3671, %v621_v31   ;;  %738 = vperm.xlu0 %3670, %v620_v32   ;;  %v410_v31 = vmul.f32 %v2995_v25, %v4010_v63  ;;  %v3036_v32 = vld [vmem:[%s3991_s28 + $0x28] sm:$0xff]  }
  0x2c   : > { %v2947_v38 = vunpack.c.h.bf16 %v3036_v32  ;;  %v2946_v41 = vunpack.c.l.bf16 %v3036_v32  ;;  %v3006_v32 = vunpack.c.l.bf16 %v3051_v13 }
  0x2f   : > { %763 = vperm.xlu1 %3671, %v625_v35   ;;  %758 = vperm.xlu0 %3670, %v624_v36   ;;  %v412_v35 = vmul.f32 %v2999_v27, %v4010_v63  ;;  %v411_v36 = vmul.f32 %v2998_v28, %v4010_v63 }
  0x33   : > { %773 = vperm.xlu1 %3671, %v627_v39   ;;  %768 = vperm.xlu0 %3670, %v626_v40   ;;  %v458_v39 = vadd.f32 %v4060_v33, %v407_v30  ;;  %v461_v40 = vadd.f32 %v4060_v33, %v410_v31  ;;  %v390_v31 = vmul.f32 %v2955_v12, %v4010_v63 }
  0x35   : > { %vm502_vm2 = vcmp.gt.f32.partialorder %v458_v39, 0.0  ;;  %vm505_vm3 = vcmp.gt.f32.partialorder %v461_v40, 0.0 }
  0x37   : > { %783 = vperm.xlu1 %3671, %v629_v42   ;;  %778 = vperm.xlu0 %3670, %v628_v43   ;;  %v3037_v42 = vld [vmem:[%s3991_s28 + $0x30] sm:$0xff]   ;;  %v459_v43 = vadd.f32 %v4060_v33, %v408_v34 }
  0x38   : > { %v2950_v54 = vunpack.c.l.bf16 %v3037_v42 }
  0x39   : > { %vm503_vm4 = vcmp.gt.f32.partialorder %v459_v43, 0.0 }
  0x3b   : > { %653 = vperm.xlu1 %3671, %v603_v44   ;;  %648 = vperm.xlu0 %3670, %v602_v45   ;;  %v463_v44 = vadd.f32 %v4060_v33, %v412_v35  ;;  %v462_v45 = vadd.f32 %v4060_v33, %v411_v36 }
  0x3d   : > { %vm507_vm5 = vcmp.gt.f32.partialorder %v463_v44, 0.0  ;;  %vm506_vm6 = vcmp.gt.f32.partialorder %v462_v45, 0.0 }
  0x3f   : > { %793 = vperm.xlu1 %3671, %v631_v46   ;;  %788 = vperm.xlu0 %3670, %v630_v47   ;;  %v3050_v46 = vld [vmem:[%s3991_s28 + $0x98] sm:$0xff]   ;;  %v548_v47 = vmul.f32 0.1, %v460_v37 }
  0x40   : > { %v3003_v55 = vunpack.c.h.bf16 %v3050_v46  ;;  %v3002_v0 = vunpack.c.l.bf16 %v3050_v46 }
  0x42   : > { %v413_v25 = vmul.f32 %v3002_v0, %v4010_v63 }
  0x43   : > { %663 = vperm.xlu1 %3671, %v605_v48   ;;  %658 = vperm.xlu0 %3670, %v604_v49   ;;  %v386_v48 = vmul.f32 %v2947_v38, %v4010_v63  ;;  %v2951_v49 = vunpack.c.h.bf16 %v3037_v42 }
  0x45   : > { %v437_v59 = vadd.f32 %v4060_v33, %v386_v48  ;;  %v388_v60 = vmul.f32 %v2951_v49, %v4010_v63 }
  0x47   : > { %803 = vperm.xlu1 %3671, %v633_v50   ;;  %798 = vperm.xlu0 %3670, %v632_v51   ;;  %v549_v50 = vmul.f32 0.1, %v461_v40  ;;  %v385_v51 = vmul.f32 %v2946_v41, %v4010_v63  ;;  %vm481_vm7 = vcmp.gt.f32.partialorder %v437_v59, 0.0  ;;  %v525_v21 = vmul.f32 0.1, %v437_v59 }
  0x48   : > { %v439_v22 = vadd.f32 %v4060_v33, %v388_v60 }
  0x49   : > { %v593_v8 = vsel %vm505_vm3, %v461_v40, %v549_v50  ;;  %v569_v38 = vsel %vm481_vm7, %v437_v59, %v525_v21  ;;  %v389_v40 = vmul.f32 %v2954_v23, %v4010_v63  ;;  %v415_v50 = vmul.f32 %v3006_v32, %v4010_v63 }
  0x4a   : > { %vm483_vm9 = vcmp.gt.f32.partialorder %v439_v22, 0.0 }
  0x4b   : > { %673 = vperm.xlu1 %3671, %v607_v52   ;;  %668 = vperm.xlu0 %3670, %v606_v53   ;;  %v546_v52 = vmul.f32 0.1, %v458_v39  ;;  %v547_v53 = vmul.f32 0.1, %v459_v43 }
  0x4d   : > { %v590_v14 = vsel %vm502_vm2, %v458_v39, %v546_v52  ;;  %v527_v39 = vmul.f32 0.1, %v439_v22 }
  0x4f   : > { %683 = vperm.xlu1 %3671, %v609_v56   ;;  %678 = vperm.xlu0 %3670, %v608_v57   ;;  %v551_v56 = vmul.f32 0.1, %v463_v44  ;;  %v550_v57 = vmul.f32 0.1, %v462_v45  ;;  %v571_v59 = vsel %vm483_vm9, %v439_v22, %v527_v39 }
  0x51   : > { %v594_v20 = vsel %vm506_vm6, %v462_v45, %v550_v57  ;;  %v3039_v45 = vld [vmem:[%s3991_s28 + $0x40] sm:$0xff]  }
  0x52   : > { %v2958_v57 = vunpack.c.l.bf16 %v3039_v45 }
  0x53   : > { %693 = vperm.xlu1 %3671, %v611_v61   ;;  %688 = vperm.xlu0 %3670, %v610_v62   ;;  %v592_v61 = vsel %vm504_vm1, %v460_v37, %v548_v47  ;;  %v436_v62 = vadd.f32 %v4060_v33, %v385_v51 }
  0x55   : > { %vm480_vm8 = vcmp.gt.f32.partialorder %v436_v62, 0.0  ;;  %v524_v24 = vmul.f32 0.1, %v436_v62 }
  0x57   : > { %753 = vperm.xlu1 %3671, %v623_v9   ;;  %748 = vperm.xlu0 %3670, %v622_v10   ;;  %v387_v9 = vmul.f32 %v2950_v54, %v4010_v63  ;;  %v414_v10 = vmul.f32 %v3003_v55, %v4010_v63  ;;  %v568_v54 = vsel %vm480_vm8, %v436_v62, %v524_v24 }
  0x58   : > { %v440_v55 = vadd.f32 %v4060_v33, %v389_v40  ;;  %v466_v62 = vadd.f32 %v4060_v33, %v415_v50 }
  0x59   : > { %v438_v29 = vadd.f32 %v4060_v33, %v387_v9  ;;  %v465_v30 = vadd.f32 %v4060_v33, %v414_v10  ;;  %v3040_v9 = vld [vmem:[%s3991_s28 + $0x48] sm:$0xff]  }
  0x5a   : > { %vm484_vm15 = vcmp.gt.f32.partialorder %v440_v55, 0.0  ;;  %v2963_v23 = vunpack.c.h.bf16 %v3040_v9  ;;  %vm510_vm2 = vcmp.gt.f32.partialorder %v466_v62, 0.0 }
  0x5b   : > { %863 = vperm.xlu1 %3671, %v645_v15   ;;  %858 = vperm.xlu0 %3670, %v644_v16   ;;  %v591_v15 = vsel %vm503_vm4, %v459_v43, %v547_v53  ;;  %v595_v16 = vsel %vm507_vm5, %v463_v44, %v551_v56  ;;  %v464_v43 = vadd.f32 %v4060_v33, %v413_v25  ;;  %vm482_vm10 = vcmp.gt.f32.partialorder %v438_v29, 0.0 }
  0x5c   : > { %v416_v44 = vmul.f32 %v3007_v26, %v4010_v63  ;;  %v526_v48 = vmul.f32 0.1, %v438_v29  ;;  %v553_v49 = vmul.f32 0.1, %v465_v30  ;;  %vm509_vm11 = vcmp.gt.f32.partialorder %v465_v30, 0.0 }
  0x5d   : > { %v441_v53 = vadd.f32 %v4060_v33, %v390_v31  ;;  %v2959_v56 = vunpack.c.h.bf16 %v3039_v45  ;;  %v552_v60 = vmul.f32 0.1, %v464_v43  ;;  %vm508_vm13 = vcmp.gt.f32.partialorder %v464_v43, 0.0 }
  0x5f   : > { %vm485_vm14 = vcmp.gt.f32.partialorder %v441_v53, 0.0  ;;  %v529_v13 = vmul.f32 0.1, %v441_v53  ;;  %v596_v22 = vsel %vm508_vm13, %v464_v43, %v552_v60 }
  0x86   : > { %v819_v4 = vpop.permute.xlu1 %818  ;;  %v809_v7 = vpop.permute.xlu0 %808 }
  0x87   : > { %v4093_v34 = vmul.f32 %v819_v4, %v592_v61  ;;  %v898_v35 = vmul.f32 %v809_v7, %v590_v14  ;;  %v467_v61 = vadd.f32 %v4060_v33, %v416_v44  ;;  %v570_v7 = vsel %vm482_vm10, %v438_v29, %v526_v48  ;;  %v3042_v14 = vld [vmem:[%s3991_s28 + $0x58] sm:$0xff]  }
  0x88   : > { %v2962_v29 = vunpack.c.l.bf16 %v3040_v9  ;;  %v394_v44 = vmul.f32 %v2963_v23, %v4010_v63  ;;  %v2970_v50 = vunpack.c.l.bf16 %v3042_v14 }
  0x89   : > { %vm511_vm1 = vcmp.gt.f32.partialorder %v467_v61, 0.0 }
  0x8a   : > { %v824_v27 = vpop.permute.xlu1 %823  ;;  %v814_v28 = vpop.permute.xlu0 %813  ;;  %v393_v48 = vmul.f32 %v2962_v29, %v4010_v63 }
  0x8b   : > { %v901_v36 = vmul.f32 %v824_v27, %v593_v8  ;;  %v899_v37 = vmul.f32 %v814_v28, %v591_v15  ;;  %v597_v8 = vsel %vm509_vm11, %v465_v30, %v553_v49  ;;  %v528_v15 = vmul.f32 0.1, %v440_v55 }
  0x8c   : > { %v555_v27 = vmul.f32 0.1, %v467_v61  ;;  %v554_v28 = vmul.f32 0.1, %v466_v62  ;;  %v2971_v30 = vunpack.c.h.bf16 %v3042_v14 }
  0x8d   : > { %v927_v41 = vpack.c.bf16 %v901_v36, %v4093_v34  ;;  %v926_v42 = vpack.c.bf16 %v899_v37, %v898_v35  ;;  %v3686_v36 = vld [vmem:[%s4779_s1 + $0x140] sm:$0xff]   ;;  %v573_v37 = vsel %vm485_vm14, %v441_v53, %v529_v13  ;;  %v572_v43 = vsel %vm484_vm15, %v440_v55, %v528_v15  ;;  %v3688_v55 = vld [vmem:[%s4779_s1 + $0x148] sm:$0xff]  }
  0x8e   : > { %v834_v46 = vpop.permute.xlu1 %833  ;;  %v829_v47 = vpop.permute.xlu0 %828  ;;  %v398_v49 = vmul.f32 %v2971_v30, %v4010_v63  ;;  %v397_v13 = vmul.f32 %v2970_v50, %v4010_v63 }
  0x8f   : > { %948 = vst [vmem:[#allocation2 + $0x80] sm:$0xff] %v926_v42  ;;  %v4102_v51 = vmul.f32 %v834_v46, %v595_v16  ;;  %v4104_v52 = vmul.f32 %v829_v47, %v594_v20  ;;  %v392_v16 = vmul.f32 %v2959_v56, %v4010_v63  ;;  %v391_v20 = vmul.f32 %v2958_v57, %v4010_v63 }
  0x90   : > { %v1628_v35 = vrot.slane %v927_v41, 4  ;;  %v3043_v41 = vld [vmem:[%s3991_s28 + $0x60] sm:$0xff]   ;;  %v599_v47 = vsel %vm511_vm1, %v467_v61, %v555_v27  ;;  %v598_v56 = vsel %vm510_vm2, %v466_v62, %v554_v28 }
  0x91   : > { %v928_v58 = vpack.c.bf16 %v4102_v51, %v4104_v52  ;;  %v442_v39 = vadd.f32 %v4060_v33, %v391_v20  ;;  %v2975_v60 = vunpack.c.h.bf16 %v3043_v41  ;;  %v2974_v14 = vunpack.c.l.bf16 %v3043_v41  ;;  %v3691_v20 = vld [vmem:[%s4779_s1 + $0x150] sm:$0xff]  }
  0x92   : > { %v704_v0 = vpop.permute.xlu1 %703  ;;  %v699_v4 = vpop.permute.xlu0 %698 }
  0x93   : > { %v877_v10 = vmul.f32 %v704_v0, %v569_v38  ;;  %v876_v12 = vmul.f32 %v699_v4, %v568_v54  ;;  %v443_v38 = vadd.f32 %v4060_v33, %v392_v16  ;;  %v4151_v0 = vrot.slane %v928_v58, 4  ;;  %v3690_v16 = vld [vmem:[%s4779_s1] sm:$0xff]  }
  0x94   : > { %vm486_vm4 = vcmp.gt.f32.partialorder %v442_v39, 0.0  ;;  %v445_v4 = vadd.f32 %v4060_v33, %v394_v44  ;;  %v400_v23 = vmul.f32 %v2975_v60, %v4010_v63  ;;  %v3694_v60 = vld [vmem:[%s4779_s1 + $0x10] sm:$0xff]  }
  0x95   : > { %v915_v21 = vpack.c.bf16 %v877_v10, %v876_v12  ;;  %vm487_vm3 = vcmp.gt.f32.partialorder %v443_v38, 0.0  ;;  %v531_v57 = vmul.f32 0.1, %v443_v38  ;;  %v444_v10 = vadd.f32 %v4060_v33, %v393_v48 }
  0x96   : > { %v714_v24 = vpop.permute.xlu1 %713  ;;  %v709_v25 = vpop.permute.xlu0 %708  ;;  %v1600_v26 = vld [vmem:[#allocation2 + $0x80] sm:$0xf0]  ;;  %v4159_v12 = vadd.f32 %v4060_v33, %v398_v49  ;;  %v533_v28 = vmul.f32 0.1, %v445_v4  ;;  %vm489_vm5 = vcmp.gt.f32.partialorder %v445_v4, 0.0 }
  0x97   : > { %937 = vst [vmem:[#allocation2 + $0x28] sm:$0xff] %v915_v21  ;;  %v879_v31 = vmul.f32 %v714_v24, %v571_v59  ;;  %v878_v32 = vmul.f32 %v709_v25, %v570_v7  ;;  %v1627_v34 = vrot.slane %v1600_v26, 4  ;;  %v530_v59 = vmul.f32 0.1, %v442_v39  ;;  %v4155_v7 = vld [vmem:[%s3991_s28 + $0x68] sm:$0xff]  }
  0x98   : > { %v575_v21 = vsel %vm487_vm3, %v443_v38, %v531_v57  ;;  %v2979_v24 = vunpack.c.h.bf16 %v4155_v7  ;;  %v1631_v26 = vsel %vm1002_vm12, %v1628_v35, %v4151_v0  ;;  %vm488_vm6 = vcmp.gt.f32.partialorder %v444_v10, 0.0  ;;  %v3693_v38 = vld [vmem:[%s4779_s1 + $0x158] sm:$0xff]  }
  0x99   : > { %v4125_v40 = vpack.c.bf16 %v879_v31, %v878_v32  ;;  %v1629_v42 = vsel %vm1002_vm12, %v1627_v34, %v1628_v35  ;;  %v532_v31 = vmul.f32 0.1, %v444_v10  ;;  %v448_v32 = vadd.f32 %v4060_v33, %v397_v13 }
  0x9a   : > { %v844_v45 = vpop.permute.xlu1 %843  ;;  %v839_v46 = vpop.permute.xlu0 %838  ;;  %3334 = vmatmul.mubr.bf16.vlgmr.msra.gmra.mrb[0].mxu0 %v1629_v42  ;;  %v399_v34 = vmul.f32 %v2974_v14, %v4010_v63  ;;  %vm493_vm7 = vcmp.gt.f32.partialorder %v4159_v12, 0.0  ;;  %v537_v42 = vmul.f32 0.1, %v4159_v12  ;;  %v402_v44 = vmul.f32 %v2979_v24, %v4010_v63  ;;  %v3032_v24 = vld [vmem:[%s3991_s28 + $0x8] sm:$0xff]  }
  0x9b   : > { %938 = vst [vmem:[#allocation2 + $0x30] sm:$0xff] %v4125_v40  ;;  %v4135_v53 = vmul.f32 %v844_v45, %v597_v8  ;;  %v4137_v54 = vmul.f32 %v839_v46, %v596_v22  ;;  %3354 = vmatpush3.bf16.msra.mxu0 %v3686_v36  ;;  %3337 = vmatprep.mubr.msk.bf16.mxu0 %vm3754_vm0, %v3753_v5  ;;  %v1004_v58 = vrot.slane %v4125_v40, 4  ;;  %v2978_v41 = vunpack.c.l.bf16 %v4155_v7  ;;  %v3045_v7 = vld [vmem:[%s3991_s28 + $0x70] sm:$0xff]   ;;  %v3696_v40 = vld [vmem:[%s4779_s1 + $0x18] sm:$0xff]  }
  0x9c   : > { %3355 = vmatprep.subr.bf16.mxu0 %v3753_v5  ;;  %v574_v22 = vsel %vm486_vm4, %v442_v39, %v530_v59  ;;  %v2925_v39 = vld [vmem:[%s3991_s28] sm:$0xff]   ;;  %v577_v46 = vsel %vm489_vm5, %v445_v4, %v533_v28  ;;  %vm492_vm8 = vcmp.gt.f32.partialorder %v448_v32, 0.0  ;;  %vm1275_vm4 = vsmask.f32 7424 }
  0x9d   : > { %v929_v61 = vpack.c.bf16 %v4135_v53, %v4137_v54  ;;  %v576_v53 = vsel %vm488_vm6, %v444_v10, %v532_v31  ;;  %v536_v54 = vmul.f32 0.1, %v448_v32  ;;  %v2926_v4 = vunpack.c.l.bf16 %v2925_v39 }
  0x9e   : > { %v724_v8 = vpop.permute.xlu1 %723  ;;  %v719_v62 = vpop.permute.xlu0 %718  ;;  %v975_v9 = vld [vmem:[#allocation2 + $0x28] sm:$0xf0]  ;;  %v401_v10 = vmul.f32 %v2978_v41, %v4010_v63  ;;  %v3698_v41 = vld [vmem:[%s4779_s1 + $0x20] sm:$0xff]  }
  0x9f   : > { %v881_v15 = vmul.f32 %v724_v8, %v573_v37  ;;  %v880_v51 = vmul.f32 %v719_v62, %v572_v43  ;;  %3356 = vmatpush3.bf16.msra.mxu0 %v3688_v55  ;;  %v1003_v52 = vrot.slane %v975_v9, 4  ;;  %v3692_v37 = vld [vmem:[%s4779_s1 + $0x8] sm:$0xff]   ;;  %v451_v43 = vadd.f32 %v4060_v33, %v400_v23 }
  0xa0   : > { %3357 = vmatprep.subr.bf16.mxu0 %v3753_v5  ;;  %v450_v55 = vadd.f32 %v4060_v33, %v399_v34  ;;  %v581_v8 = vsel %vm493_vm7, %v4159_v12, %v537_v42  ;;  %v453_v9 = vadd.f32 %v4060_v33, %v402_v44  ;;  %v375_v23 = vmul.f32 %v2926_v4, %v4010_v63 }
  0xa1   : > { %v4174_v25 = vpack.c.bf16 %v881_v15, %v880_v51  ;;  %v1005_v27 = vsel %vm1002_vm12, %v1003_v52, %v1004_v58  ;;  %v539_v62 = vmul.f32 0.1, %v451_v43  ;;  %vm495_vm9 = vcmp.gt.f32.partialorder %v451_v43, 0.0 }
  0xa2   : > { %v854_v29 = vpop.permute.xlu1 %853  ;;  %v849_v30 = vpop.permute.xlu0 %848  ;;  %3338 = vmatmul.mubr.bf16.gmra.mrb[4].mxu0 %v1631_v26  ;;  %3190 = vmatmul.mubr.bf16.vlgmr.msra.gmra.mrb[0].mxu1 %v1005_v27  ;;  %v580_v52 = vsel %vm492_vm8, %v448_v32, %v536_v54  ;;  %vm494_vm10 = vcmp.gt.f32.partialorder %v450_v55, 0.0  ;;  %v541_v27 = vmul.f32 0.1, %v453_v9  ;;  %v452_v28 = vadd.f32 %v4060_v33, %v401_v10  ;;  %v3046_v54 = vld [vmem:[%s3991_s28 + $0x78] sm:$0xff]  }
  0xa3   : > { %939 = vst [vmem:[#allocation2 + $0x38] sm:$0xff] %v4174_v25  ;;  %v4184_v36 = vmul.f32 %v854_v29, %v599_v47  ;;  %v4186_v35 = vmul.f32 %v849_v30, %v598_v56  ;;  %3210 = vmatpush3.bf16.msra.mxu1 %v3690_v16  ;;  %3358 = vmatpush3.bf16.msra.mxu0 %v3691_v20  ;;  %v4206_v47 = vrot.slane %v929_v61, 4  ;;  %v1006_v48 = vrot.slane %v4174_v25, 4  ;;  %v3695_v61 = vld [vmem:[%s4779_s1 + $0x160] sm:$0xff]   ;;  %v3700_v25 = vld [vmem:[%s4779_s1 + $0x28] sm:$0xff]  }
  0xa4   : > { %3341 = vmatprep.mubr.msk.bf16.mxu0 %vm3754_vm0, %v3753_v5  ;;  %3211 = vmatprep.subr.bf16.mxu1 %v3753_v5  ;;  %v2927_v56 = vunpack.c.h.bf16 %v2925_v39  ;;  %v538_v16 = vmul.f32 0.1, %v450_v55  ;;  %v583_v26 = vsel %vm495_vm9, %v451_v43, %v539_v62  ;;  %v2982_v29 = vunpack.c.l.bf16 %v3045_v7 }
  0xa5   : > { %v930_v45 = vpack.c.bf16 %v4184_v36, %v4186_v35  ;;  %3359 = vmatprep.subr.bf16.mxu0 %v3753_v5  ;;  %3193 = vmatprep.mubr.msk.bf16.mxu1 %vm3754_vm0, %v3753_v5  ;;  %v1633_v14 = vsel %vm1002_vm12, %v4151_v0, %v4206_v47  ;;  %v1007_v12 = vsel %vm1002_vm12, %v1004_v58, %v1006_v48  ;;  %v3697_v58 = vld [vmem:[%s4779_s1 + $0x168] sm:$0xff]   ;;  %vm497_vm11 = vcmp.gt.f32.partialorder %v453_v9, 0.0 }
  0xa6   : > { %v734_v49 = vpop.permute.xlu1 %733  ;;  %v729_v50 = vpop.permute.xlu0 %728  ;;  %v376_v20 = vmul.f32 %v2927_v56, %v4010_v63  ;;  %v582_v35 = vsel %vm494_vm10, %v450_v55, %v538_v16  ;;  %v2931_v39 = vunpack.c.h.bf16 %v3032_v24  ;;  %v426_v44 = vadd.f32 %v4060_v33, %v375_v23  ;;  %v3702_v23 = vld [vmem:[%s4779_s1 + $0x30] sm:$0xff]  }
  0xa7   : > { %v883_v57 = vmul.f32 %v734_v49, %v575_v21  ;;  %v882_v59 = vmul.f32 %v729_v50, %v574_v22  ;;  %3212 = vmatpush3.bf16.msra.mxu1 %v3692_v37  ;;  %3360 = vmatpush3.bf16.msra.mxu0 %v3693_v38  ;;  %v2983_v21 = vunpack.c.h.bf16 %v3045_v7  ;;  %v4256_v31 = vrot.slane %v930_v45, 4  ;;  %v3699_v49 = vld [vmem:[%s4779_s1 + $0x170] sm:$0xff]  }
  0xa8   : > { %3213 = vmatprep.subr.bf16.mxu1 %v3753_v5  ;;  %3361 = vmatprep.subr.bf16.mxu0 %v3753_v5  ;;  %v427_v37 = vadd.f32 %v4060_v33, %v376_v20  ;;  %v585_v45 = vsel %vm497_vm11, %v453_v9, %v541_v27  ;;  %v403_v50 = vmul.f32 %v2982_v29, %v4010_v63  ;;  %vm496_vm13 = vcmp.gt.f32.partialorder %v452_v28, 0.0 }
  0xa9   : > { %v4228_v13 = vpack.c.bf16 %v883_v57, %v882_v59  ;;  %v404_v38 = vmul.f32 %v2983_v21, %v4010_v63  ;;  %v1635_v56 = vsel %vm1002_vm12, %v4206_v47, %v4256_v31  ;;  %v378_v7 = vmul.f32 %v2931_v39, %v4010_v63 }
  0xaa   : > { %v744_v15 = vpop.permute.xlu1 %743  ;;  %v739_v51 = vpop.permute.xlu0 %738  ;;  %3342 = vmatmul.mubr.bf16.gmra.mrb[8].mxu0 %v1633_v14  ;;  %3194 = vmatmul.mubr.bf16.gmra.mrb[4].mxu1 %v1007_v12  ;;  %vm471_vm14 = vcmp.gt.f32.partialorder %v427_v37, 0.0  ;;  %v514_v47 = vmul.f32 0.1, %v426_v44  ;;  %v454_v10 = vadd.f32 %v4060_v33, %v403_v50  ;;  %v3701_v14 = vld [vmem:[%s4779_s1 + $0x178] sm:$0xff]   ;;  %vm470_vm15 = vcmp.gt.f32.partialorder %v426_v44, 0.0 }
  0xab   : > { %940 = vst [vmem:[#allocation2 + $0x40] sm:$0xff] %v4228_v13  ;;  %v885_v0 = vmul.f32 %v744_v15, %v577_v46  ;;  %v884_v22 = vmul.f32 %v739_v51, %v576_v53  ;;  %3214 = vmatpush3.bf16.msra.mxu1 %v3694_v60  ;;  %3362 = vmatpush3.bf16.msra.mxu0 %v3695_v61  ;;  %v1008_v32 = vrot.slane %v4228_v13, 4  ;;  %v540_v46 = vmul.f32 0.1, %v452_v28 }
  0xac   : > { %3345 = vmatprep.mubr.msk.bf16.mxu0 %vm3754_vm0, %v3753_v5  ;;  %3215 = vmatprep.subr.bf16.mxu1 %v3753_v5  ;;  %v2930_v53 = vunpack.c.l.bf16 %v3032_v24  ;;  %v515_v61 = vmul.f32 0.1, %v427_v37  ;;  %v455_v4 = vadd.f32 %v4060_v33, %v404_v38  ;;  %v2986_v15 = vunpack.c.l.bf16 %v3046_v54 }
  0xad   : > { %v4254_v30 = vpack.c.bf16 %v885_v0, %v884_v22  ;;  %3363 = vmatprep.subr.bf16.mxu0 %v3753_v5  ;;  %3197 = vmatprep.mubr.msk.bf16.mxu1 %vm3754_vm0, %v3753_v5  ;;  %v1009_v57 = vsel %vm1002_vm12, %v1006_v48, %v1008_v32  ;;  %v2987_v48 = vunpack.c.h.bf16 %v3046_v54  ;;  %v584_v9 = vsel %vm496_vm13, %v452_v28, %v540_v46 }
  0xae   : > { %v764_v34 = vpop.permute.xlu1 %763  ;;  %v759_v36 = vpop.permute.xlu0 %758  ;;  %v377_v12 = vmul.f32 %v2930_v53, %v4010_v63  ;;  %v559_v21 = vsel %vm471_vm14, %v427_v37, %v515_v61  ;;  %vm499_vm1 = vcmp.gt.f32.partialorder %v455_v4, 0.0  ;;  %v543_v0 = vmul.f32 0.1, %v455_v4 }
  0xaf   : > { %941 = vst [vmem:[#allocation2 + $0x48] sm:$0xff] %v4254_v30  ;;  %v889_v42 = vmul.f32 %v764_v34, %v581_v8  ;;  %v888_v43 = vmul.f32 %v759_v36, %v580_v52  ;;  %3216 = vmatpush3.bf16.msra.mxu1 %v3696_v40  ;;  %3364 = vmatpush3.bf16.msra.mxu0 %v3697_v58  ;;  %v1010_v52 = vrot.slane %v4254_v30, 4  ;;  %v542_v28 = vmul.f32 0.1, %v454_v10 }
  0xb0   : > { %3217 = vmatprep.subr.bf16.mxu1 %v3753_v5  ;;  %3365 = vmatprep.subr.bf16.mxu0 %v3753_v5  ;;  %v429_v22 = vadd.f32 %v4060_v33, %v378_v7  ;;  %v558_v27 = vsel %vm470_vm15, %v426_v44, %v514_v47  ;;  %v428_v29 = vadd.f32 %v4060_v33, %v377_v12  ;;  %vm498_vm2 = vcmp.gt.f32.partialorder %v454_v10, 0.0  ;;  %v3704_v44 = vld [vmem:[%s4779_s1 + $0x38] sm:$0xff]  }
  0xb1   : > { %v4277_v55 = vpack.c.bf16 %v889_v42, %v888_v43  ;;  %v405_v34 = vmul.f32 %v2986_v15, %v4010_v63  ;;  %v432_v30 = vadd.f32 %v4060_v33, %v4023_v6  ;;  %v447_v6 = vadd.f32 %v4060_v33, %v4045_v18 }
  0xb2   : > { %v774_v59 = vpop.permute.xlu1 %773  ;;  %v769_v60 = vpop.permute.xlu0 %768  ;;  %3346 = vmatmul.mubr.bf16.gmra.mrb[12].mxu0 %v1635_v56  ;;  %3198 = vmatmul.mubr.bf16.gmra.mrb[8].mxu1 %v1009_v57  ;;  %vm473_vm3 = vcmp.gt.f32.partialorder %v429_v22, 0.0  ;;  %v446_v18 = vadd.f32 %v4060_v33, %v4048_v19  ;;  %v3708_v19 = vld [vmem:[%s4779_s1 + $0x88] sm:$0xff]  }
  0xb3   : > { %v891_v8 = vmul.f32 %v774_v59, %v583_v26  ;;  %v890_v62 = vmul.f32 %v769_v60, %v582_v35  ;;  %3349 = vmatprep.mubr.msk.bf16.mxu0 %vm3754_vm0, %v3753_v5  ;;  %3218 = vmatpush3.bf16.msra.mxu1 %v3698_v41  ;;  %v1791_v24 = vshll.u32 %v4277_v55, 16  ;;  %v406_v26 = vmul.f32 %v2987_v48, %v4010_v63 }
  0xb4   : > { %3366 = vmatpush3.bf16.msra.mxu0 %v3699_v49  ;;  %3201 = vmatprep.mubr.msk.bf16.mxu1 %vm3754_vm0, %v3753_v5  ;;  %v1011_v35 = vsel %vm1002_vm12, %v1008_v32, %v1010_v52  ;;  %v517_v63 = vmul.f32 0.1, %v429_v22  ;;  %v587_v41 = vsel %vm499_vm1, %v455_v4, %v543_v0  ;;  %v456_v46 = vadd.f32 %v4060_v33, %v405_v34 }
  0xb5   : > { %v4302_v51 = vpack.c.bf16 %v891_v8, %v890_v62  ;;  %3219 = vmatprep.subr.bf16.mxu1 %v3753_v5  ;;  %3367 = vmatprep.subr.bf16.mxu0 %v3753_v5  ;;  %v1793_v13 = vrot.slane %v1791_v24, 1  ;;  %v457_v32 = vadd.f32 %v4060_v33, %v406_v26  ;;  %vm472_vm12 = vcmp.gt.f32.partialorder %v428_v29, 0.0  ;;  %v3703_v8 = vld [vmem:[%s4779_s1 + $0x180] sm:$0xff]  }
  0xb6   : > { %v784_v16 = vpop.permute.xlu1 %783  ;;  %v779_v20 = vpop.permute.xlu0 %778  ;;  %v1789_v50 = vshrl.u32 %v4277_v55, 16  ;;  %v561_v57 = vsel %vm473_vm3, %v429_v22, %v517_v63  ;;  %v431_v59 = vadd.f32 %v4060_v33, %v4014_v1  ;;  %v430_v60 = vadd.f32 %v4060_v33, %v4017_v2 }
  0xb7   : > { %v893_v40 = vmul.f32 %v784_v16, %v585_v45  ;;  %v892_v58 = vmul.f32 %v779_v20, %v584_v9  ;;  %3220 = vmatpush3.bf16.msra.mxu1 %v3700_v25  ;;  %v1796_v37 = vshll.u32 %v4302_v51, 16  ;;  %v516_v45 = vmul.f32 0.1, %v428_v29  ;;  %v3705_v20 = vld [vmem:[%s4779_s1 + $0x188] sm:$0xff]  }
  0xb8   : > { %3368 = vmatpush3.bf16.msra.mxu0 %v3701_v14  ;;  %3221 = vmatprep.subr.bf16.mxu1 %v3753_v5  ;;  %v1794_v7 = vor.u32 %v1793_v13, %v1789_v50  ;;  %v545_v62 = vmul.f32 0.1, %v457_v32  ;;  %vm501_vm5 = vcmp.gt.f32.partialorder %v457_v32, 0.0  ;;  %v544_v25 = vmul.f32 0.1, %v456_v46 }
  0xb9   : > { %v4318_v36 = vpack.c.bf16 %v893_v40, %v892_v58  ;;  %3389 = vmatprep.subr.bf16.mxu0 %v3753_v5  ;;  %v1798_v53 = vrot.slane %v1796_v37, 1  ;;  %v560_v47 = vsel %vm472_vm12, %v428_v29, %v516_v45  ;;  %v433_v1 = vadd.f32 %v4060_v33, %v4020_v3  ;;  %v3706_v37 = vld [vmem:[%s4779_s1 + $0x80] sm:$0xff]  }
  0xba   : > { %v654_v38 = vpop.permute.xlu1 %653  ;;  %v649_v39 = vpop.permute.xlu0 %648  ;;  %3350 = vmatmul.mubr.bf16.gmra.mrb[16].mxu0 %v4256_v31  ;;  %3202 = vmatmul.mubr.bf16.gmra.mrb[12].mxu1 %v1011_v35  ;;  %v586_v31 = vsel %vm498_vm2, %v454_v10, %v542_v28  ;;  %vm500_vm6 = vcmp.gt.f32.partialorder %v456_v46, 0.0  ;;  %vm475_vm7 = vcmp.gt.f32.partialorder %v431_v59, 0.0  ;;  %v519_v12 = vmul.f32 0.1, %v431_v59 }
  0xbb   : > { %v867_v42 = vmul.f32 %v654_v38, %v559_v21  ;;  %v866_v43 = vmul.f32 %v649_v39, %v558_v27  ;;  %3369 = vmatprep.mubr.msk.bf16.mxu0 %vm3754_vm0, %v3753_v5  ;;  %3222 = vmatpush3.bf16.msra.mxu1 %v3702_v23  ;;  %v1799_v48 = vsel %vm1275_vm4, %v1794_v7, %v1798_v53  ;;  %v1804_v9 = vshll.u32 %v4318_v36, 16  ;;  %v3707_v38 = vld [vmem:[%s4779_s1 + $0x190] sm:$0xff]  }
  0xbc   : > { %3205 = vmatprep.mubr.msk.bf16.mxu1 %vm3754_vm0, %v3753_v5  ;;  %3223 = vmatprep.subr.bf16.mxu1 %v3753_v5  ;;  %v589_v3 = vsel %vm501_vm5, %v457_v32, %v545_v62  ;;  %v518_v21 = vmul.f32 0.1, %v430_v60  ;;  %v588_v0 = vsel %vm500_vm6, %v456_v46, %v544_v25  ;;  %vm474_vm8 = vcmp.gt.f32.partialorder %v430_v60, 0.0  ;;  %v3710_v25 = vld [vmem:[%s4779_s1 + $0x90] sm:$0xff]  }
  0xbd   : > { %v4340_v49 = vpack.c.bf16 %v867_v42, %v866_v43  ;;  %v1800_v40 = vshrl.u32 %v4302_v51, 16  ;;  %v1806_v58 = vrot.slane %v1804_v9, 1  ;;  %vm477_vm9 = vcmp.gt.f32.partialorder %v433_v1, 0.0 }
  0xbe   : > { %v794_v54 = vpop.permute.xlu1 %793  ;;  %v789_v56 = vpop.permute.xlu0 %788  ;;  %v563_v26 = vsel %vm475_vm7, %v431_v59, %v519_v12  ;;  %v521_v27 = vmul.f32 0.1, %v433_v1  ;;  %v434_v28 = vadd.f32 %v4060_v33, %v4042_v17  ;;  %vm476_vm10 = vcmp.gt.f32.partialorder %v432_v30, 0.0 }
  0xbf   : > { %932 = vst [vmem:[#allocation2] sm:$0xff] %v4340_v49  ;;  %v895_v61 = vmul.f32 %v794_v54, %v587_v41  ;;  %v894_v4 = vmul.f32 %v789_v56, %v586_v31  ;;  %3224 = vmatpush3.bf16.msra.mxu1 %v3704_v44  ;;  %v1802_v35 = vor.u32 %v1800_v40, %v1798_v53  ;;  %v520_v17 = vmul.f32 0.1, %v432_v30 }
  0xc0   : > { %3245 = vmatprep.subr.bf16.mxu1 %v3753_v5  ;;  %v565_v44 = vsel %vm477_vm9, %v433_v1, %v521_v27  ;;  %v522_v41 = vmul.f32 0.1, %v434_v28  ;;  %v535_v31 = vmul.f32 0.1, %v447_v6  ;;  %vm478_vm13 = vcmp.gt.f32.partialorder %v434_v28, 0.0  ;;  %v3711_v1 = vld [vmem:[%s4779_s1 + $0x1a0] sm:$0xff]  }
  0xc1   : > { %v4356_v2 = vpack.c.bf16 %v895_v61, %v894_v4  ;;  %v1807_v42 = vsel %vm1275_vm4, %v1802_v35, %v1806_v58  ;;  %vm491_vm14 = vcmp.gt.f32.partialorder %v447_v6, 0.0  ;;  %v564_v50 = vsel %vm476_vm10, %v432_v30, %v520_v17 }
  0xc2   : > { %v664_v10 = vpop.permute.xlu1 %663  ;;  %v659_v14 = vpop.permute.xlu0 %658  ;;  %3370 = vmatmul.mubr.bf16.vlgmr.msra.gmra.mrb[0].mxu0 %v1799_v48  ;;  %3206 = vmatmul.mubr.bf16.gmra.mrb[16].mxu1 %v1010_v52  ;;  %v435_v52 = vadd.f32 %v4060_v33, %v4033_v11  ;;  %v562_v11 = vsel %vm474_vm8, %v430_v60, %v518_v21  ;;  %v3709_v33 = vld [vmem:[%s4779_s1 + $0x198] sm:$0xff]   ;;  %vm490_vm15 = vcmp.gt.f32.partialorder %v446_v18, 0.0  ;;  %v534_v54 = vmul.f32 0.1, %v446_v18 }
  0xc3   : > { %v869_v15 = vmul.f32 %v664_v10, %v561_v57  ;;  %v868_v16 = vmul.f32 %v659_v14, %v560_v47  ;;  %3390 = vmatpush3.bf16.msra.mxu0 %v3703_v8  ;;  %3373 = vmatprep.mubr.msk.bf16.mxu0 %vm3754_vm0, %v3753_v5  ;;  %v1812_v43 = vshll.u32 %v4356_v2, 16  ;;  %v1808_v57 = vshrl.u32 %v4318_v36, 16 }
  0xc4   : > { %3391 = vmatprep.subr.bf16.mxu0 %v3753_v5  ;;  %3225 = vmatprep.mubr.msk.bf16.mxu1 %vm3754_vm0, %v3753_v5  ;;  %v523_v39 = vmul.f32 0.1, %v435_v52  ;;  %vm479_vm11 = vcmp.gt.f32.partialorder %v435_v52, 0.0  ;;  %v566_v4 = vsel %vm478_vm13, %v434_v28, %v522_v41  ;;  %v579_v7 = vsel %vm491_vm14, %v447_v6, %v535_v31  ;;  %v4469_v31 = vld [vmem:[#allocation2 + $0x28] sm:$0x1] }
  0xc5   : > { %v4375_v22 = vpack.c.bf16 %v869_v15, %v868_v16  ;;  %v1814_v59 = vrot.slane %v1812_v43, 1  ;;  %v1810_v47 = vor.u32 %v1808_v57, %v1806_v58  ;;  %vm2387_vm1 = vcmask 1042432  }
  0xc6   : > { %v804_v23 = vpop.permute.xlu1 %803  ;;  %v799_v24 = vpop.permute.xlu0 %798  ;;  %v567_v53 = vsel %vm479_vm11, %v435_v52, %v523_v39  ;;  %v578_v16 = vsel %vm490_vm15, %v446_v18, %v534_v54  ;;  %vm1984_vm2 = vsmask.f32 3328 }
  0xc7   : > { %v897_v29 = vmul.f32 %v804_v23, %v589_v3  ;;  %v896_v34 = vmul.f32 %v799_v24, %v588_v0  ;;  %3392 = vmatpush3.bf16.msra.mxu0 %v3705_v20  ;;  %v2389_v10 = vrot.slane %v4375_v22, 5  ;;  %v1815_v15 = vsel %vm1275_vm4, %v1810_v47, %v1814_v59  ;;  %v3712_v23 = vld [vmem:[%s4779_s1 + $0x98] sm:$0xff]   ;;  %v3713_v24 = vld [vmem:[%s4779_s1 + $0x1a8] sm:$0xff]  }
  0xc8   : > { %3393 = vmatprep.subr.bf16.mxu0 %v3753_v5  ;;  %v1816_v0 = vshrl.u32 %v4356_v2, 16  ;;  %v3716_v47 = vld [vmem:[%s4779_s1 + $0xa8] sm:$0xff]  }
  0xc9   : > { %v925_v63 = vpack.c.bf16 %v897_v29, %v896_v34 }
  0xca   : > { %v674_v13 = vpop.permute.xlu1 %673  ;;  %v669_v32 = vpop.permute.xlu0 %668  ;;  %3374 = vmatmul.mubr.bf16.gmra.mrb[4].mxu0 %v1807_v42  ;;  %3226 = vmatmul.mubr.bf16.vlgmr.msra.gmra.mrb[0].mxu1 %v4340_v49 }
  0xcb   : > { %947 = vst [vmem:[#allocation2 + $0x78] sm:$0xff] %v925_v63  ;;  %v871_v45 = vmul.f32 %v674_v13, %v563_v26  ;;  %v870_v46 = vmul.f32 %v669_v32, %v562_v11  ;;  %3246 = vmatpush3.bf16.msra.mxu1 %v3706_v37  ;;  %3394 = vmatpush3.bf16.msra.mxu0 %v3707_v38  ;;  %v3714_v32 = vld [vmem:[%s4779_s1 + $0xa0] sm:$0xff]  }
  0xcc   : > { %3247 = vmatprep.subr.bf16.mxu1 %v3753_v5  ;;  %3395 = vmatprep.subr.bf16.mxu0 %v3753_v5  ;;  %v1818_v11 = vor.u32 %v1816_v0, %v1814_v59 }
  0xcd   : > { %v4407_v56 = vpack.c.bf16 %v871_v45, %v870_v46  ;;  %3377 = vmatprep.mubr.msk.bf16.mxu0 %vm3754_vm0, %v3753_v5  ;;  %3229 = vmatprep.mubr.msk.bf16.mxu1 %vm3754_vm0, %v3753_v5 }
  0xce   : > { %v684_v60 = vpop.permute.xlu1 %683  ;;  %v679_v61 = vpop.permute.xlu0 %678 }
  0xcf   : > { %v873_v8 = vmul.f32 %v684_v60, %v565_v44  ;;  %v872_v62 = vmul.f32 %v679_v61, %v564_v50  ;;  %3248 = vmatpush3.bf16.msra.mxu1 %v3708_v19  ;;  %3396 = vmatpush3.bf16.msra.mxu0 %v3709_v33  ;;  %v1292_v48 = vshll.u32 %v4407_v56, 16  ;;  %v1296_v9 = vshrl.u32 %v4407_v56, 16  ;;  %v3715_v44 = vld [vmem:[%s4779_s1 + $0x1b0] sm:$0xff]  }
  0xd0   : > { %3249 = vmatprep.subr.bf16.mxu1 %v3753_v5  ;;  %3397 = vmatprep.subr.bf16.mxu0 %v3753_v5  ;;  %v2391_v14 = vrot.slane %v4407_v56, 5 }
  0xd1   : > { %v4427_v12 = vpack.c.bf16 %v873_v8, %v872_v62  ;;  %v4449_v26 = vrot.slane %v1292_v48, 1  ;;  %v2005_v6 = vrot.slane %v1296_v9, 4  ;;  %v2008_v29 = vrot.slane %v1292_v48, 5 }
  0xd2   : > { %v694_v3 = vpop.permute.xlu1 %693  ;;  %v689_v20 = vpop.permute.xlu0 %688  ;;  %3378 = vmatmul.mubr.bf16.gmra.mrb[8].mxu0 %v1815_v15  ;;  %3230 = vmatmul.mubr.bf16.gmra.mrb[4].mxu1 %v4375_v22  ;;  %v4432_v21 = vld [vmem:[#allocation2 + $0x78] sm:$0x1f]  ;;  %v4440_v30 = vsel %vm2387_vm1, %v2389_v10, %v2391_v14  ;;  %v2397_v62 = vrot.slane %v4469_v31, 5  ;;  %v1288_v15 = vshrl.u32 %v4375_v22, 16 }
  0xd3   : > { %v875_v52 = vmul.f32 %v694_v3, %v567_v53  ;;  %v874_v40 = vmul.f32 %v689_v20, %v566_v4  ;;  %3250 = vmatpush3.bf16.msra.mxu1 %v3710_v25  ;;  %3398 = vmatpush3.bf16.msra.mxu0 %v3711_v1  ;;  %v1820_v58 = vshll.u32 %v4432_v21, 16  ;;  %v1300_v27 = vshll.u32 %v4427_v12, 16  ;;  %v1961_v53 = vld [vmem:[#allocation2] sm:$0xf0]  ;;  %v3717_v25 = vld [vmem:[%s4779_s1 + $0x1b8] sm:$0xff]  }
  0xd4   : > { %3381 = vmatprep.mubr.msk.bf16.mxu0 %vm3754_vm0, %v3753_v5  ;;  %3251 = vmatprep.subr.bf16.mxu1 %v3753_v5  ;;  %v1304_v28 = vshrl.u32 %v4427_v12, 16  ;;  %v2393_v63 = vrot.slane %v4427_v12, 5  ;;  %v1298_v13 = vor.u32 %v1296_v9, %v4449_v26  ;;  %v4474_v46 = vor.u32 %v2008_v29, %v2005_v6 }
  0xd5   : > { %v914_v34 = vpack.c.bf16 %v875_v52, %v874_v40  ;;  %v1822_v35 = vrot.slane %v1820_v58, 1  ;;  %3399 = vmatprep.subr.bf16.mxu0 %v3753_v5  ;;  %3233 = vmatprep.mubr.msk.bf16.mxu1 %vm3754_vm0, %v3753_v5  ;;  %v1302_v17 = vrot.slane %v1300_v27, 1  ;;  %v2017_v18 = vrot.slane %v1300_v27, 5  ;;  %v3718_v52 = vld [vmem:[%s4779_s1 + $0xb0] sm:$0xff]  }
  0xd6   : > { %v754_v37 = vpop.permute.xlu1 %753  ;;  %v749_v38 = vpop.permute.xlu0 %748  ;;  %v2014_v39 = vrot.slane %v1304_v28, 4  ;;  %v4487_v8 = vsel %vm2387_vm1, %v2391_v14, %v2393_v63  ;;  %v1986_v48 = vshrl.u32 %v1961_v53, 16  ;;  %v1824_v3 = vshrl.u32 %v4432_v21, 16 }
  0xd7   : > { %936 = vst [vmem:[#allocation2 + $0x20] sm:$0xff] %v914_v34  ;;  %v887_v42 = vmul.f32 %v754_v37, %v579_v7  ;;  %v886_v43 = vmul.f32 %v749_v38, %v578_v16  ;;  %3252 = vmatpush3.bf16.msra.mxu1 %v3712_v23  ;;  %3400 = vmatpush3.bf16.msra.mxu0 %v3713_v24  ;;  %v2021_v41 = vshrl.u32 %v914_v34, 16  ;;  %v2024_v33 = vshll.u32 %v914_v34, 16  ;;  %v3719_v37 = vld [vmem:[%s4779_s1 + $0x1c0] sm:$0xff]  }
  0xd8   : > { %v1823_v45 = vsel %vm1275_vm4, %v1818_v11, %v1822_v35  ;;  %3253 = vmatprep.subr.bf16.mxu1 %v3753_v5  ;;  %3401 = vmatprep.subr.bf16.mxu0 %v3753_v5  ;;  %v2018_v19 = vor.u32 %v2017_v18, %v2014_v39  ;;  %v4477_v57 = vsel %vm1275_vm4, %v1298_v13, %v1302_v17  ;;  %v2395_v59 = vrot.slane %v914_v34, 5  ;;  %v3720_v34 = vld [vmem:[%s4779_s1 + $0xb8] sm:$0xff]   ;;  %v3721_v18 = vld [vmem:[%s4779_s1 + $0x1c8] sm:$0xff]   ;;  %v3722_v13 = vld [vmem:[%s4779_s1 + $0xc0] sm:$0xff]  }
  0xd9   : > { %v920_v50 = vpack.c.bf16 %v887_v42, %v886_v43  ;;  %v2023_v54 = vrot.slane %v2021_v41, 4  ;;  %v2026_v7 = vrot.slane %v2024_v33, 5  ;;  %v1989_v16 = vshll.u32 %v1961_v53, 16  ;;  %v3727_v33 = vld [vmem:[%s4779_s1 + $0x1e0] sm:$0xff]   ;;  %v3728_v53 = vld [vmem:[%s4779_s1 + $0xd8] sm:$0xff]  }
  0xda   : > { %v864_v60 = vpop.permute.xlu1 %863  ;;  %v859_v61 = vpop.permute.xlu0 %858  ;;  %3382 = vmatmul.mubr.bf16.gmra.mrb[12].mxu0 %v1823_v45  ;;  %3234 = vmatmul.mubr.bf16.gmra.mrb[8].mxu1 %v4407_v56  ;;  %v4482_v4 = vsel %vm1984_vm2, %v4474_v46, %v2018_v19  ;;  %v4497_v1 = vsel %vm2387_vm1, %v2393_v63, %v2395_v59  ;;  %v1284_v56 = vshll.u32 %v4375_v22, 16  ;;  %v4507_v14 = vsel %vm2387_vm1, %v2395_v59, %v2397_v62  ;;  %v3725_v45 = vld [vmem:[%s4779_s1 + $0x1d8] sm:$0xff]   ;;  %v3731_v59 = vld [vmem:[%s4779_s1 + $0x1f0] sm:$0xff]  }
  0xdb   : > { %942 = vst [vmem:[#allocation2 + $0x50] sm:$0xff] %v920_v50  ;;  %3254 = vmatpush3.bf16.msra.mxu1 %v3714_v32  ;;  %3402 = vmatpush3.bf16.msra.mxu0 %v3715_v44  ;;  %v4504_v9 = vor.u32 %v2026_v7, %v2023_v54  ;;  %v1826_v58 = vor.u32 %v1824_v3, %v1822_v35  ;;  %v1988_v21 = vrot.slane %v1986_v48, 4  ;;  %v1991_v27 = vrot.slane %v1989_v16, 5  ;;  %v3723_v32 = vld [vmem:[%s4779_s1 + $0x1d0] sm:$0xff]   ;;  %v3729_v54 = vld [vmem:[%s4779_s1 + $0x1e8] sm:$0xff]  }
  0xdc   : > { %3385 = vmatprep.mubr.msk.bf16.mxu0 %vm3754_vm0, %v3753_v5  ;;  %3237 = vmatprep.mubr.msk.bf16.mxu1 %vm3754_vm0, %v3753_v5  ;;  %v1999_v23 = vrot.slane %v1284_v56, 5  ;;  %v1306_v24 = vor.u32 %v1304_v28, %v1302_v17  ;;  %v1996_v6 = vrot.slane %v1288_v15, 4  ;;  %v1277_v63 = vshrl.u32 %v4340_v49, 16  ;;  %v3732_v61 = vld [vmem:[%s4779_s1 + $0xe8] sm:$0xff]   ;;  %v2168_v7 = vld [vmem:[#allocation2 + $0x30] sm:$0xff] }
  0xdd   : > { %3255 = vmatprep.subr.bf16.mxu1 %v3753_v5  ;;  %3403 = vmatprep.subr.bf16.mxu0 %v3753_v5  ;;  %v4515_v20 = vsel %vm1984_vm2, %v2018_v19, %v4504_v9  ;;  %v1992_v11 = vor.u32 %v1991_v27, %v1988_v21  ;;  %v1286_v42 = vrot.slane %v1284_v56, 1  ;;  %v3726_v19 = vld [vmem:[%s4779_s1 + $0xd0] sm:$0xff]   ;;  %v2030_v60 = vshll.u32 %v4469_v31, 16  ;;  %v2169_v31 = vld [vmem:[#allocation2 + $0x38] sm:$0xff] }
  0xde   : > { %v4517_v0 = vld [vmem:[#allocation2 + $0x20] sm:$0x1f]  ;;  %v2000_v35 = vor.u32 %v1999_v23, %v1996_v6  ;;  %v3734_v62 = vld [vmem:[%s4779_s1 + $0xf0] sm:$0xff]   ;;  %v2198_v56 = vshll.u32 %v2169_v31, 16  ;;  %v2191_v16 = vshrl.u32 %v2168_v7, 16  ;;  %v2171_v6 = vld [vmem:[#allocation2 + $0x48] sm:$0xff] }
  0xdf   : > { %3256 = vmatpush3.bf16.msra.mxu1 %v3716_v47  ;;  %3404 = vmatpush3.bf16.msra.mxu0 %v3717_v25  ;;  %v1308_v40 = vshll.u32 %v4517_v0, 16  ;;  %v958_v17 = vld [vmem:[#allocation2 + $0x20] sm:$0xf]  ;;  %v2193_v47 = vshll.u32 %v2168_v7, 16  ;;  %v1312_v3 = vshrl.u32 %v4517_v0, 16  ;;  %v3737_v0 = vld [vmem:[%s4779_s1 + $0x208] sm:$0xff]  }
  0xe0   : > { %3257 = vmatprep.subr.bf16.mxu1 %v3753_v5  ;;  %3425 = vmatprep.subr.bf16.mxu0 %v3753_v5  ;;  %v2001_v38 = vsel %vm1984_vm2, %v1992_v11, %v2000_v35  ;;  %v2010_v44 = vsel %vm1984_vm2, %v2000_v35, %v4474_v46  ;;  %v1290_v46 = vor.u32 %v1288_v15, %v1286_v42  ;;  %v3736_v15 = vld [vmem:[%s4779_s1 + $0xf8] sm:$0xff]   ;;  %v2214_v11 = vshll.u32 %v2171_v6, 16 }
  0xe1   : > { %v4529_v29 = vrot.slane %v1308_v40, 1  ;;  %v2195_v48 = vrot.slane %v2193_v47, 1  ;;  %v3735_v40 = vld [vmem:[%s4779_s1 + $0x200] sm:$0xff]   ;;  %v3739_v35 = vld [vmem:[%s4779_s1 + $0x218] sm:$0xff]  }
  0xe2   : > { %3386 = vmatmul.mubr.bf16.gmra.mrb[16].mxu0 %v1826_v58  ;;  %3238 = vmatmul.mubr.bf16.gmra.mrb[12].mxu1 %v4427_v12  ;;  %v1279_v12 = vshll.u32 %v4340_v49, 16  ;;  %v3724_v49 = vld [vmem:[%s4779_s1 + $0xc8] sm:$0xff]   ;;  %v1295_v50 = vsel %vm1275_vm4, %v1290_v46, %v4449_v26  ;;  %v3730_v26 = vld [vmem:[%s4779_s1 + $0xe0] sm:$0xff]  }
  0xe3   : > { %3405 = vmatprep.mubr.msk.bf16.mxu0 %vm3754_vm0, %v3753_v5  ;;  %3258 = vmatpush3.bf16.msra.mxu1 %v3718_v52  ;;  %v4539_v28 = vsel %vm1275_vm4, %v1306_v24, %v4529_v29  ;;  %v2196_v52 = vor.u32 %v2195_v48, %v2191_v16  ;;  %v1314_v58 = vor.u32 %v1312_v3, %v4529_v29  ;;  %v2202_v24 = vshrl.u32 %v2169_v31, 16 }
  0xe4   : > { %3241 = vmatprep.mubr.msk.bf16.mxu1 %vm3754_vm0, %v3753_v5  ;;  %3259 = vmatprep.subr.bf16.mxu1 %v3753_v5  ;;  %v1281_v39 = vrot.slane %v1279_v12, 1 }
  0xe6   : > { %v1282_v43 = vor.u32 %v1281_v39, %v1277_v63  ;;  %v3741_v63 = vld [vmem:[%s4779_s1 + $0x228] sm:$0xff]  }
  0xe7   : > { %3260 = vmatpush3.bf16.msra.mxu1 %v3720_v34  ;;  %v3738_v34 = vld [vmem:[%s4779_s1 + $0x210] sm:$0xff]  }
  0xe8   : > { %3281 = vmatprep.subr.bf16.mxu1 %v3753_v5  ;;  %v1287_v41 = vsel %vm1275_vm4, %v1282_v43, %v1286_v42  ;;  %v2218_v42 = vshrl.u32 %v2171_v6, 16 }
  0xea   : > { %3406 = vmatmul.mubr.bf16.vlgmr.msra.gmra.mrb[0].mxu0 %v2001_v38  ;;  %3242 = vmatmul.mubr.bf16.gmra.mrb[16].mxu1 %v958_v17  ;;  %v2172_v38 = vld [vmem:[#allocation2 + $0x50] sm:$0x1f]  ;;  %v3740_v17 = vld [vmem:[%s4779_s1 + $0x220] sm:$0xff]  }
  0xeb   : > { %3426 = vmatpush3.bf16.msra.mxu0 %v3719_v37  ;;  %3409 = vmatprep.mubr.msk.bf16.mxu0 %vm3754_vm0, %v3753_v5  ;;  %v2216_v37 = vrot.slane %v2214_v11, 1 }
  0xec   : > { %3427 = vmatprep.subr.bf16.mxu0 %v3753_v5  ;;  %3261 = vmatprep.mubr.msk.bf16.mxu1 %vm3754_vm0, %v3753_v5 }
  0xef   : > { %3428 = vmatpush3.bf16.msra.mxu0 %v3721_v18  ;;  %v2222_v18 = vshll.u32 %v2172_v38, 16 }
  0xf0   : > { %3429 = vmatprep.subr.bf16.mxu0 %v3753_v5 }
  0xf1   : > { %v2224_v43 = vrot.slane %v2222_v18, 1 }
  0xf2   : > { %3410 = vmatmul.mubr.bf16.gmra.mrb[4].mxu0 %v2010_v44  ;;  %3262 = vmatmul.mubr.bf16.vlgmr.msra.gmra.mrb[0].mxu1 %v1287_v41  ;;  %v3743_v44 = vld [vmem:[%s4779_s1 + $0x238] sm:$0xff]   ;;  %v2226_v41 = vshrl.u32 %v2172_v38, 16 }
  0xf3   : > { %3282 = vmatpush3.bf16.msra.mxu1 %v3722_v13  ;;  %3430 = vmatpush3.bf16.msra.mxu0 %v3723_v32  ;;  %v2220_v13 = vor.u32 %v2218_v42, %v2216_v37 }
  0xf4   : > { %3283 = vmatprep.subr.bf16.mxu1 %v3753_v5  ;;  %3431 = vmatprep.subr.bf16.mxu0 %v3753_v5 }
  0xf5   : > { %3413 = vmatprep.mubr.msk.bf16.mxu0 %vm3754_vm0, %v3753_v5  ;;  %3265 = vmatprep.mubr.msk.bf16.mxu1 %vm3754_vm0, %v3753_v5  ;;  %v2225_v32 = vsel %vm1275_vm4, %v2220_v13, %v2224_v43 }
  0xf7   : > { %3284 = vmatpush3.bf16.msra.mxu1 %v3724_v49  ;;  %3432 = vmatpush3.bf16.msra.mxu0 %v3725_v45  ;;  %v2363_v49 = vld [vmem:[#allocation2] sm:$0xe0] }
  0xf8   : > { %3285 = vmatprep.subr.bf16.mxu1 %v3753_v5  ;;  %3433 = vmatprep.subr.bf16.mxu0 %v3753_v5  ;;  %v2388_v45 = vrot.slane %v2363_v49, 5 }
  0xfa   : > { %3414 = vmatmul.mubr.bf16.gmra.mrb[8].mxu0 %v4482_v4  ;;  %3266 = vmatmul.mubr.bf16.gmra.mrb[4].mxu1 %v1295_v50  ;;  %v3733_v4 = vld [vmem:[%s4779_s1 + $0x1f8] sm:$0xff]   ;;  %v2390_v46 = vsel %vm2387_vm1, %v2388_v45, %v2389_v10 }
  0xfb   : > { %3286 = vmatpush3.bf16.msra.mxu1 %v3726_v19  ;;  %3434 = vmatpush3.bf16.msra.mxu0 %v3727_v33  ;;  %v1453_v19 = vld [vmem:[#allocation2 + $0x78] sm:$0xf] }
  0xfc   : > { %3417 = vmatprep.mubr.msk.bf16.mxu0 %vm3754_vm0, %v3753_v5  ;;  %3287 = vmatprep.subr.bf16.mxu1 %v3753_v5 }
  0xfd   : > { %3435 = vmatprep.subr.bf16.mxu0 %v3753_v5  ;;  %3269 = vmatprep.mubr.msk.bf16.mxu1 %vm3754_vm0, %v3753_v5 }
  0xff   : > { %3288 = vmatpush3.bf16.msra.mxu1 %v3728_v53  ;;  %3436 = vmatpush3.bf16.msra.mxu0 %v3729_v54 }
 0x100   : > { %3289 = vmatprep.subr.bf16.mxu1 %v3753_v5  ;;  %3437 = vmatprep.subr.bf16.mxu0 %v3753_v5 }
 0x102   : > { %3418 = vmatmul.mubr.bf16.gmra.mrb[12].mxu0 %v4515_v20  ;;  %3270 = vmatmul.mubr.bf16.gmra.mrb[8].mxu1 %v4477_v57  ;;  %v2032_v57 = vrot.slane %v2030_v60, 5  ;;  %v2170_v20 = vld [vmem:[#allocation2 + $0x40] sm:$0xff] }
 0x103   : > { %3290 = vmatpush3.bf16.msra.mxu1 %v3730_v26  ;;  %3438 = vmatpush3.bf16.msra.mxu0 %v3731_v59  ;;  %v2206_v23 = vshll.u32 %v2170_v20, 16  ;;  %v2210_v12 = vshrl.u32 %v2170_v20, 16 }
 0x104   : > { %3421 = vmatprep.mubr.msk.bf16.mxu0 %vm3754_vm0, %v3753_v5  ;;  %3273 = vmatprep.mubr.msk.bf16.mxu1 %vm3754_vm0, %v3753_v5  ;;  %v2033_v25 = vsel %vm1984_vm2, %v4504_v9, %v2032_v57  ;;  %v2200_v9 = vrot.slane %v2198_v56, 1 }
 0x105   : > { %3291 = vmatprep.subr.bf16.mxu1 %v3753_v5  ;;  %3439 = vmatprep.subr.bf16.mxu0 %v3753_v5  ;;  %v2208_v27 = vrot.slane %v2206_v23, 1 }
 0x106   : > { %v2201_v21 = vsel %vm1275_vm4, %v2196_v52, %v2200_v9  ;;  %v2204_v29 = vor.u32 %v2202_v24, %v2200_v9  ;;  %v4736_v9 = vld [vmem:[%s4783_s5] ss:$0 sm:$0xff] }
 0x107   : > { %3292 = vmatpush3.bf16.msra.mxu1 %v3732_v61  ;;  %3440 = vmatpush3.bf16.msra.mxu0 %v3733_v4 }
 0x108   : > { %3293 = vmatprep.subr.bf16.mxu1 %v3753_v5  ;;  %3461 = vmatprep.subr.bf16.mxu0 %v3753_v5 }
 0x10a   : > { %3422 = vmatmul.mubr.bf16.gmra.mrb[16].mxu0 %v2033_v25  ;;  %3274 = vmatmul.mubr.bf16.gmra.mrb[12].mxu1 %v4539_v28  ;;  %v2209_v28 = vsel %vm1275_vm4, %v2204_v29, %v2208_v27 }
 0x10b   : > { %3441 = vmatprep.mubr.msk.bf16.mxu0 %vm3754_vm0, %v3753_v5  ;;  %3294 = vmatpush3.bf16.msra.mxu1 %v3734_v62 }
 0x10c   : > { %3277 = vmatprep.mubr.msk.bf16.mxu1 %vm3754_vm0, %v3753_v5  ;;  %3295 = vmatprep.subr.bf16.mxu1 %v3753_v5 }
 0x10f   : > { %3296 = vmatpush3.bf16.msra.mxu1 %v3736_v15 }
 0x110   : > { %3497 = vmatprep.subr.bf16.mxu1 %v3753_v5 }
 0x112   : > { %3442 = vmatmul.mubr.bf16.vlgmr.msra.gmra.mrb[0].mxu0 %v2201_v21  ;;  %3278 = vmatmul.mubr.bf16.gmra.mrb[16].mxu1 %v1314_v58  ;;  %v4741_v21 = vld [vmem:[%s4784_s6] ss:$0 sm:$0xff] }
 0x113   : > { %3462 = vmatpush3.bf16.msra.mxu0 %v3735_v40  ;;  %3445 = vmatprep.mubr.msk.bf16.mxu0 %vm3754_vm0, %v3753_v5 }
 0x114   : > { %3463 = vmatprep.subr.bf16.mxu0 %v3753_v5  ;;  %3297 = vmatprep.mubr.msk.bf16.mxu1 %vm3754_vm0, %v3753_v5 }
 0x117   : > { %3464 = vmatpush3.bf16.msra.mxu0 %v3737_v0 }
 0x118   : > { %3465 = vmatprep.subr.bf16.mxu0 %v3753_v5 }
 0x11a   : > { %3446 = vmatmul.mubr.bf16.gmra.mrb[4].mxu0 %v2209_v28  ;;  %3298 = vmatmul.mubr.bf16.vlgmr.msra.gmra.mrb[0].mxu1 %v4277_v55  ;;  %v2212_v55 = vor.u32 %v2210_v12, %v2208_v27 }
 0x11b   : > { %3505 = vmatpush3.bf16.msra.mxu1 %v3735_v40  ;;  %3466 = vmatpush3.bf16.msra.mxu0 %v3738_v34 }
 0x11c   : > { %3498 = vmatprep.subr.bf16.mxu1 %v3753_v5  ;;  %3467 = vmatprep.subr.bf16.mxu0 %v3753_v5  ;;  %v2217_v39 = vsel %vm1275_vm4, %v2212_v55, %v2216_v37 }
 0x11d   : > { %3449 = vmatprep.mubr.msk.bf16.mxu0 %vm3754_vm0, %v3753_v5  ;;  %3301 = vmatprep.mubr.msk.bf16.mxu1 %vm3754_vm0, %v3753_v5 }
 0x11f   : > { %3506 = vmatpush3.bf16.msra.mxu1 %v3737_v0  ;;  %3468 = vmatpush3.bf16.msra.mxu0 %v3739_v35 }
 0x120   : > { %3499 = vmatprep.subr.bf16.mxu1 %v3753_v5  ;;  %3469 = vmatprep.subr.bf16.mxu0 %v3753_v5 }
 0x122   : > { %3450 = vmatmul.mubr.bf16.gmra.mrb[8].mxu0 %v2217_v39  ;;  %3302 = vmatmul.mubr.bf16.gmra.mrb[4].mxu1 %v4302_v51  ;;  %v3742_v51 = vld [vmem:[%s4779_s1 + $0x230] sm:$0xff]  }
 0x123   : > { %3507 = vmatpush3.bf16.msra.mxu1 %v3738_v34  ;;  %3470 = vmatpush3.bf16.msra.mxu0 %v3740_v17 }
 0x124   : > { %3453 = vmatprep.mubr.msk.bf16.mxu0 %vm3754_vm0, %v3753_v5  ;;  %3500 = vmatprep.subr.bf16.mxu1 %v3753_v5 }
 0x125   : > { %3471 = vmatprep.subr.bf16.mxu0 %v3753_v5  ;;  %3305 = vmatprep.mubr.msk.bf16.mxu1 %vm3754_vm0, %v3753_v5 }
 0x127   : > { %3508 = vmatpush3.bf16.msra.mxu1 %v3739_v35  ;;  %3472 = vmatpush3.bf16.msra.mxu0 %v3741_v63 }
 0x128   : > { %3501 = vmatprep.subr.bf16.mxu1 %v3753_v5  ;;  %3473 = vmatprep.subr.bf16.mxu0 %v3753_v5 }
 0x12a   : > { %3454 = vmatmul.mubr.bf16.gmra.mrb[12].mxu0 %v2225_v32  ;;  %3306 = vmatmul.mubr.bf16.gmra.mrb[8].mxu1 %v4318_v36  ;;  %v2228_v36 = vor.u32 %v2226_v41, %v2224_v43 }
 0x12b   : > { %3509 = vmatpush3.bf16.msra.mxu1 %v3740_v17  ;;  %3474 = vmatpush3.bf16.msra.mxu0 %v3742_v51 }
 0x12c   : > { %3457 = vmatprep.mubr.msk.bf16.mxu0 %vm3754_vm0, %v3753_v5  ;;  %3309 = vmatprep.mubr.msk.bf16.mxu1 %vm3754_vm0, %v3753_v5 }
 0x12d   : > { %3502 = vmatprep.subr.bf16.mxu1 %v3753_v5  ;;  %3475 = vmatprep.subr.bf16.mxu0 %v3753_v5 }
 0x12f   : > { %3510 = vmatpush3.bf16.msra.mxu1 %v3741_v63  ;;  %3476 = vmatpush3.bf16.msra.mxu0 %v3743_v44 }
 0x130   : > { %3503 = vmatprep.subr.bf16.mxu1 %v3753_v5 }
 0x132   : > { %3458 = vmatmul.mubr.bf16.gmra.mrb[16].mxu0 %v2228_v36  ;;  %3310 = vmatmul.mubr.bf16.gmra.mrb[12].mxu1 %v4356_v2 }
 0x133   : > { %3477 = vmatprep.mubr.msk.bf16.mxu0 %vm3754_vm0, %v3753_v5  ;;  %3511 = vmatpush3.bf16.msra.mxu1 %v3742_v51 }
 0x134   : > { %3313 = vmatprep.mubr.msk.bf16.mxu1 %vm3754_vm0, %v3753_v5  ;;  %3504 = vmatprep.subr.bf16.mxu1 %v3753_v5 }
 0x137   : > { %3512 = vmatpush3.bf16.msra.mxu1 %v3743_v44 }
 0x13a   : > { %3478 = vmatmul.mubr.bf16.vlgmr.msra.gmra.mrb[0].mxu0 %v2390_v46  ;;  %3314 = vmatmul.mubr.bf16.gmra.mrb[16].mxu1 %v1453_v19 }
 0x13b   : > { %3481 = vmatprep.mubr.msk.bf16.mxu0 %vm3754_vm0, %v3753_v5  ;;  %3489 = vmatprep.mubr.msk.bf16.mxu1 %vm3754_vm0, %v3753_v5 }
 0x142   : > { %3482 = vmatmul.mubr.bf16.gmra.mrb[4].mxu0 %v4440_v30  ;;  %3490 = vmatmul.mubr.bf16.vlgmr.msra.gmra.mrb[20].mxu1 %v4497_v1 }
 0x143   : > { %3485 = vmatprep.mubr.msk.bf16.mxu0 %vm3754_vm0, %v3753_v5  ;;  %3493 = vmatprep.mubr.msk.bf16.mxu1 %vm3754_vm0, %v3753_v5 }
 0x14a   : > { %3486 = vmatmul.mubr.bf16.gmra.mrb[8].mxu0 %v4487_v8  ;;  %3494 = vmatmul.mubr.bf16.gmra.mrb[24].mxu1 %v4507_v14 }
 0x1ed   : > { %v1553_v2 = vpop.f32.mrb[0].mxu1 }
 0x1ee   : > { %v3299_v22 = vpop.f32.mrb[1].mxu1 }
 0x1ef   : > { %v1556_v10 = vpop.f32.mrb[2].mxu1 }
 0x1f0   : > { %v3300_v33 = vpop.f32.mrb[3].mxu1 }
 0x1f5   : > { %v1561_v50 = vpop.f32.mrb[4].mxu1 }
 0x1f6   : > { %v3303_v53 = vpop.f32.mrb[5].mxu1 }
 0x1f7   : > { %v1564_v54 = vpop.f32.mrb[6].mxu1 }
 0x1f8   : > { %v3304_v30 = vpop.f32.mrb[7].mxu1 }
 0x1fd   : > { %v2340_v26 = vpop.f32.mrb[12].mxu0  ;;  %v4729_v1 = vpop.f32.mrb[8].mxu1 }
 0x1fe   : > { %v3455_v59 = vpop.f32.mrb[13].mxu0  ;;  %v3307_v60 = vpop.f32.mrb[9].mxu1 }
 0x1ff   : > { %v2343_v61 = vpop.f32.mrb[14].mxu0  ;;  %v4731_v4 = vpop.f32.mrb[10].mxu1 }
 0x200   : > { %v3456_v5 = vpop.f32.mrb[15].mxu0  ;;  %v3308_v8 = vpop.f32.mrb[11].mxu1 }
 0x205   : > { %v2348_v7 = vpop.f32.mrb[16].mxu0  ;;  %v1577_v14 = vpop.f32.mrb[12].mxu1 }
 0x206   : > { %v3459_v31 = vpop.f32.mrb[17].mxu0  ;;  %v3519_v57 = vadd.f32 %v2340_v26, %v1577_v14  ;;  %v3311_v62 = vpop.f32.mrb[13].mxu1 }
 0x207   : > { %v2351_v47 = vpop.f32.mrb[18].mxu0  ;;  %v1580_v25 = vpop.f32.mrb[14].mxu1 }
 0x208   : > { %v3460_v56 = vpop.f32.mrb[19].mxu0  ;;  %v3521_v48 = vadd.f32 %v2343_v61, %v1580_v25  ;;  %v3312_v15 = vpop.f32.mrb[15].mxu1 }
 0x20d   : > { %v2486_v16 = vpop.f32.mrb[0].mxu0  ;;  %v1585_v3 = vpop.f32.mrb[16].mxu1 }
 0x20e   : > { %v3513_v20 = vadd.f32 %v2486_v16, %v1553_v2  ;;  %v3479_v52 = vpop.f32.mrb[1].mxu0  ;;  %v3523_v40 = vadd.f32 %v2348_v7, %v1585_v3  ;;  %v3315_v58 = vpop.f32.mrb[17].mxu1 }
 0x20f   : > { %v2489_v23 = vpop.f32.mrb[2].mxu0  ;;  %v1588_v0 = vpop.f32.mrb[18].mxu1 }
 0x210   : > { %v2540_v24 = vmul.f32 %v3513_v20, %v4736_v9  ;;  %v3514_v27 = vadd.f32 %v2489_v23, %v1556_v10  ;;  %v3480_v6 = vpop.f32.mrb[3].mxu0  ;;  %v3316_v29 = vpop.f32.mrb[19].mxu1 }
 0x212   : > { %v2556_v34 = vadd.f32 %v4741_v21, %v2540_v24  ;;  %v2541_v28 = vmul.f32 %v3514_v27, %v4736_v9 }
 0x214   : > { %vm2565_vm0 = vcmp.gt.f32.partialorder %v2556_v34, 0.0  ;;  %v2574_v11 = vmul.f32 0.1, %v2556_v34  ;;  %v2557_v35 = vadd.f32 %v4741_v21, %v2541_v28 }
 0x215   : > { %v2494_v12 = vpop.f32.mrb[4].mxu0  ;;  %v2510_v37 = vpop.f32.mrb[20].mxu1 }
 0x216   : > { %vm2566_vm3 = vcmp.gt.f32.partialorder %v2557_v35, 0.0  ;;  %v2575_v38 = vmul.f32 0.1, %v2557_v35  ;;  %v3515_v55 = vadd.f32 %v2494_v12, %v1561_v50  ;;  %v3483_v17 = vpop.f32.mrb[5].mxu0  ;;  %v3491_v39 = vpop.f32.mrb[21].mxu1  ;;  %v2583_v18 = vsel %vm2565_vm0, %v2556_v34, %v2574_v11 }
 0x217   : > { %v2497_v63 = vpop.f32.mrb[6].mxu0  ;;  %v3520_v42 = vadd.f32 %v3519_v57, %v2510_v37  ;;  %v2513_v43 = vpop.f32.mrb[22].mxu1 }
 0x218   : > { %v2584_v13 = vsel %vm2566_vm3, %v2557_v35, %v2575_v38  ;;  %v2542_v51 = vmul.f32 %v3515_v55, %v4736_v9  ;;  %v3516_v32 = vadd.f32 %v2497_v63, %v1564_v54  ;;  %v3484_v44 = vpop.f32.mrb[7].mxu0  ;;  %v3522_v41 = vadd.f32 %v3521_v48, %v2513_v43  ;;  %v3492_v36 = vpop.f32.mrb[23].mxu1 }
 0x219   : > { %v3015_v49 = vpack.c.bf16 %v2584_v13, %v2583_v18  ;;  %v2546_v45 = vmul.f32 %v3520_v42, %v4736_v9 }
 0x21a   : > { %v2558_v46 = vadd.f32 %v4741_v21, %v2542_v51  ;;  %v2543_v19 = vmul.f32 %v3516_v32, %v4736_v9  ;;  %v2547_v2 = vmul.f32 %v3522_v41, %v4736_v9 }
 0x21b   : > { %3016 = vst [vmem:[%s4751_s20] sm:$0xff] %v3015_v49   ;;  %v2562_v22 = vadd.f32 %v4741_v21, %v2546_v45 }
 0x21c   : > { %v2576_v10 = vmul.f32 0.1, %v2558_v46  ;;  %v2559_v33 = vadd.f32 %v4741_v21, %v2543_v19  ;;  %v2563_v50 = vadd.f32 %v4741_v21, %v2547_v2  ;;  %vm2567_vm12 = vcmp.gt.f32.partialorder %v2558_v46, 0.0 }
 0x21d   : > { %vm2571_vm4 = vcmp.gt.f32.partialorder %v2562_v22, 0.0  ;;  %v2580_v53 = vmul.f32 0.1, %v2562_v22  ;;  %v2502_v54 = vpop.f32.mrb[8].mxu0  ;;  %v2518_v30 = vpop.f32.mrb[24].mxu1 }
 0x21e   : > { %vm2568_vm5 = vcmp.gt.f32.partialorder %v2559_v33, 0.0  ;;  %v2577_v26 = vmul.f32 0.1, %v2559_v33  ;;  %vm2572_vm6 = vcmp.gt.f32.partialorder %v2563_v50, 0.0  ;;  %v3487_v59 = vpop.f32.mrb[9].mxu0  ;;  %v3495_v60 = vpop.f32.mrb[25].mxu1  ;;  %v3517_v5 = vadd.f32 %v2502_v54, %v4729_v1 }
 0x21f   : > { %v2581_v61 = vmul.f32 0.1, %v2563_v50  ;;  %v2505_v8 = vpop.f32.mrb[10].mxu0  ;;  %v3524_v7 = vadd.f32 %v3523_v40, %v2518_v30  ;;  %v2521_v14 = vpop.f32.mrb[26].mxu1  ;;  %v2585_v31 = vsel %vm2567_vm12, %v2558_v46, %v2576_v10  ;;  %v2589_v62 = vsel %vm2571_vm4, %v2562_v22, %v2580_v53 }
 0x220   : > { %v2586_v57 = vsel %vm2568_vm5, %v2559_v33, %v2577_v26  ;;  %v3518_v47 = vadd.f32 %v2505_v8, %v4731_v4  ;;  %v3488_v25 = vpop.f32.mrb[11].mxu0  ;;  %v3496_v56 = vpop.f32.mrb[27].mxu1  ;;  %v2544_v16 = vmul.f32 %v3517_v5, %v4736_v9 }
 0x221   : > { %v3020_v48 = vpack.c.bf16 %v2586_v57, %v2585_v31  ;;  %v2590_v15 = vsel %vm2572_vm6, %v2563_v50, %v2581_v61  ;;  %v2548_v3 = vmul.f32 %v3524_v7, %v4736_v9 }
 0x222   : > { %v3030_v1 = vpack.c.bf16 %v2590_v15, %v2589_v62  ;;  %v2545_v20 = vmul.f32 %v3518_v47, %v4736_v9  ;;  %v2560_v52 = vadd.f32 %v4741_v21, %v2544_v16 }
 0x223   : > { %3053 = vst [vmem:[%s4751_s20 + $0x8] sm:$0xff] %v3020_v48   ;;  %v2564_v40 = vadd.f32 %v4741_v21, %v2548_v3 }
 0x224   : > { %3055 = vst [vmem:[%s4751_s20 + $0x18] sm:$0xff] %v3030_v1   ;;  %v2561_v4 = vadd.f32 %v4741_v21, %v2545_v20  ;;  %vm2569_vm7 = vcmp.gt.f32.partialorder %v2560_v52, 0.0  ;;  %v2578_v58 = vmul.f32 0.1, %v2560_v52 }
 0x225   : > { %vm2573_vm8 = vcmp.gt.f32.partialorder %v2564_v40, 0.0  ;;  %v2582_v23 = vmul.f32 0.1, %v2564_v40 }
 0x226   : > { %vm2570_vm9 = vcmp.gt.f32.partialorder %v2561_v4, 0.0  ;;  %v2579_v0 = vmul.f32 0.1, %v2561_v4  ;;  %v2587_v27 = vsel %vm2569_vm7, %v2560_v52, %v2578_v58 }
 0x227   : > { %v2591_v24 = vsel %vm2573_vm8, %v2564_v40, %v2582_v23 }
 0x228   : > { %v2588_v6 = vsel %vm2570_vm9, %v2561_v4, %v2579_v0  ;;  %v2923_v9 = vpack.c.bf16 %v2591_v24, %v2591_v24 }
 0x229   : > { %v3025_v29 = vpack.c.bf16 %v2588_v6, %v2587_v27 }
 0x22a   : > { %2637 = vst [vmem:[%s4751_s20 + $0x20] sm:$0xf] %v2923_v9 }
 0x22b   : > { %3054 = vst [vmem:[%s4751_s20 + $0x10] sm:$0xff] %v3025_v29  }
 0x22c PF: > { %s17_s24 = sadd.s32 1, %s3750_s24  }
 0x22d   : > { %p14_p4 = scmp.ge.s32.totalorder %s17_s24, 4  }
 0x22f   :  { %16 = sbr.rel (!%p14_p4) target bundleno = 1 (0x1), region = 86 }

// kernel: basic_block_forward.4
= control target key start
LH: loop header
LB: loop body
LE: loop exit
PB: predicated region body
PF: predicated region fallthrough
CT: control target
= control target key end

     0   :  { %s708_s18 = smov 0   ;;  %s787_s0 = inlined_call_operand.vmem [shape: bf16[2,64,128], index: 0, kind: input, shape index: {}]   ;;  %s788_s1 = inlined_call_operand.vmem [shape: bf16[1,128,128], index: 1, kind: input, shape index: {}]   ;;  %s789_s2 = inlined_call_operand.vmem [shape: f32[1,128], index: 2, kind: input, shape index: {}]   ;;  %s790_s3 = inlined_call_operand.vmem [shape: f32[1,128], index: 3, kind: input, shape index: {}]   ;;  %s791_s4 = inlined_call_operand.vmem [shape: f32[64,1], index: 4, kind: input, shape index: {}]   ;;  %s792_s5 = inlined_call_operand.vmem [shape: f32[2,64,128], index: 5, kind: output, shape index: {}]  }
   0x1 LB: > { %s556_s19 = sadd.s32 4294967295, %s675_s18   ;;  %p560_p0 = scmp.ge.s32.totalorder %s675_s18, 1  ;;  %s675_s18 = sphi %s708_s18, %s15_s18  }
   0x2   : > { %p187_p1 = scmp.lt.s32.totalorder %s675_s18, 3 }
   0x4   : > { %p188_p2 = pnand %p560_p0, %p187_p1 }
   0x5   : > { %v300_v0 = vld [vmem:[%s791_s4 + $0x20] sm:$0xff] (!%p188_p2)  ;;  %v677_v2 = vmov (!%p188_p2), 0   ;;  %v301_v3 = vld [vmem:[%s791_s4 + $0x28] sm:$0xff] (!%p188_p2)  ;;  %v299_v7 = vld [vmem:[%s791_s4 + $0x18] sm:$0xff] (!%p188_p2)  ;;  %p215_p3 = scmp.lt.s32.totalorder (!%p188_p2), %s556_s19, 1 }
   0x6   : > { %191 = sbr.rel (%p188_p2) target bundleno = 367 (0x16f), region = 40  ;;  %v296_v1 = vld [vmem:[%s791_s4] sm:$0xff] (!%p188_p2)  ;;  %660 = vset.pattern.permute.xlu1 (!%p188_p2), %v677_v2  ;;  %659 = vset.pattern.permute.xlu0 (!%p188_p2), %v677_v2  ;;  %v297_v4 = vld [vmem:[%s791_s4 + $0x8] sm:$0xff] (!%p188_p2)  ;;  %v298_v8 = vld [vmem:[%s791_s4 + $0x10] sm:$0xff] (!%p188_p2) }
   0x7   : > { %326 = vperm.xlu1 (!%p188_p2), %660, %v300_v0   ;;  %306 = vperm.xlu0 (!%p188_p2), %659, %v296_v1   ;;  %v661_v5 = vld [vmem:[%s788_s1] sm:$0xff] (!%p188_p2)   ;;  %v662_v6 = vld [vmem:[%s788_s1 + $0x8] sm:$0xff] (!%p188_p2)   ;;  %v663_v9 = vld [vmem:[%s788_s1 + $0x10] sm:$0xff] (!%p188_p2)  }
   0x8   : > { %610 = vmatprep.subr.bf16.mxu0 (!%p188_p2), %v661_v5  ;;  %634 = vmatprep.subr.bf16.mxu1 (!%p188_p2), %v661_v5  ;;  %v303_v10 = vld [vmem:[%s791_s4 + $0x38] sm:$0xff] (!%p188_p2)  ;;  %v302_v11 = vld [vmem:[%s791_s4 + $0x30] sm:$0xff] (!%p188_p2)  ;;  %v665_v13 = vld [vmem:[%s788_s1 + $0x20] sm:$0xff] (!%p188_p2)  }
   0x9   : > { %611 = vmatpush3.bf16.msra.mxu0 (!%p188_p2), %v661_v5  ;;  %642 = vmatpush3.bf16.msra.mxu1 (!%p188_p2), %v661_v5  ;;  %v664_v12 = vld [vmem:[%s788_s1 + $0x18] sm:$0xff] (!%p188_p2)   ;;  %v666_v14 = vld [vmem:[%s788_s1 + $0x28] sm:$0xff] (!%p188_p2)   ;;  %v667_v15 = vld [vmem:[%s788_s1 + $0x30] sm:$0xff] (!%p188_p2)  }
   0xa   : > { %612 = vmatprep.subr.bf16.mxu0 (!%p188_p2), %v662_v6  ;;  %635 = vmatprep.subr.bf16.mxu1 (!%p188_p2), %v662_v6  ;;  %v668_v16 = vld [vmem:[%s788_s1 + $0x38] sm:$0xff] (!%p188_p2)   ;;  %v565_v21 = vld [vmem:[%s789_s2] ss:$0 sm:$0xff] (!%p188_p2) }
   0xb   : > { %331 = vperm.xlu1 (!%p188_p2), %660, %v301_v3   ;;  %311 = vperm.xlu0 (!%p188_p2), %659, %v297_v4   ;;  %v566_v27 = vld [vmem:[%s790_s3] ss:$0 sm:$0xff] (!%p188_p2) }
   0xd   : > { %613 = vmatpush3.bf16.msra.mxu0 %v662_v6  ;;  %643 = vmatpush3.bf16.msra.mxu1 %v662_v6  ;;  %s794_s19 = smov (!%p215_p3, %s556_s19), 1 }
   0xe   : > { %614 = vmatprep.subr.bf16.mxu0 %v663_v9  ;;  %636 = vmatprep.subr.bf16.mxu1 %v663_v9  ;;  %s577_s29 = sshll.u32 %s794_s19, 5  ;;  %s578_s12 = sshll.u32 %s794_s19, 6 }
   0xf   : > { %321 = vperm.xlu1 %660, %v299_v7   ;;  %316 = vperm.xlu0 %659, %v298_v8   ;;  %s219_s7 = scalar_lea.vmem %s787_s0, %s577_s29  ;;  %s224_s15 = scalar_lea.vmem %s792_s5, %s578_s12 }
  0x10   : > { %v596_v17 = vld [vmem:[%s219_s7 + $0x10] sm:$0xff]   ;;  %v580_v18 = vld [vmem:[%s219_s7] sm:$0xff]   ;;  %v595_v24 = vld [vmem:[%s219_s7 + $0x8] sm:$0xff]  }
  0x11   : > { %615 = vmatpush3.bf16.msra.mxu0 %v663_v9  ;;  %644 = vmatpush3.bf16.msra.mxu1 %v663_v9  ;;  %v589_v19 = vunpack.c.l.bf16 %v596_v17  ;;  %v590_v20 = vunpack.c.h.bf16 %v596_v17  ;;  %v581_v22 = vunpack.c.l.bf16 %v580_v18  ;;  %v582_v23 = vunpack.c.h.bf16 %v580_v18  ;;  %v597_v32 = vld [vmem:[%s219_s7 + $0x18] sm:$0xff]  }
  0x12   : > { %616 = vmatprep.subr.bf16.mxu0 %v664_v12  ;;  %637 = vmatprep.subr.bf16.mxu1 %v664_v12  ;;  %v586_v30 = vunpack.c.h.bf16 %v595_v24  ;;  %v585_v31 = vunpack.c.l.bf16 %v595_v24  ;;  %v594_v39 = vunpack.c.h.bf16 %v597_v32  ;;  %v593_v40 = vunpack.c.l.bf16 %v597_v32 }
  0x13   : > { %341 = vperm.xlu1 %660, %v303_v10   ;;  %336 = vperm.xlu0 %659, %v302_v11   ;;  %v253_v25 = vmul.f32 %v589_v19, %v565_v21  ;;  %v254_v26 = vmul.f32 %v590_v20, %v565_v21  ;;  %v249_v28 = vmul.f32 %v581_v22, %v565_v21 }
  0x14   : > { %v250_v29 = vmul.f32 %v582_v23, %v565_v21  ;;  %v252_v37 = vmul.f32 %v586_v30, %v565_v21  ;;  %v251_v38 = vmul.f32 %v585_v31, %v565_v21  ;;  %v256_v47 = vmul.f32 %v594_v39, %v565_v21 }
  0x15   : > { %617 = vmatpush3.bf16.msra.mxu0 %v664_v12  ;;  %645 = vmatpush3.bf16.msra.mxu1 %v664_v12  ;;  %v268_v33 = vadd.f32 %v566_v27, %v253_v25  ;;  %v269_v34 = vadd.f32 %v566_v27, %v254_v26  ;;  %v264_v35 = vadd.f32 %v566_v27, %v249_v28 }
  0x16   : > { %618 = vmatprep.subr.bf16.mxu0 %v665_v13  ;;  %638 = vmatprep.subr.bf16.mxu1 %v665_v13  ;;  %v265_v36 = vadd.f32 %v566_v27, %v250_v29  ;;  %v267_v45 = vadd.f32 %v566_v27, %v252_v37  ;;  %v266_v46 = vadd.f32 %v566_v27, %v251_v38 }
  0x17   : > { %vm276_vm0 = vcmp.gt.f32.partialorder %v268_v33, 0.0  ;;  %v284_v41 = vmul.f32 0.1, %v268_v33  ;;  %vm277_vm1 = vcmp.gt.f32.partialorder %v269_v34, 0.0  ;;  %v285_v42 = vmul.f32 0.1, %v269_v34 }
  0x18   : > { %vm272_vm2 = vcmp.gt.f32.partialorder %v264_v35, 0.0  ;;  %v280_v43 = vmul.f32 0.1, %v264_v35  ;;  %vm273_vm3 = vcmp.gt.f32.partialorder %v265_v36, 0.0  ;;  %v281_v44 = vmul.f32 0.1, %v265_v36 }
  0x19   : > { %619 = vmatpush3.bf16.msra.mxu0 %v665_v13  ;;  %646 = vmatpush3.bf16.msra.mxu1 %v665_v13  ;;  %v255_v48 = vmul.f32 %v593_v40, %v565_v21  ;;  %v292_v51 = vsel %vm276_vm0, %v268_v33, %v284_v41  ;;  %v293_v53 = vsel %vm277_vm1, %v269_v34, %v285_v42  ;;  %v283_v55 = vmul.f32 0.1, %v267_v45 }
  0x1a   : > { %620 = vmatprep.subr.bf16.mxu0 %v666_v14  ;;  %639 = vmatprep.subr.bf16.mxu1 %v666_v14  ;;  %v288_v52 = vsel %vm272_vm2, %v264_v35, %v280_v43  ;;  %v289_v54 = vsel %vm273_vm3, %v265_v36, %v281_v44  ;;  %v282_v56 = vmul.f32 0.1, %v266_v46  ;;  %v271_v57 = vadd.f32 %v566_v27, %v256_v47 }
  0x1b   : > { %v270_v58 = vadd.f32 %v566_v27, %v255_v48  ;;  %vm275_vm4 = vcmp.gt.f32.partialorder %v267_v45, 0.0  ;;  %vm274_vm5 = vcmp.gt.f32.partialorder %v266_v46, 0.0 }
  0x1c   : > { %v291_v1 = vsel %vm275_vm4, %v267_v45, %v283_v55  ;;  %v290_v2 = vsel %vm274_vm5, %v266_v46, %v282_v56  ;;  %v287_v3 = vmul.f32 0.1, %v271_v57  ;;  %vm279_vm6 = vcmp.gt.f32.partialorder %v271_v57, 0.0 }
  0x1d   : > { %621 = vmatpush3.bf16.msra.mxu0 %v666_v14  ;;  %647 = vmatpush3.bf16.msra.mxu1 %v666_v14  ;;  %v286_v4 = vmul.f32 0.1, %v270_v58  ;;  %vm278_vm7 = vcmp.gt.f32.partialorder %v270_v58, 0.0 }
  0x1e   : > { %622 = vmatprep.subr.bf16.mxu0 %v667_v15  ;;  %640 = vmatprep.subr.bf16.mxu1 %v667_v15  ;;  %v295_v11 = vsel %vm279_vm6, %v271_v57, %v287_v3 }
  0x1f   : > { %v294_v12 = vsel %vm278_vm7, %v270_v58, %v286_v4 }
  0x21   : > { %623 = vmatpush3.bf16.msra.mxu0 %v667_v15  ;;  %648 = vmatpush3.bf16.msra.mxu1 %v667_v15 }
  0x22   : > { %624 = vmatprep.subr.bf16.mxu0 %v668_v16  ;;  %641 = vmatprep.subr.bf16.mxu1 %v668_v16 }
  0x25   : > { %625 = vmatpush3.bf16.msra.mxu0 %v668_v16  ;;  %649 = vmatpush3.bf16.msra.mxu1 %v668_v16 }
  0x86   : > { %v327_v49 = vpop.permute.xlu1 %326  ;;  %v307_v50 = vpop.permute.xlu0 %306 }
  0x87   : > { %v348_v61 = vmul.f32 %v327_v49, %v292_v51  ;;  %v344_v62 = vmul.f32 %v307_v50, %v288_v52 }
  0x8a   : > { %v332_v59 = vpop.permute.xlu1 %331  ;;  %v312_v60 = vpop.permute.xlu0 %311 }
  0x8b   : > { %v349_v63 = vmul.f32 %v332_v59, %v293_v53  ;;  %v345_v0 = vmul.f32 %v312_v60, %v289_v54 }
  0x8d   : > { %v352_v5 = vpack.c.bf16 %v345_v0, %v344_v62  ;;  %v354_v6 = vpack.c.bf16 %v349_v63, %v348_v61 }
  0x8e   : > { %v322_v7 = vpop.permute.xlu1 %321  ;;  %v317_v8 = vpop.permute.xlu0 %316 }
  0x8f   : > { %v347_v9 = vmul.f32 %v322_v7, %v291_v1  ;;  %v346_v10 = vmul.f32 %v317_v8, %v290_v2  ;;  %626 = vmatprep.mubr.bf16.mxu0 %v352_v5  ;;  %630 = vmatprep.mubr.bf16.mxu1 %v354_v6 }
  0x91   : > { %v353_v13 = vpack.c.bf16 %v347_v9, %v346_v10 }
  0x92   : > { %v342_v14 = vpop.permute.xlu1 %341  ;;  %v337_v15 = vpop.permute.xlu0 %336 }
  0x93   : > { %v351_v16 = vmul.f32 %v342_v14, %v295_v11  ;;  %v350_v17 = vmul.f32 %v337_v15, %v294_v12  ;;  %627 = vmatmul.mubr.bf16.vlgmr.msra.gmra.mrb[0].mxu0 %v353_v13 }
  0x95   : > { %v355_v18 = vpack.c.bf16 %v351_v16, %v350_v17 }
  0x97   : > { %631 = vmatmul.mubr.bf16.vlgmr.msra.gmra.mrb[0].mxu1 %v355_v18 }
 0x166   : > { %v628_v19 = vpop.f32.mrb[0].mxu0 }
 0x167   : > { %495 = vst [vmem:[%s224_s15 + $0x10] sm:$0xff] %v628_v19  ;;  %v462_v20 = vpop.f32.mrb[1].mxu0 }
 0x168   : > { %493 = vst [vmem:[%s224_s15] sm:$0xff] %v462_v20  ;;  %v629_v21 = vpop.f32.mrb[2].mxu0 }
 0x169   : > { %496 = vst [vmem:[%s224_s15 + $0x18] sm:$0xff] %v629_v21  ;;  %v465_v22 = vpop.f32.mrb[3].mxu0 }
 0x16a   : > { %494 = vst [vmem:[%s224_s15 + $0x8] sm:$0xff] %v465_v22  ;;  %v632_v23 = vpop.f32.mrb[0].mxu1 }
 0x16b   : > { %499 = vst [vmem:[%s224_s15 + $0x30] sm:$0xff] %v632_v23  ;;  %v478_v24 = vpop.f32.mrb[1].mxu1 }
 0x16c   : > { %497 = vst [vmem:[%s224_s15 + $0x20] sm:$0xff] %v478_v24  ;;  %v633_v25 = vpop.f32.mrb[2].mxu1 }
 0x16d   : > { %500 = vst [vmem:[%s224_s15 + $0x38] sm:$0xff] %v633_v25  ;;  %v481_v26 = vpop.f32.mrb[3].mxu1 }
 0x16e   : > { %498 = vst [vmem:[%s224_s15 + $0x28] sm:$0xff] %v481_v26 }
 0x16f PF: > { %s15_s18 = sadd.s32 1, %s675_s18  }
 0x170   : > { %p12_p4 = scmp.ge.s32.totalorder %s15_s18, 4  }
 0x172   :  { %14 = sbr.rel (!%p12_p4) target bundleno = 1 (0x1), region = 70 }

// kernel: basic_block_forward.5
= control target key start
LH: loop header
LB: loop body
LE: loop exit
PB: predicated region body
PF: predicated region fallthrough
CT: control target
= control target key end

     0   :  { %s2820_s12 = smov 0   ;;  %s3435_s0 = inlined_call_operand.vmem [shape: bf16[2,104,128], index: 0, kind: input, shape index: {}]   ;;  %s3436_s1 = inlined_call_operand.vmem [shape: bf16[9,128,128], index: 1, kind: input, shape index: {}]   ;;  %s3437_s2 = inlined_call_operand.vmem [shape: f32[2,80,128], index: 2, kind: input, shape index: {}]   ;;  %s3438_s3 = inlined_call_operand.vmem [shape: f32[2,80,128], index: 3, kind: output, shape index: {}]  }
   0x1 LB: > { %s1993_s13 = sadd.s32 4294967295, %s2796_s12   ;;  %p1997_p0 = scmp.ge.s32.totalorder %s2796_s12, 1  ;;  %s2796_s12 = sphi %s2820_s12, %s13_s12  }
   0x2   : > { %p147_p1 = scmp.lt.s32.totalorder %s2796_s12, 3 }
   0x4   : > { %p148_p2 = pnand %p1997_p0, %p147_p1 }
   0x5   : > { %v2695_v0 = vld [vmem:[%s3436_s1 + $0x40] sm:$0xff] (!%p148_p2)   ;;  %v2798_v1 = vmov (!%p148_p2), 0.0   ;;  %v2697_v3 = vld [vmem:[%s3436_s1 + $0x48] sm:$0xff] (!%p148_p2)   ;;  %vm2799_vm0 = vmmov (!%p148_p2), 0   ;;  %p176_p3 = scmp.lt.s32.totalorder (!%p148_p2), %s1993_s13, 1  ;;  %v2699_v5 = vld [vmem:[%s3436_s1 + $0x50] sm:$0xff] (!%p148_p2)  }
   0x6   : > { %151 = sbr.rel (%p148_p2) target bundleno = 433 (0x1b1), region = 32  ;;  %2343 = vmatprep.subr.bf16.mxu0 (!%p148_p2), %v2798_v1  ;;  %2379 = vmatprep.subr.bf16.mxu1 (!%p148_p2), %v2798_v1  ;;  %v2696_v2 = vld [vmem:[%s3436_s1] sm:$0xff] (!%p148_p2)   ;;  %v2698_v4 = vld [vmem:[%s3436_s1 + $0x8] sm:$0xff] (!%p148_p2)   ;;  %v2700_v6 = vld [vmem:[%s3436_s1 + $0x10] sm:$0xff] (!%p148_p2)   ;;  %vm264_vm1 = vsmask.f32 (!%p148_p2), 7424 }
   0x7   : > { %2344 = vmatpush3.bf16.msra.mxu0 (!%p148_p2), %v2695_v0  ;;  %2359 = vmatprep.mubr.msk.bf16.mxu0 (!%p148_p2), %vm2799_vm0, %v2798_v1  ;;  %v2701_v7 = vld [vmem:[%s3436_s1 + $0x58] sm:$0xff] (!%p148_p2)   ;;  %v2703_v9 = vld [vmem:[%s3436_s1 + $0x60] sm:$0xff] (!%p148_p2)   ;;  %v2705_v13 = vld [vmem:[%s3436_s1 + $0x68] sm:$0xff] (!%p148_p2)   ;;  %vm582_vm2 = vcmask (!%p148_p2), 1046528   ;;  %vm954_vm3 = vsmask.f32 (!%p148_p2), 6400 }
   0x8   : > { %2380 = vmatpush3.bf16.msra.mxu1 (!%p148_p2), %v2696_v2  ;;  %2345 = vmatprep.subr.bf16.mxu0 (!%p148_p2), %v2798_v1  ;;  %v2702_v8 = vld [vmem:[%s3436_s1 + $0x18] sm:$0xff] (!%p148_p2)   ;;  %v2704_v10 = vld [vmem:[%s3436_s1 + $0x20] sm:$0xff] (!%p148_p2)   ;;  %v2706_v16 = vld [vmem:[%s3436_s1 + $0x28] sm:$0xff] (!%p148_p2)   ;;  %vm1165_vm4 = vcmask (!%p148_p2), 1045504   ;;  %vm1537_vm5 = vsmask.f32 (!%p148_p2), 5376 }
   0x9   : > { %2381 = vmatprep.subr.bf16.mxu1 (!%p148_p2), %v2798_v1  ;;  %2395 = vmatprep.mubr.msk.bf16.mxu1 (!%p148_p2), %vm2799_vm0, %v2798_v1  ;;  %v2707_v18 = vld [vmem:[%s3436_s1 + $0x70] sm:$0xff] (!%p148_p2)   ;;  %v2709_v23 = vld [vmem:[%s3436_s1 + $0x78] sm:$0xff] (!%p148_p2)   ;;  %v2713_v28 = vld [vmem:[%s3436_s1 + $0x80] sm:$0xff] (!%p148_p2)   ;;  %vm1748_vm6 = vcmask (!%p148_p2), 1044480  }
   0xa   : > { %v2708_v22 = vld [vmem:[%s3436_s1 + $0x30] sm:$0xff] (!%p148_p2)   ;;  %v2710_v24 = vld [vmem:[%s3436_s1 + $0x38] sm:$0xff] (!%p148_p2)   ;;  %v2716_v32 = vld [vmem:[%s3436_s1 + $0xc0] sm:$0xff] (!%p148_p2)  }
   0xb   : > { %2346 = vmatpush3.bf16.msra.mxu0 (!%p148_p2), %v2697_v3  ;;  %v2714_v34 = vld [vmem:[%s3436_s1 + $0x88] sm:$0xff] (!%p148_p2)   ;;  %v2717_v40 = vld [vmem:[%s3436_s1 + $0x90] sm:$0xff] (!%p148_p2)   ;;  %v2720_v44 = vld [vmem:[%s3436_s1 + $0x98] sm:$0xff] (!%p148_p2)  }
   0xc   : > { %2382 = vmatpush3.bf16.msra.mxu1 (!%p148_p2), %v2698_v4  ;;  %2347 = vmatprep.subr.bf16.mxu0 (!%p148_p2), %v2798_v1  ;;  %v2718_v37 = vld [vmem:[%s3436_s1 + $0xc8] sm:$0xff] (!%p148_p2)   ;;  %v2721_v42 = vld [vmem:[%s3436_s1 + $0xd0] sm:$0xff] (!%p148_p2)   ;;  %v2723_v47 = vld [vmem:[%s3436_s1 + $0xd8] sm:$0xff] (!%p148_p2)  }
   0xd   : > { %s3440_s13 = smov (!%p176_p3, %s1993_s13), 1  ;;  %2383 = vmatprep.subr.bf16.mxu1 %v2798_v1  ;;  %v2722_v48 = vld [vmem:[%s3436_s1 + $0xa0] sm:$0xff]   ;;  %v2726_v56 = vld [vmem:[%s3436_s1 + $0xa8] sm:$0xff]   ;;  %v2728_v61 = vld [vmem:[%s3436_s1 + $0xb0] sm:$0xff]  }
   0xe   : > { %s2683_s26 = smul.u32 52, %s3440_s13  ;;  %v2725_v52 = vld [vmem:[%s3436_s1 + $0xe0] sm:$0xff]   ;;  %v2727_v57 = vld [vmem:[%s3436_s1 + $0xe8] sm:$0xff]   ;;  %v2730_v62 = vld [vmem:[%s3436_s1 + $0xf0] sm:$0xff]  }
   0xf   : > { %2348 = vmatpush3.bf16.msra.mxu0 %v2699_v5  ;;  %v2731_v63 = vld [vmem:[%s3436_s1 + $0xb8] sm:$0xff]  }
  0x10   : > { %2384 = vmatpush3.bf16.msra.mxu1 %v2700_v6  ;;  %2349 = vmatprep.subr.bf16.mxu0 %v2798_v1  ;;  %s2870_s6 = scalar_lea.vmem %s3435_s0, %s2683_s26  ;;  %v2732_v3 = vld [vmem:[%s3436_s1 + $0xf8] sm:$0xff]  }
  0x11   : > { %2385 = vmatprep.subr.bf16.mxu1 %v2798_v1  ;;  %v192_v11 = vld [vmem:[%s2870_s6] sm:$0xf]  ;;  %v2882_v12 = vld [vmem:[%s2870_s6 + $0x4] sm:$0xf]  ;;  %v2889_v15 = vld [vmem:[%s2870_s6 + $0x8] sm:$0xff]  }
  0x12   : > { %v2017_v14 = vcombine.low %v192_v11, %v2882_v12  ;;  %v273_v21 = vshll.u32 %v2889_v15, 16  ;;  %v2912_v27 = vld [vmem:[%s2870_s6 + $0x10] sm:$0xff]   ;;  %v277_v30 = vshrl.u32 %v2889_v15, 16  ;;  %v2928_v33 = vld [vmem:[%s2870_s6 + $0x18] sm:$0xff]   ;;  %v2957_v45 = vld [vmem:[%s2870_s6 + $0x20] sm:$0xff]  }
  0x13   : > { %2350 = vmatpush3.bf16.msra.mxu0 %v2701_v7  ;;  %v281_v31 = vshll.u32 %v2912_v27, 16  ;;  %v289_v38 = vshll.u32 %v2928_v33, 16  ;;  %v285_v41 = vshrl.u32 %v2912_v27, 16  ;;  %v293_v50 = vshrl.u32 %v2928_v33, 16  ;;  %v561_v4 = vld [vmem:[%s2870_s6] sm:$0xe] }
  0x14   : > { %2386 = vmatpush3.bf16.msra.mxu1 %v2702_v8  ;;  %2351 = vmatprep.subr.bf16.mxu0 %v2798_v1  ;;  %v268_v17 = vshll.u32 %v2017_v14, 16  ;;  %v266_v19 = vshrl.u32 %v2017_v14, 16  ;;  %v275_v26 = vrot.slane %v273_v21, 1  ;;  %v297_v51 = vshll.u32 %v2957_v45, 16  ;;  %v730_v5 = vld [vmem:[%s2870_s6 + $0x4] sm:$0xe] }
  0x15   : > { %2387 = vmatprep.subr.bf16.mxu1 %v2798_v1  ;;  %v283_v36 = vrot.slane %v281_v31, 1  ;;  %v291_v43 = vrot.slane %v289_v38, 1  ;;  %v2980_v53 = vld [vmem:[%s2870_s6 + $0x28] ss:$0 sps:$4 sm:$0x11]   ;;  %v301_v59 = vshrl.u32 %v2957_v45, 16  ;;  %v2055_v8 = vcombine.low %v561_v4, %v2882_v12 }
  0x16   : > { %v270_v20 = vrot.slane %v268_v17, 1  ;;  %v279_v35 = vor.u32 %v277_v30, %v275_v26  ;;  %v299_v55 = vrot.slane %v297_v51, 1  ;;  %v305_v60 = vshll.u32 %v2980_v53, 16  ;;  %v3022_v6 = vld [vmem:[%s2870_s6 + $0x8] sm:$0xf]  ;;  %v2736_v17 = vld [vmem:[%s3436_s1 + $0x100] sm:$0xff]  }
  0x17   : > { %2352 = vmatpush3.bf16.msra.mxu0 %v2703_v9  ;;  %v287_v46 = vor.u32 %v285_v41, %v283_v36  ;;  %v295_v54 = vor.u32 %v293_v50, %v291_v43  ;;  %v3028_v9 = vcombine.low %v730_v5, %v3022_v6  ;;  %v583_v11 = vrot.slane %v2055_v8, 1  ;;  %v2743_v30 = vld [vmem:[%s3436_s1 + $0x118] sm:$0xff]   ;;  %v2750_v41 = vld [vmem:[%s3436_s1 + $0x168] sm:$0xff]  }
  0x18   : > { %2388 = vmatpush3.bf16.msra.mxu1 %v2704_v10  ;;  %2353 = vmatprep.subr.bf16.mxu0 %v2798_v1  ;;  %v271_v25 = vor.u32 %v270_v20, %v266_v19  ;;  %v284_v39 = vsel %vm264_vm1, %v279_v35, %v283_v36  ;;  %v303_v0 = vor.u32 %v301_v59, %v299_v55  ;;  %v307_v2 = vrot.slane %v305_v60, 1  ;;  %v3031_v10 = vld [vmem:[%s2870_s6 + $0xc] sm:$0xff]   ;;  %v3049_v19 = vld [vmem:[%s2870_s6 + $0x14] sm:$0xff]   ;;  %v3102_v36 = vld [vmem:[%s2870_s6 + $0x24] sm:$0xff]  }
  0x19   : > { %2389 = vmatprep.subr.bf16.mxu1 %v2798_v1  ;;  %v292_v49 = vsel %vm264_vm1, %v287_v46, %v291_v43  ;;  %v300_v58 = vsel %vm264_vm1, %v295_v54, %v299_v55  ;;  %v584_v12 = vrot.slane %v2889_v15, 1  ;;  %v2737_v20 = vld [vmem:[%s3436_s1 + $0x108] sm:$0xff]   ;;  %v586_v21 = vrot.slane %v2912_v27, 1  ;;  %v2753_v46 = vld [vmem:[%s3436_s1 + $0x170] sm:$0xff]   ;;  %v2755_v54 = vld [vmem:[%s3436_s1 + $0x178] sm:$0xff]  }
  0x1a   : > { %v276_v29 = vsel %vm264_vm1, %v271_v25, %v275_v26  ;;  %v308_v7 = vsel %vm264_vm1, %v303_v0, %v307_v2  ;;  %v2740_v25 = vld [vmem:[%s3436_s1 + $0x110] sm:$0xff]   ;;  %v590_v38 = vrot.slane %v2957_v45, 1  ;;  %v2752_v43 = vld [vmem:[%s2870_s6 + $0x2c] ss:$0 sps:$4 sm:$0x11]   ;;  %v964_v50 = vshrl.u32 %v3031_v10, 16 }
  0x1b   : > { %2354 = vmatpush3.bf16.msra.mxu0 %v2705_v13  ;;  %v786_v13 = vrot.slane %v3028_v9, 1  ;;  %v967_v51 = vshll.u32 %v3031_v10, 16  ;;  %v1144_v55 = vld [vmem:[%s2870_s6 + $0x4] sm:$0xc]  ;;  %v973_v2 = vshrl.u32 %v3049_v19, 16  ;;  %v1167_v5 = vrot.slane %v3031_v10, 2 }
  0x1c   : > { %2390 = vmatpush3.bf16.msra.mxu1 %v2706_v16  ;;  %2355 = vmatprep.subr.bf16.mxu0 %v2798_v1  ;;  %v585_v16 = vsel %vm582_vm2, %v583_v11, %v584_v12  ;;  %v966_v59 = vrot.slane %v964_v50, 1 }
  0x1d   : > { %2391 = vmatprep.subr.bf16.mxu1 %v2798_v1  ;;  %v969_v60 = vrot.slane %v967_v51, 2  ;;  %v975_v8 = vrot.slane %v973_v2, 1  ;;  %v3247_v51 = vld [vmem:[%s2870_s6 + $0x10] sm:$0xff]  }
  0x1f   : > { %2356 = vmatpush3.bf16.msra.mxu0 %v2707_v18  ;;  %v970_v0 = vor.u32 %v969_v60, %v966_v59  ;;  %v1550_v59 = vshll.u32 %v3247_v51, 16  ;;  %v2773_v60 = vld [vmem:[%s3436_s1 + $0x1f8] sm:$0xff]  }
  0x20   : > { %2392 = vmatpush3.bf16.msra.mxu1 %v2708_v22  ;;  %2357 = vmatprep.subr.bf16.mxu0 %v2798_v1  ;;  %v789_v22 = vrot.slane %v3049_v19, 1 }
  0x21   : > { %2393 = vmatprep.subr.bf16.mxu1 %v2798_v1 }
  0x23   : > { %2358 = vmatpush3.bf16.msra.mxu0 %v2709_v23  ;;  %v2741_v23 = vld [vmem:[%s3436_s1 + $0x148] sm:$0xff]  }
  0x24   : > { %2394 = vmatpush3.bf16.msra.mxu1 %v2710_v24  ;;  %2415 = vmatprep.subr.bf16.mxu0 %v2798_v1  ;;  %v587_v24 = vsel %vm582_vm2, %v584_v12, %v586_v21  ;;  %v2759_v12 = vld [vmem:[%s3436_s1 + $0x1c0] sm:$0xff]  }
  0x25   : > { %2451 = vmatprep.subr.bf16.mxu1 %v2798_v1 }
  0x26   : > { %2360 = vmatmul.mubr.bf16.vlgmr.msra.gmra.mrb[0].mxu0 %v276_v29  ;;  %v588_v29 = vrot.slane %v2928_v33, 1 }
  0x27   : > { %2396 = vmatmul.mubr.bf16.vlgmr.msra.gmra.mrb[0].mxu1 %v2017_v14  ;;  %2416 = vmatpush3.bf16.msra.mxu0 %v2713_v28  ;;  %v787_v14 = vrot.slane %v3031_v10, 1  ;;  %v2744_v28 = vld [vmem:[%s3436_s1 + $0x150] sm:$0xff]   ;;  %v2758_v10 = vld [vmem:[%s3436_s1 + $0x188] sm:$0xff]  }
  0x28   : > { %2417 = vmatprep.subr.bf16.mxu0 %v2798_v1  ;;  %2363 = vmatprep.mubr.msk.bf16.mxu0 %vm2799_vm0, %v2798_v1 }
  0x29   : > { %2399 = vmatprep.mubr.msk.bf16.mxu1 %vm2799_vm0, %v2798_v1  ;;  %2452 = vmatpush3.bf16.msra.mxu1 %v2716_v32  ;;  %v788_v18 = vsel %vm582_vm2, %v786_v13, %v787_v14  ;;  %v790_v26 = vsel %vm582_vm2, %v787_v14, %v789_v22  ;;  %v2746_v32 = vld [vmem:[%s3436_s1 + $0x158] sm:$0xff]  }
  0x2a   : > { %2453 = vmatprep.subr.bf16.mxu1 %v2798_v1 }
  0x2b   : > { %2418 = vmatpush3.bf16.msra.mxu0 %v2714_v34  ;;  %v2745_v34 = vld [vmem:[%s3436_s1 + $0x120] sm:$0xff]  }
  0x2c   : > { %2419 = vmatprep.subr.bf16.mxu0 %v2798_v1 }
  0x2d   : > { %2454 = vmatpush3.bf16.msra.mxu1 %v2718_v37  ;;  %v2748_v37 = vld [vmem:[%s3436_s1 + $0x160] sm:$0xff]  }
  0x2e   : > { %2364 = vmatmul.mubr.bf16.gmra.mrb[4].mxu0 %v284_v39  ;;  %2455 = vmatprep.subr.bf16.mxu1 %v2798_v1  ;;  %v2749_v39 = vld [vmem:[%s3436_s1 + $0x128] sm:$0xff]  }
  0x2f   : > { %2400 = vmatmul.mubr.bf16.gmra.mrb[4].mxu1 %v2889_v15  ;;  %2420 = vmatpush3.bf16.msra.mxu0 %v2717_v40  ;;  %v2739_v15 = vld [vmem:[%s3436_s1 + $0x140] sm:$0xff]   ;;  %v793_v40 = vrot.slane %v3102_v36, 1 }
  0x30   : > { %2367 = vmatprep.mubr.msk.bf16.mxu0 %vm2799_vm0, %v2798_v1  ;;  %2403 = vmatprep.mubr.msk.bf16.mxu1 %vm2799_vm0, %v2798_v1 }
  0x31   : > { %2421 = vmatprep.subr.bf16.mxu0 %v2798_v1  ;;  %2456 = vmatpush3.bf16.msra.mxu1 %v2721_v42  ;;  %v591_v42 = vsel %vm582_vm2, %v588_v29, %v590_v38 }
  0x32   : > { %2457 = vmatprep.subr.bf16.mxu1 %v2798_v1 }
  0x33   : > { %2422 = vmatpush3.bf16.msra.mxu0 %v2720_v44 }
  0x34   : > { %2423 = vmatprep.subr.bf16.mxu0 %v2798_v1 }
  0x35   : > { %2458 = vmatpush3.bf16.msra.mxu1 %v2723_v47  ;;  %v592_v47 = vrot.slane %v2980_v53, 1  ;;  %v2754_v53 = vld [vmem:[%s3436_s1 + $0x138] sm:$0xff]  }
  0x36   : > { %2368 = vmatmul.mubr.bf16.gmra.mrb[8].mxu0 %v292_v49  ;;  %2459 = vmatprep.subr.bf16.mxu1 %v2798_v1  ;;  %v959_v49 = vshll.u32 %v3028_v9, 16 }
  0x37   : > { %2404 = vmatmul.mubr.bf16.gmra.mrb[8].mxu1 %v2912_v27  ;;  %2424 = vmatpush3.bf16.msra.mxu0 %v2722_v48  ;;  %v3075_v27 = vld [vmem:[%s2870_s6 + $0x1c] sm:$0xff]   ;;  %v956_v48 = vshrl.u32 %v3028_v9, 16 }
  0x38   : > { %2371 = vmatprep.mubr.msk.bf16.mxu0 %vm2799_vm0, %v2798_v1  ;;  %2407 = vmatprep.mubr.msk.bf16.mxu1 %vm2799_vm0, %v2798_v1  ;;  %v791_v31 = vrot.slane %v3075_v27, 1  ;;  %v982_v14 = vshrl.u32 %v3075_v27, 16 }
  0x39   : > { %2425 = vmatprep.subr.bf16.mxu0 %v2798_v1  ;;  %2460 = vmatpush3.bf16.msra.mxu1 %v2725_v52  ;;  %v795_v52 = vrot.slane %v2752_v43, 1  ;;  %v2768_v43 = vld [vmem:[%s3436_s1 + $0x1e8] sm:$0xff]  }
  0x3a   : > { %2461 = vmatprep.subr.bf16.mxu1 %v2798_v1  ;;  %v792_v35 = vsel %vm582_vm2, %v789_v22, %v791_v31  ;;  %v794_v44 = vsel %vm582_vm2, %v791_v31, %v793_v40 }
  0x3b   : > { %2426 = vmatpush3.bf16.msra.mxu0 %v2726_v56  ;;  %v593_v56 = vsel %vm582_vm2, %v590_v38, %v592_v47 }
  0x3c   : > { %2427 = vmatprep.subr.bf16.mxu0 %v2798_v1 }
  0x3d   : > { %2462 = vmatpush3.bf16.msra.mxu1 %v2727_v57  ;;  %v958_v57 = vrot.slane %v956_v48, 1 }
  0x3e   : > { %2372 = vmatmul.mubr.bf16.gmra.mrb[12].mxu0 %v300_v58  ;;  %2463 = vmatprep.subr.bf16.mxu1 %v2798_v1  ;;  %v961_v58 = vrot.slane %v959_v49, 2 }
  0x3f   : > { %2408 = vmatmul.mubr.bf16.gmra.mrb[12].mxu1 %v2928_v33  ;;  %2375 = vmatprep.mubr.msk.bf16.mxu0 %vm2799_vm0, %v2798_v1  ;;  %v589_v33 = vsel %vm582_vm2, %v586_v21, %v588_v29  ;;  %v984_v21 = vrot.slane %v982_v14, 1  ;;  %v1171_v29 = vrot.slane %v3075_v27, 2 }
  0x40   : > { %2411 = vmatprep.mubr.msk.bf16.mxu1 %vm2799_vm0, %v2798_v1  ;;  %2428 = vmatpush3.bf16.msra.mxu0 %v2728_v61  ;;  %v796_v61 = vsel %vm582_vm2, %v793_v40, %v795_v52  ;;  %v2771_v52 = vld [vmem:[%s3436_s1 + $0x1f0] sm:$0xff]  }
  0x41   : > { %2464 = vmatpush3.bf16.msra.mxu1 %v2730_v62  ;;  %2429 = vmatprep.subr.bf16.mxu0 %v2798_v1  ;;  %v2135_v62 = vcombine.low %v1144_v55, %v3022_v6  ;;  %v2772_v55 = vld [vmem:[%s3436_s1 + $0x1b8] sm:$0xff]  }
  0x42   : > { %2465 = vmatprep.subr.bf16.mxu1 %v2798_v1 }
  0x43   : > { %v1166_v4 = vrot.slane %v2135_v62, 2 }
  0x44   : > { %2430 = vmatpush3.bf16.msra.mxu0 %v2731_v63  ;;  %v962_v63 = vor.u32 %v961_v58, %v958_v57  ;;  %v1547_v58 = vshrl.u32 %v3247_v51, 16 }
  0x45   : > { %2466 = vmatpush3.bf16.msra.mxu1 %v2732_v3  ;;  %2487 = vmatprep.subr.bf16.mxu0 %v2798_v1  ;;  %v976_v3 = vshll.u32 %v3049_v19, 16  ;;  %v1168_v11 = vsel %vm1165_vm4, %v1166_v4, %v1167_v5  ;;  %v3270_v4 = vld [vmem:[%s2870_s6 + $0x18] sm:$0xff]  }
  0x46   : > { %2376 = vmatmul.mubr.bf16.gmra.mrb[16].mxu0 %v308_v7  ;;  %2523 = vmatprep.subr.bf16.mxu1 %v2798_v1  ;;  %v971_v6 = vsel %vm954_vm3, %v962_v63, %v970_v0  ;;  %v2757_v7 = vld [vmem:[%s3436_s1 + $0x180] sm:$0xff]   ;;  %v1549_v2 = vrot.slane %v1547_v58, 2 }
  0x47   : > { %2412 = vmatmul.mubr.bf16.gmra.mrb[16].mxu1 %v2957_v45  ;;  %2431 = vmatprep.mubr.msk.bf16.mxu0 %vm2799_vm0, %v2798_v1  ;;  %v2751_v45 = vld [vmem:[%s3436_s1 + $0x130] sm:$0xff]   ;;  %v978_v9 = vrot.slane %v976_v3, 2  ;;  %v1552_v3 = vrot.slane %v1550_v59, 3 }
  0x48   : > { %2467 = vmatprep.mubr.msk.bf16.mxu1 %vm2799_vm0, %v2798_v1 }
  0x49   : > { %v979_v13 = vor.u32 %v978_v9, %v975_v8  ;;  %v1553_v8 = vor.u32 %v1552_v3, %v1549_v2  ;;  %v1556_v9 = vshrl.u32 %v3270_v4, 16 }
  0x4b   : > { %v1558_v14 = vrot.slane %v1556_v9, 2 }
  0x4e   : > { %2432 = vmatmul.mubr.bf16.vlgmr.msra.gmra.mrb[20].mxu0 %v585_v16  ;;  %v985_v16 = vshll.u32 %v3075_v27, 16 }
  0x4f   : > { %2468 = vmatmul.mubr.bf16.vlgmr.msra.gmra.mrb[20].mxu1 %v788_v18  ;;  %2488 = vmatpush3.bf16.msra.mxu0 %v2736_v17  ;;  %v1169_v17 = vrot.slane %v3049_v19, 2  ;;  %v2761_v18 = vld [vmem:[%s3436_s1 + $0x1c8] sm:$0xff]  }
  0x50   : > { %2489 = vmatprep.subr.bf16.mxu0 %v2798_v1  ;;  %2435 = vmatprep.mubr.msk.bf16.mxu0 %vm2799_vm0, %v2798_v1  ;;  %v987_v22 = vrot.slane %v985_v16, 2 }
  0x51   : > { %2471 = vmatprep.mubr.msk.bf16.mxu1 %vm2799_vm0, %v2798_v1  ;;  %2524 = vmatpush3.bf16.msra.mxu1 %v2739_v15  ;;  %v980_v15 = vsel %vm954_vm3, %v970_v0, %v979_v13  ;;  %v1170_v19 = vsel %vm1165_vm4, %v1167_v5, %v1169_v17  ;;  %v1172_v27 = vsel %vm1165_vm4, %v1169_v17, %v1171_v29  ;;  %v3287_v17 = vld [vmem:[%s2870_s6 + $0x20] sm:$0xff]  }
  0x52   : > { %2525 = vmatprep.subr.bf16.mxu1 %v2798_v1 }
  0x53   : > { %2490 = vmatpush3.bf16.msra.mxu0 %v2737_v20  ;;  %v2760_v20 = vld [vmem:[%s3436_s1 + $0x190] sm:$0xff]  }
  0x54   : > { %2491 = vmatprep.subr.bf16.mxu0 %v2798_v1 }
  0x55   : > { %2526 = vmatpush3.bf16.msra.mxu1 %v2741_v23  ;;  %v2763_v23 = vld [vmem:[%s3436_s1 + $0x1d0] sm:$0xff]  }
  0x56   : > { %2436 = vmatmul.mubr.bf16.gmra.mrb[24].mxu0 %v587_v24  ;;  %2527 = vmatprep.subr.bf16.mxu1 %v2798_v1  ;;  %v988_v24 = vor.u32 %v987_v22, %v984_v21  ;;  %v1565_v21 = vshrl.u32 %v3287_v17, 16  ;;  %v1568_v22 = vshll.u32 %v3287_v17, 16 }
  0x57   : > { %2472 = vmatmul.mubr.bf16.gmra.mrb[24].mxu1 %v790_v26  ;;  %2492 = vmatpush3.bf16.msra.mxu0 %v2740_v25  ;;  %v2762_v25 = vld [vmem:[%s3436_s1 + $0x198] sm:$0xff]   ;;  %v991_v26 = vshrl.u32 %v3102_v36, 16 }
  0x58   : > { %2439 = vmatprep.mubr.msk.bf16.mxu0 %vm2799_vm0, %v2798_v1  ;;  %2475 = vmatprep.mubr.msk.bf16.mxu1 %vm2799_vm0, %v2798_v1  ;;  %v989_v31 = vsel %vm954_vm3, %v979_v13, %v988_v24 }
  0x59   : > { %2493 = vmatprep.subr.bf16.mxu0 %v2798_v1  ;;  %2528 = vmatpush3.bf16.msra.mxu1 %v2744_v28  ;;  %v994_v28 = vshll.u32 %v3102_v36, 16 }
  0x5a   : > { %2529 = vmatprep.subr.bf16.mxu1 %v2798_v1 }
  0x5b   : > { %2494 = vmatpush3.bf16.msra.mxu0 %v2743_v30  ;;  %v2765_v30 = vld [vmem:[%s3436_s1 + $0x1d8] sm:$0xff]  }
  0x5c   : > { %2495 = vmatprep.subr.bf16.mxu0 %v2798_v1 }
  0x5d   : > { %2530 = vmatpush3.bf16.msra.mxu1 %v2746_v32  ;;  %v2764_v32 = vld [vmem:[%s3436_s1 + $0x1a0] sm:$0xff]  }
  0x5e   : > { %2440 = vmatmul.mubr.bf16.gmra.mrb[28].mxu0 %v589_v33  ;;  %2531 = vmatprep.subr.bf16.mxu1 %v2798_v1  ;;  %v993_v33 = vrot.slane %v991_v26, 1  ;;  %v1570_v26 = vrot.slane %v1568_v22, 3 }
  0x5f   : > { %2476 = vmatmul.mubr.bf16.gmra.mrb[28].mxu1 %v792_v35  ;;  %2496 = vmatpush3.bf16.msra.mxu0 %v2745_v34  ;;  %v996_v34 = vrot.slane %v994_v28, 2  ;;  %v2770_v35 = vld [vmem:[%s2870_s6 + $0x2c] ss:$0 sps:$4 sm:$0x33]  }
  0x60   : > { %2443 = vmatprep.mubr.msk.bf16.mxu0 %vm2799_vm0, %v2798_v1  ;;  %2479 = vmatprep.mubr.msk.bf16.mxu1 %vm2799_vm0, %v2798_v1  ;;  %v1000_v40 = vshrl.u32 %v2770_v35, 16  ;;  %v3308_v28 = vld [vmem:[%s2870_s6 + $0x28] sm:$0xff]  }
  0x61   : > { %2497 = vmatprep.subr.bf16.mxu0 %v2798_v1  ;;  %2532 = vmatpush3.bf16.msra.mxu1 %v2748_v37  ;;  %v2766_v37 = vld [vmem:[%s3436_s1 + $0x1e0] sm:$0xff]   ;;  %v997_v38 = vor.u32 %v996_v34, %v993_v33  ;;  %v1577_v33 = vshll.u32 %v3308_v28, 16 }
  0x62   : > { %2533 = vmatprep.subr.bf16.mxu1 %v2798_v1  ;;  %v1002_v47 = vrot.slane %v1000_v40, 1  ;;  %v1376_v40 = vrot.slane %v3308_v28, 2 }
  0x63   : > { %2498 = vmatpush3.bf16.msra.mxu0 %v2749_v39  ;;  %v2767_v39 = vld [vmem:[%s3436_s1 + $0x1a8] sm:$0xff]  }
  0x64   : > { %2499 = vmatprep.subr.bf16.mxu0 %v2798_v1 }
  0x65   : > { %2534 = vmatpush3.bf16.msra.mxu1 %v2750_v41  ;;  %v1003_v41 = vshll.u32 %v2770_v35, 16 }
  0x66   : > { %2444 = vmatmul.mubr.bf16.gmra.mrb[32].mxu0 %v591_v42  ;;  %2535 = vmatprep.subr.bf16.mxu1 %v2798_v1  ;;  %v1173_v42 = vrot.slane %v3102_v36, 2  ;;  %v2769_v36 = vld [vmem:[%s3436_s1 + $0x1b0] sm:$0xff]  }
  0x67   : > { %2480 = vmatmul.mubr.bf16.gmra.mrb[32].mxu1 %v794_v44  ;;  %2447 = vmatprep.mubr.msk.bf16.mxu0 %vm2799_vm0, %v2798_v1  ;;  %v1313_v44 = vld [vmem:[%s2870_s6 + $0x8] sm:$0xc]  ;;  %v1005_v48 = vrot.slane %v1003_v41, 2 }
  0x68   : > { %2483 = vmatprep.mubr.msk.bf16.mxu1 %vm2799_vm0, %v2798_v1  ;;  %2500 = vmatpush3.bf16.msra.mxu0 %v2751_v45  ;;  %v3236_v45 = vld [vmem:[%s2870_s6 + $0xc] sm:$0xf]  ;;  %v1174_v49 = vsel %vm1165_vm4, %v1171_v29, %v1173_v42  ;;  %v1374_v29 = vrot.slane %v3287_v17, 2 }
  0x69   : > { %2536 = vmatpush3.bf16.msra.mxu1 %v2753_v46  ;;  %2501 = vmatprep.subr.bf16.mxu0 %v2798_v1  ;;  %v998_v46 = vsel %vm954_vm3, %v988_v24, %v997_v38  ;;  %v2160_v50 = vcombine.low %v1313_v44, %v3236_v45  ;;  %v2784_v41 = vld [vmem:[%s3436_s1 + $0x228] sm:$0xff]  }
  0x6a   : > { %2537 = vmatprep.subr.bf16.mxu1 %v2798_v1 }
  0x6b   : > { %v1542_v57 = vshll.u32 %v2160_v50, 16  ;;  %v1369_v5 = vrot.slane %v2160_v50, 2 }
  0x6c   : > { %2502 = vmatpush3.bf16.msra.mxu0 %v2754_v53  ;;  %v1006_v53 = vor.u32 %v1005_v48, %v1002_v47  ;;  %v2786_v47 = vld [vmem:[%s2870_s6 + $0x30] ss:$0 sps:$4 sm:$0x33]  }
  0x6d   : > { %2538 = vmatpush3.bf16.msra.mxu1 %v2755_v54  ;;  %2559 = vmatprep.subr.bf16.mxu0 %v2798_v1  ;;  %v1175_v54 = vrot.slane %v2770_v35, 2  ;;  %v1544_v0 = vrot.slane %v1542_v57, 3  ;;  %v2782_v35 = vld [vmem:[%s3436_s1 + $0x220] sm:$0xff]  }
  0x6e   : > { %2448 = vmatmul.mubr.bf16.gmra.mrb[36].mxu0 %v593_v56  ;;  %2595 = vmatprep.subr.bf16.mxu1 %v2798_v1  ;;  %v1539_v56 = vshrl.u32 %v2160_v50, 16 }
  0x6f   : > { %2484 = vmatmul.mubr.bf16.gmra.mrb[36].mxu1 %v796_v61  ;;  %2503 = vmatprep.mubr.msk.bf16.mxu0 %vm2799_vm0, %v2798_v1  ;;  %v1007_v61 = vsel %vm954_vm3, %v997_v38, %v1006_v53  ;;  %v1176_v62 = vsel %vm1165_vm4, %v1173_v42, %v1175_v54  ;;  %v1579_v38 = vrot.slane %v1577_v33, 3  ;;  %v2788_v54 = vld [vmem:[%s3436_s1 + $0x238] sm:$0xff]  }
  0x70   : > { %2539 = vmatprep.mubr.msk.bf16.mxu1 %vm2799_vm0, %v2798_v1  ;;  %v1541_v63 = vrot.slane %v1539_v56, 2 }
  0x76   : > { %2504 = vmatmul.mubr.bf16.vlgmr.msra.gmra.mrb[40].mxu0 %v971_v6  ;;  %v1370_v6 = vrot.slane %v3247_v51, 2 }
  0x77   : > { %2540 = vmatmul.mubr.bf16.vlgmr.msra.gmra.mrb[40].mxu1 %v1168_v11  ;;  %2560 = vmatpush3.bf16.msra.mxu0 %v2757_v7  ;;  %v1545_v7 = vor.u32 %v1544_v0, %v1541_v63  ;;  %v1559_v11 = vshll.u32 %v3270_v4, 16  ;;  %v1752_v0 = vrot.slane %v3270_v4, 3 }
  0x78   : > { %2561 = vmatprep.subr.bf16.mxu0 %v2798_v1  ;;  %2507 = vmatprep.mubr.msk.bf16.mxu0 %vm2799_vm0, %v2798_v1 }
  0x79   : > { %2543 = vmatprep.mubr.msk.bf16.mxu1 %vm2799_vm0, %v2798_v1  ;;  %2596 = vmatpush3.bf16.msra.mxu1 %v2759_v12  ;;  %v1371_v12 = vsel %vm1165_vm4, %v1369_v5, %v1370_v6  ;;  %v1554_v13 = vsel %vm1537_vm5, %v1545_v7, %v1553_v8  ;;  %v1561_v16 = vrot.slane %v1559_v11, 3 }
  0x7a   : > { %2597 = vmatprep.subr.bf16.mxu1 %v2798_v1 }
  0x7b   : > { %2562 = vmatpush3.bf16.msra.mxu0 %v2758_v10  ;;  %v2776_v10 = vld [vmem:[%s3436_s1 + $0x200] sm:$0xff]  }
  0x7c   : > { %2563 = vmatprep.subr.bf16.mxu0 %v2798_v1 }
  0x7d   : > { %2598 = vmatpush3.bf16.msra.mxu1 %v2761_v18  ;;  %v2777_v18 = vld [vmem:[%s3436_s1 + $0x208] sm:$0xff]  }
  0x7e   : > { %2508 = vmatmul.mubr.bf16.gmra.mrb[44].mxu0 %v980_v15  ;;  %2599 = vmatprep.subr.bf16.mxu1 %v2798_v1  ;;  %v1372_v15 = vrot.slane %v3270_v4, 2 }
  0x7f   : > { %2544 = vmatmul.mubr.bf16.gmra.mrb[44].mxu1 %v1170_v19  ;;  %2564 = vmatpush3.bf16.msra.mxu0 %v2760_v20  ;;  %v1562_v20 = vor.u32 %v1561_v16, %v1558_v14 }
  0x80   : > { %2511 = vmatprep.mubr.msk.bf16.mxu0 %vm2799_vm0, %v2798_v1  ;;  %2547 = vmatprep.mubr.msk.bf16.mxu1 %vm2799_vm0, %v2798_v1  ;;  %v1373_v19 = vsel %vm1165_vm4, %v1370_v6, %v1372_v15  ;;  %v1375_v34 = vsel %vm1165_vm4, %v1372_v15, %v1374_v29 }
  0x81   : > { %2565 = vmatprep.subr.bf16.mxu0 %v2798_v1  ;;  %2600 = vmatpush3.bf16.msra.mxu1 %v2763_v23  ;;  %v2779_v23 = vld [vmem:[%s3436_s1 + $0x210] sm:$0xff]   ;;  %v1563_v24 = vsel %vm1537_vm5, %v1553_v8, %v1562_v20 }
  0x82   : > { %2601 = vmatprep.subr.bf16.mxu1 %v2798_v1 }
  0x83   : > { %2566 = vmatpush3.bf16.msra.mxu0 %v2762_v25  ;;  %v1567_v25 = vrot.slane %v1565_v21, 2 }
  0x84   : > { %2567 = vmatprep.subr.bf16.mxu0 %v2798_v1 }
  0x85   : > { %2602 = vmatpush3.bf16.msra.mxu1 %v2765_v30  ;;  %v2781_v30 = vld [vmem:[%s3436_s1 + $0x218] sm:$0xff]  }
  0x86   : > { %2512 = vmatmul.mubr.bf16.gmra.mrb[48].mxu0 %v989_v31  ;;  %2603 = vmatprep.subr.bf16.mxu1 %v2798_v1  ;;  %v1571_v31 = vor.u32 %v1570_v26, %v1567_v25 }
  0x87   : > { %2548 = vmatmul.mubr.bf16.gmra.mrb[48].mxu1 %v1172_v27  ;;  %2568 = vmatpush3.bf16.msra.mxu0 %v2764_v32  ;;  %v1574_v32 = vshrl.u32 %v3308_v28, 16 }
  0x88   : > { %2515 = vmatprep.mubr.msk.bf16.mxu0 %vm2799_vm0, %v2798_v1  ;;  %2551 = vmatprep.mubr.msk.bf16.mxu1 %vm2799_vm0, %v2798_v1  ;;  %v1572_v27 = vsel %vm1537_vm5, %v1562_v20, %v1571_v31 }
  0x89   : > { %2569 = vmatprep.subr.bf16.mxu0 %v2798_v1  ;;  %2604 = vmatpush3.bf16.msra.mxu1 %v2766_v37  ;;  %v1576_v37 = vrot.slane %v1574_v32, 2 }
  0x8a   : > { %2605 = vmatprep.subr.bf16.mxu1 %v2798_v1 }
  0x8b   : > { %2570 = vmatpush3.bf16.msra.mxu0 %v2767_v39  ;;  %v3330_v39 = vld [vmem:[%s2870_s6 + $0x30] ss:$0 sps:$4 sm:$0x77]   ;;  %v1580_v42 = vor.u32 %v1579_v38, %v1576_v37 }
  0x8c   : > { %2571 = vmatprep.subr.bf16.mxu0 %v2798_v1  ;;  %v1586_v44 = vshll.u32 %v3330_v39, 16 }
  0x8d   : > { %2606 = vmatpush3.bf16.msra.mxu1 %v2768_v43  ;;  %v1583_v43 = vshrl.u32 %v3330_v39, 16  ;;  %v1581_v48 = vsel %vm1537_vm5, %v1571_v31, %v1580_v42 }
  0x8e   : > { %2516 = vmatmul.mubr.bf16.gmra.mrb[52].mxu0 %v998_v46  ;;  %2607 = vmatprep.subr.bf16.mxu1 %v2798_v1  ;;  %v1377_v46 = vsel %vm1165_vm4, %v1374_v29, %v1376_v40  ;;  %v1588_v50 = vrot.slane %v1586_v44, 3 }
  0x8f   : > { %2552 = vmatmul.mubr.bf16.gmra.mrb[52].mxu1 %v1174_v49  ;;  %2519 = vmatprep.mubr.msk.bf16.mxu0 %vm2799_vm0, %v2798_v1  ;;  %v2785_v49 = vld [vmem:[%s3436_s1 + $0x230] sm:$0xff]  }
  0x90   : > { %2555 = vmatprep.mubr.msk.bf16.mxu1 %vm2799_vm0, %v2798_v1  ;;  %2572 = vmatpush3.bf16.msra.mxu0 %v2769_v36  ;;  %v1585_v36 = vrot.slane %v1583_v43, 2 }
  0x91   : > { %2608 = vmatpush3.bf16.msra.mxu1 %v2771_v52  ;;  %2573 = vmatprep.subr.bf16.mxu0 %v2798_v1  ;;  %v1378_v52 = vrot.slane %v2786_v47, 2 }
  0x92   : > { %2609 = vmatprep.subr.bf16.mxu1 %v2798_v1  ;;  %v1589_v53 = vor.u32 %v1588_v50, %v1585_v36 }
  0x93   : > { %v1379_v56 = vsel %vm1165_vm4, %v1376_v40, %v1378_v52 }
  0x94   : > { %2574 = vmatpush3.bf16.msra.mxu0 %v2772_v55  ;;  %v1727_v55 = vld [vmem:[%s2870_s6 + $0x8] sm:$0x8]  ;;  %v1590_v58 = vsel %vm1537_vm5, %v1580_v42, %v1589_v53  ;;  %s2684_s6 = smul.u32 80, %s3440_s13 }
  0x95   : > { %2610 = vmatpush3.bf16.msra.mxu1 %v2773_v60  ;;  %2631 = vmatprep.subr.bf16.mxu0 %v2798_v1  ;;  %v2215_v57 = vcombine.low %v1727_v55, %v3236_v45  ;;  %v1750_v60 = vrot.slane %v3247_v51, 3  ;;  %v1756_v45 = vrot.slane %v3308_v28, 3  ;;  %v1758_v51 = vrot.slane %v3330_v39, 3 }
  0x96   : > { %2520 = vmatmul.mubr.bf16.gmra.mrb[56].mxu0 %v1007_v61  ;;  %2667 = vmatprep.subr.bf16.mxu1 %v2798_v1  ;;  %v1754_v61 = vrot.slane %v3287_v17, 3  ;;  %s3400_s19 = scalar_lea.vmem %s3437_s2, %s2684_s6  ;;  %s3407_s21 = scalar_lea.vmem %s3438_s3, %s2684_s6 }
  0x97   : > { %2556 = vmatmul.mubr.bf16.gmra.mrb[56].mxu1 %v1176_v62  ;;  %2575 = vmatprep.mubr.msk.bf16.mxu0 %vm2799_vm0, %v2798_v1  ;;  %v1749_v59 = vrot.slane %v2215_v57, 3  ;;  %v1753_v2 = vsel %vm1748_vm6, %v1750_v60, %v1752_v0  ;;  %v1759_v3 = vsel %vm1748_vm6, %v1756_v45, %v1758_v51 }
  0x98   : > { %2611 = vmatprep.mubr.msk.bf16.mxu1 %vm2799_vm0, %v2798_v1  ;;  %v1757_v63 = vsel %vm1748_vm6, %v1754_v61, %v1756_v45  ;;  %v1755_v5 = vsel %vm1748_vm6, %v1752_v0, %v1754_v61 }
  0x99   : > { %v1751_v62 = vsel %vm1748_vm6, %v1749_v59, %v1750_v60 }
  0x9e   : > { %2576 = vmatmul.mubr.bf16.vlgmr.msra.gmra.mrb[60].mxu0 %v1371_v12 }
  0x9f   : > { %2612 = vmatmul.mubr.bf16.vlgmr.msra.gmra.mrb[60].mxu1 %v1554_v13  ;;  %2632 = vmatpush3.bf16.msra.mxu0 %v2776_v10 }
  0xa0   : > { %2633 = vmatprep.subr.bf16.mxu0 %v2798_v1  ;;  %2579 = vmatprep.mubr.msk.bf16.mxu0 %vm2799_vm0, %v2798_v1 }
  0xa1   : > { %2615 = vmatprep.mubr.msk.bf16.mxu1 %vm2799_vm0, %v2798_v1  ;;  %2675 = vmatpush3.bf16.msra.mxu1 %v2776_v10 }
  0xa2   : > { %2668 = vmatprep.subr.bf16.mxu1 %v2798_v1 }
  0xa3   : > { %2634 = vmatpush3.bf16.msra.mxu0 %v2777_v18 }
  0xa4   : > { %2635 = vmatprep.subr.bf16.mxu0 %v2798_v1 }
  0xa5   : > { %2676 = vmatpush3.bf16.msra.mxu1 %v2777_v18 }
  0xa6   : > { %2580 = vmatmul.mubr.bf16.gmra.mrb[64].mxu0 %v1373_v19  ;;  %2669 = vmatprep.subr.bf16.mxu1 %v2798_v1 }
  0xa7   : > { %2616 = vmatmul.mubr.bf16.gmra.mrb[64].mxu1 %v1563_v24  ;;  %2636 = vmatpush3.bf16.msra.mxu0 %v2779_v23 }
  0xa8   : > { %2583 = vmatprep.mubr.msk.bf16.mxu0 %vm2799_vm0, %v2798_v1  ;;  %2619 = vmatprep.mubr.msk.bf16.mxu1 %vm2799_vm0, %v2798_v1 }
  0xa9   : > { %2637 = vmatprep.subr.bf16.mxu0 %v2798_v1  ;;  %2677 = vmatpush3.bf16.msra.mxu1 %v2779_v23 }
  0xaa   : > { %2670 = vmatprep.subr.bf16.mxu1 %v2798_v1 }
  0xab   : > { %2638 = vmatpush3.bf16.msra.mxu0 %v2781_v30 }
  0xac   : > { %2639 = vmatprep.subr.bf16.mxu0 %v2798_v1 }
  0xad   : > { %2678 = vmatpush3.bf16.msra.mxu1 %v2781_v30 }
  0xae   : > { %2584 = vmatmul.mubr.bf16.gmra.mrb[68].mxu0 %v1375_v34  ;;  %2671 = vmatprep.subr.bf16.mxu1 %v2798_v1 }
  0xaf   : > { %2620 = vmatmul.mubr.bf16.gmra.mrb[68].mxu1 %v1572_v27  ;;  %2640 = vmatpush3.bf16.msra.mxu0 %v2782_v35 }
  0xb0   : > { %2587 = vmatprep.mubr.msk.bf16.mxu0 %vm2799_vm0, %v2798_v1  ;;  %2623 = vmatprep.mubr.msk.bf16.mxu1 %vm2799_vm0, %v2798_v1 }
  0xb1   : > { %2679 = vmatpush3.bf16.msra.mxu1 %v2782_v35  ;;  %2641 = vmatprep.subr.bf16.mxu0 %v2798_v1 }
  0xb2   : > { %2672 = vmatprep.subr.bf16.mxu1 %v2798_v1 }
  0xb3   : > { %2642 = vmatpush3.bf16.msra.mxu0 %v2784_v41 }
  0xb4   : > { %2643 = vmatprep.subr.bf16.mxu0 %v2798_v1 }
  0xb5   : > { %2680 = vmatpush3.bf16.msra.mxu1 %v2784_v41 }
  0xb6   : > { %2588 = vmatmul.mubr.bf16.gmra.mrb[72].mxu0 %v1377_v46  ;;  %2673 = vmatprep.subr.bf16.mxu1 %v2798_v1 }
  0xb7   : > { %2624 = vmatmul.mubr.bf16.gmra.mrb[72].mxu1 %v1581_v48  ;;  %2591 = vmatprep.mubr.msk.bf16.mxu0 %vm2799_vm0, %v2798_v1 }
  0xb8   : > { %2627 = vmatprep.mubr.msk.bf16.mxu1 %vm2799_vm0, %v2798_v1  ;;  %2644 = vmatpush3.bf16.msra.mxu0 %v2785_v49 }
  0xb9   : > { %2681 = vmatpush3.bf16.msra.mxu1 %v2785_v49  ;;  %2645 = vmatprep.subr.bf16.mxu0 %v2798_v1 }
  0xba   : > { %2674 = vmatprep.subr.bf16.mxu1 %v2798_v1 }
  0xbc   : > { %2646 = vmatpush3.bf16.msra.mxu0 %v2788_v54 }
  0xbd   : > { %2682 = vmatpush3.bf16.msra.mxu1 %v2788_v54 }
  0xbe   : > { %2592 = vmatmul.mubr.bf16.gmra.mrb[76].mxu0 %v1379_v56 }
  0xbf   : > { %2628 = vmatmul.mubr.bf16.gmra.mrb[76].mxu1 %v1590_v58  ;;  %2647 = vmatprep.mubr.msk.bf16.mxu0 %vm2799_vm0, %v2798_v1 }
  0xc0   : > { %2659 = vmatprep.mubr.msk.bf16.mxu1 %vm2799_vm0, %v2798_v1 }
  0xc6   : > { %2648 = vmatmul.mubr.bf16.vlgmr.msra.gmra.mrb[80].mxu0 %v1751_v62 }
  0xc7   : > { %2660 = vmatmul.mubr.bf16.vlgmr.msra.gmra.mrb[80].mxu1 %v1757_v63  ;;  %2651 = vmatprep.mubr.msk.bf16.mxu0 %vm2799_vm0, %v2798_v1 }
  0xc8   : > { %2663 = vmatprep.mubr.msk.bf16.mxu1 %vm2799_vm0, %v2798_v1 }
  0xce   : > { %2652 = vmatmul.mubr.bf16.gmra.mrb[84].mxu0 %v1753_v2 }
  0xcf   : > { %2664 = vmatmul.mubr.bf16.gmra.mrb[84].mxu1 %v1759_v3  ;;  %2655 = vmatprep.mubr.msk.bf16.mxu0 %vm2799_vm0, %v2798_v1 }
  0xd6   : > { %2656 = vmatmul.mubr.bf16.gmra.mrb[88].mxu0 %v1755_v5 }
  0xf9   : > { %v396_v6 = vpop.f32.mrb[0].mxu0 }
  0xfa   : > { %v522_v7 = vpop.f32.mrb[0].mxu1  ;;  %v2361_v4 = vpop.f32.mrb[1].mxu0 }
  0xfb   : > { %v523_v8 = vadd.f32 %v522_v7, %v396_v6  ;;  %v2397_v9 = vpop.f32.mrb[1].mxu1  ;;  %v399_v11 = vpop.f32.mrb[2].mxu0 }
  0xfc   : > { %v525_v12 = vpop.f32.mrb[2].mxu1  ;;  %v2362_v10 = vpop.f32.mrb[3].mxu0 }
  0xfd   : > { %v526_v13 = vadd.f32 %v525_v12, %v399_v11  ;;  %v2398_v14 = vpop.f32.mrb[3].mxu1 }
 0x101   : > { %v404_v16 = vpop.f32.mrb[4].mxu0 }
 0x102   : > { %v530_v17 = vpop.f32.mrb[4].mxu1  ;;  %v2365_v18 = vpop.f32.mrb[5].mxu0 }
 0x103   : > { %v531_v15 = vadd.f32 %v530_v17, %v404_v16  ;;  %v2401_v20 = vpop.f32.mrb[5].mxu1  ;;  %v407_v21 = vpop.f32.mrb[6].mxu0 }
 0x104   : > { %v533_v1 = vpop.f32.mrb[6].mxu1  ;;  %v2366_v22 = vpop.f32.mrb[7].mxu0 }
 0x105   : > { %v534_v19 = vadd.f32 %v533_v1, %v407_v21  ;;  %v2402_v23 = vpop.f32.mrb[7].mxu1 }
 0x109   : > { %v412_v24 = vpop.f32.mrb[8].mxu0 }
 0x10a   : > { %v538_v25 = vpop.f32.mrb[8].mxu1  ;;  %v2369_v26 = vpop.f32.mrb[9].mxu0 }
 0x10b   : > { %v539_v28 = vadd.f32 %v538_v25, %v412_v24  ;;  %v2405_v29 = vpop.f32.mrb[9].mxu1  ;;  %v415_v30 = vpop.f32.mrb[10].mxu0 }
 0x10c   : > { %v541_v31 = vpop.f32.mrb[10].mxu1  ;;  %v2370_v32 = vpop.f32.mrb[11].mxu0 }
 0x10d   : > { %v542_v33 = vadd.f32 %v541_v31, %v415_v30  ;;  %v2406_v34 = vpop.f32.mrb[11].mxu1 }
 0x111   : > { %v420_v35 = vpop.f32.mrb[12].mxu0 }
 0x112   : > { %v546_v27 = vpop.f32.mrb[12].mxu1  ;;  %v2373_v37 = vpop.f32.mrb[13].mxu0 }
 0x113   : > { %v547_v38 = vadd.f32 %v546_v27, %v420_v35  ;;  %v2409_v39 = vpop.f32.mrb[13].mxu1  ;;  %v423_v40 = vpop.f32.mrb[14].mxu0 }
 0x114   : > { %v549_v41 = vpop.f32.mrb[14].mxu1  ;;  %v2374_v42 = vpop.f32.mrb[15].mxu0 }
 0x115   : > { %v550_v43 = vadd.f32 %v549_v41, %v423_v40  ;;  %v2410_v44 = vpop.f32.mrb[15].mxu1 }
 0x119   : > { %v428_v46 = vpop.f32.mrb[16].mxu0 }
 0x11a   : > { %v554_v47 = vpop.f32.mrb[16].mxu1  ;;  %v2377_v48 = vpop.f32.mrb[17].mxu0 }
 0x11b   : > { %v555_v49 = vadd.f32 %v554_v47, %v428_v46  ;;  %v2413_v36 = vpop.f32.mrb[17].mxu1  ;;  %v431_v50 = vpop.f32.mrb[18].mxu0 }
 0x11c   : > { %v557_v52 = vpop.f32.mrb[18].mxu1  ;;  %v2378_v53 = vpop.f32.mrb[19].mxu0 }
 0x11d   : > { %v558_v54 = vadd.f32 %v557_v52, %v431_v50  ;;  %v2414_v55 = vpop.f32.mrb[19].mxu1 }
 0x121   : > { %v681_v56 = vpop.f32.mrb[20].mxu0 }
 0x122   : > { %v720_v57 = vadd.f32 %v681_v56, %v523_v8  ;;  %v2433_v58 = vpop.f32.mrb[21].mxu0  ;;  %v884_v59 = vpop.f32.mrb[20].mxu1 }
 0x123   : > { %v684_v60 = vpop.f32.mrb[22].mxu0  ;;  %v2469_v61 = vpop.f32.mrb[21].mxu1 }
 0x124   : > { %v721_v45 = vadd.f32 %v684_v60, %v526_v13  ;;  %v923_v62 = vadd.f32 %v884_v59, %v720_v57  ;;  %v2434_v63 = vpop.f32.mrb[23].mxu0  ;;  %v887_v0 = vpop.f32.mrb[22].mxu1 }
 0x125   : > { %v2470_v51 = vpop.f32.mrb[23].mxu1 }
 0x126   : > { %v924_v2 = vadd.f32 %v887_v0, %v721_v45 }
 0x129   : > { %v689_v3 = vpop.f32.mrb[24].mxu0 }
 0x12a   : > { %v722_v5 = vadd.f32 %v689_v3, %v531_v15  ;;  %v2437_v6 = vpop.f32.mrb[25].mxu0  ;;  %v892_v7 = vpop.f32.mrb[24].mxu1 }
 0x12b   : > { %v692_v4 = vpop.f32.mrb[26].mxu0  ;;  %v2473_v9 = vpop.f32.mrb[25].mxu1 }
 0x12c   : > { %v723_v11 = vadd.f32 %v692_v4, %v534_v19  ;;  %v925_v12 = vadd.f32 %v892_v7, %v722_v5  ;;  %v2438_v10 = vpop.f32.mrb[27].mxu0  ;;  %v895_v8 = vpop.f32.mrb[26].mxu1 }
 0x12d   : > { %v2474_v14 = vpop.f32.mrb[27].mxu1 }
 0x12e   : > { %v926_v16 = vadd.f32 %v895_v8, %v723_v11 }
 0x131   : > { %v697_v17 = vpop.f32.mrb[28].mxu0 }
 0x132   : > { %v724_v18 = vadd.f32 %v697_v17, %v539_v28  ;;  %v2441_v13 = vpop.f32.mrb[29].mxu0  ;;  %v900_v20 = vpop.f32.mrb[28].mxu1 }
 0x133   : > { %v700_v21 = vpop.f32.mrb[30].mxu0  ;;  %v2477_v1 = vpop.f32.mrb[29].mxu1 }
 0x134   : > { %v725_v22 = vadd.f32 %v700_v21, %v542_v33  ;;  %v927_v23 = vadd.f32 %v900_v20, %v724_v18  ;;  %v2442_v24 = vpop.f32.mrb[31].mxu0  ;;  %v903_v15 = vpop.f32.mrb[30].mxu1 }
 0x135   : > { %v2478_v25 = vpop.f32.mrb[31].mxu1 }
 0x136   : > { %v928_v26 = vadd.f32 %v903_v15, %v725_v22 }
 0x139   : > { %v705_v29 = vpop.f32.mrb[32].mxu0 }
 0x13a   : > { %v726_v30 = vadd.f32 %v705_v29, %v547_v38  ;;  %v2445_v19 = vpop.f32.mrb[33].mxu0  ;;  %v908_v31 = vpop.f32.mrb[32].mxu1 }
 0x13b   : > { %v708_v32 = vpop.f32.mrb[34].mxu0  ;;  %v2481_v34 = vpop.f32.mrb[33].mxu1 }
 0x13c   : > { %v727_v35 = vadd.f32 %v708_v32, %v550_v43  ;;  %v929_v27 = vadd.f32 %v908_v31, %v726_v30  ;;  %v2446_v37 = vpop.f32.mrb[35].mxu0  ;;  %v911_v28 = vpop.f32.mrb[34].mxu1 }
 0x13d   : > { %v2482_v39 = vpop.f32.mrb[35].mxu1 }
 0x13e   : > { %v930_v40 = vadd.f32 %v911_v28, %v727_v35 }
 0x141   : > { %v713_v41 = vpop.f32.mrb[36].mxu0 }
 0x142   : > { %v728_v42 = vadd.f32 %v713_v41, %v555_v49  ;;  %v2449_v33 = vpop.f32.mrb[37].mxu0  ;;  %v916_v44 = vpop.f32.mrb[36].mxu1 }
 0x143   : > { %v716_v46 = vpop.f32.mrb[38].mxu0  ;;  %v2485_v47 = vpop.f32.mrb[37].mxu1 }
 0x144   : > { %v729_v48 = vadd.f32 %v716_v46, %v558_v54  ;;  %v931_v36 = vadd.f32 %v916_v44, %v728_v42  ;;  %v2450_v50 = vpop.f32.mrb[39].mxu0  ;;  %v919_v38 = vpop.f32.mrb[38].mxu1 }
 0x145   : > { %v2486_v52 = vpop.f32.mrb[39].mxu1 }
 0x146   : > { %v932_v53 = vadd.f32 %v919_v38, %v729_v48 }
 0x149   : > { %v1095_v55 = vpop.f32.mrb[40].mxu0 }
 0x14a   : > { %v1134_v56 = vadd.f32 %v1095_v55, %v923_v62  ;;  %v2505_v43 = vpop.f32.mrb[41].mxu0  ;;  %v1264_v57 = vpop.f32.mrb[40].mxu1 }
 0x14b   : > { %v1098_v58 = vpop.f32.mrb[42].mxu0  ;;  %v2541_v59 = vpop.f32.mrb[41].mxu1 }
 0x14c   : > { %v1135_v60 = vadd.f32 %v1098_v58, %v924_v2  ;;  %v1303_v61 = vadd.f32 %v1264_v57, %v1134_v56  ;;  %v2506_v45 = vpop.f32.mrb[43].mxu0  ;;  %v1267_v49 = vpop.f32.mrb[42].mxu1 }
 0x14d   : > { %v2542_v63 = vpop.f32.mrb[43].mxu1 }
 0x14e   : > { %v1304_v0 = vadd.f32 %v1267_v49, %v1135_v60 }
 0x151   : > { %v1103_v51 = vpop.f32.mrb[44].mxu0 }
 0x152   : > { %v1136_v3 = vadd.f32 %v1103_v51, %v925_v12  ;;  %v2509_v54 = vpop.f32.mrb[45].mxu0  ;;  %v1272_v5 = vpop.f32.mrb[44].mxu1 }
 0x153   : > { %v1106_v6 = vpop.f32.mrb[46].mxu0  ;;  %v2545_v7 = vpop.f32.mrb[45].mxu1 }
 0x154   : > { %v1137_v4 = vadd.f32 %v1106_v6, %v926_v16  ;;  %v1305_v9 = vadd.f32 %v1272_v5, %v1136_v3  ;;  %v2510_v11 = vpop.f32.mrb[47].mxu0  ;;  %v1275_v62 = vpop.f32.mrb[46].mxu1 }
 0x155   : > { %v2546_v10 = vpop.f32.mrb[47].mxu1 }
 0x156   : > { %v1306_v8 = vadd.f32 %v1275_v62, %v1137_v4 }
 0x159   : > { %v1111_v14 = vpop.f32.mrb[48].mxu0 }
 0x15a   : > { %v1138_v17 = vadd.f32 %v1111_v14, %v927_v23  ;;  %v2513_v2 = vpop.f32.mrb[49].mxu0  ;;  %v1280_v18 = vpop.f32.mrb[48].mxu1 }
 0x15b   : > { %v1114_v13 = vpop.f32.mrb[50].mxu0  ;;  %v2549_v20 = vpop.f32.mrb[49].mxu1 }
 0x15c   : > { %v1139_v21 = vadd.f32 %v1114_v13, %v928_v26  ;;  %v1307_v1 = vadd.f32 %v1280_v18, %v1138_v17  ;;  %v2514_v22 = vpop.f32.mrb[51].mxu0  ;;  %v1283_v12 = vpop.f32.mrb[50].mxu1 }
 0x15d   : > { %v2550_v24 = vpop.f32.mrb[51].mxu1 }
 0x15e   : > { %v1308_v15 = vadd.f32 %v1283_v12, %v1139_v21 }
 0x161   : > { %v1119_v25 = vpop.f32.mrb[52].mxu0 }
 0x162   : > { %v1140_v29 = vadd.f32 %v1119_v25, %v929_v27  ;;  %v2517_v16 = vpop.f32.mrb[53].mxu0  ;;  %v1288_v30 = vpop.f32.mrb[52].mxu1 }
 0x163   : > { %v1122_v19 = vpop.f32.mrb[54].mxu0  ;;  %v2553_v31 = vpop.f32.mrb[53].mxu1 }
 0x164   : > { %v1141_v32 = vadd.f32 %v1122_v19, %v930_v40  ;;  %v1309_v34 = vadd.f32 %v1288_v30, %v1140_v29  ;;  %v2518_v35 = vpop.f32.mrb[55].mxu0  ;;  %v1291_v23 = vpop.f32.mrb[54].mxu1 }
 0x165   : > { %v2554_v37 = vpop.f32.mrb[55].mxu1 }
 0x166   : > { %v1310_v28 = vadd.f32 %v1291_v23, %v1141_v32 }
 0x169   : > { %v1127_v39 = vpop.f32.mrb[56].mxu0 }
 0x16a   : > { %v1142_v41 = vadd.f32 %v1127_v39, %v931_v36  ;;  %v2521_v26 = vpop.f32.mrb[57].mxu0  ;;  %v1296_v42 = vpop.f32.mrb[56].mxu1 }
 0x16b   : > { %v1130_v33 = vpop.f32.mrb[58].mxu0  ;;  %v2557_v44 = vpop.f32.mrb[57].mxu1 }
 0x16c   : > { %v1143_v46 = vadd.f32 %v1130_v33, %v932_v53  ;;  %v1311_v47 = vadd.f32 %v1296_v42, %v1142_v41  ;;  %v2522_v48 = vpop.f32.mrb[59].mxu0  ;;  %v1299_v27 = vpop.f32.mrb[58].mxu1 }
 0x16d   : > { %v2558_v50 = vpop.f32.mrb[59].mxu1 }
 0x16e   : > { %v1312_v38 = vadd.f32 %v1299_v27, %v1143_v46 }
 0x171   : > { %v1467_v52 = vpop.f32.mrb[60].mxu0 }
 0x172   : > { %v1506_v55 = vadd.f32 %v1467_v52, %v1303_v61  ;;  %v2577_v40 = vpop.f32.mrb[61].mxu0  ;;  %v1678_v56 = vpop.f32.mrb[60].mxu1 }
 0x173   : > { %v1470_v43 = vpop.f32.mrb[62].mxu0  ;;  %v2613_v57 = vpop.f32.mrb[61].mxu1 }
 0x174   : > { %v1507_v58 = vadd.f32 %v1470_v43, %v1304_v0  ;;  %v1717_v59 = vadd.f32 %v1678_v56, %v1506_v55  ;;  %v2578_v60 = vpop.f32.mrb[63].mxu0  ;;  %v1681_v36 = vpop.f32.mrb[62].mxu1  ;;  %v1902_v55 = vld [vmem:[%s3400_s19 + $0x30] sm:$0xff]  ;;  %v1897_v57 = vld [vmem:[%s3400_s19 + $0x8] sm:$0xff] }
 0x175   : > { %v2614_v45 = vpop.f32.mrb[63].mxu1 }
 0x176   : > { %v3386_v49 = vadd.f32 %v1681_v36, %v1507_v58  ;;  %v1903_v36 = vld [vmem:[%s3400_s19 + $0x38] sm:$0xff] }
 0x179   : > { %v1475_v63 = vpop.f32.mrb[64].mxu0 }
 0x17a   : > { %v1508_v53 = vadd.f32 %v1475_v63, %v1305_v9  ;;  %v2581_v51 = vpop.f32.mrb[65].mxu0  ;;  %v1686_v3 = vpop.f32.mrb[64].mxu1 }
 0x17b   : > { %v1478_v54 = vpop.f32.mrb[66].mxu0  ;;  %v2617_v5 = vpop.f32.mrb[65].mxu1 }
 0x17c   : > { %v1509_v6 = vadd.f32 %v1478_v54, %v1306_v8  ;;  %v3388_v7 = vadd.f32 %v1686_v3, %v1508_v53  ;;  %v2582_v61 = vpop.f32.mrb[67].mxu0  ;;  %v1689_v4 = vpop.f32.mrb[66].mxu1 }
 0x17d   : > { %v2618_v11 = vpop.f32.mrb[67].mxu1 }
 0x17e   : > { %v3390_v62 = vadd.f32 %v1689_v4, %v1509_v6  ;;  %v1898_v6 = vld [vmem:[%s3400_s19 + $0x10] sm:$0xff]  ;;  %v1904_v4 = vld [vmem:[%s3400_s19 + $0x40] sm:$0xff] }
 0x181   : > { %v1483_v0 = vpop.f32.mrb[68].mxu0 }
 0x182   : > { %v1510_v10 = vadd.f32 %v1483_v0, %v1307_v1  ;;  %v2585_v14 = vpop.f32.mrb[69].mxu0  ;;  %v1694_v17 = vpop.f32.mrb[68].mxu1 }
 0x183   : > { %v1486_v2 = vpop.f32.mrb[70].mxu0  ;;  %v2621_v18 = vpop.f32.mrb[69].mxu1 }
 0x184   : > { %v1511_v13 = vadd.f32 %v1486_v2, %v1308_v15  ;;  %v3392_v9 = vadd.f32 %v1694_v17, %v1510_v10  ;;  %v2586_v20 = vpop.f32.mrb[71].mxu0  ;;  %v1697_v21 = vpop.f32.mrb[70].mxu1  ;;  %v1899_v17 = vld [vmem:[%s3400_s19 + $0x18] sm:$0xff] }
 0x185   : > { %v2622_v22 = vpop.f32.mrb[71].mxu1  ;;  %v1905_v20 = vld [vmem:[%s3400_s19 + $0x48] sm:$0xff] }
 0x186   : > { %v3394_v8 = vadd.f32 %v1697_v21, %v1511_v13 }
 0x189   : > { %v1491_v12 = vpop.f32.mrb[72].mxu0 }
 0x18a   : > { %v1512_v24 = vadd.f32 %v1491_v12, %v1309_v34  ;;  %v2589_v25 = vpop.f32.mrb[73].mxu0  ;;  %v1702_v29 = vpop.f32.mrb[72].mxu1 }
 0x18b   : > { %v1494_v16 = vpop.f32.mrb[74].mxu0  ;;  %v2625_v30 = vpop.f32.mrb[73].mxu1 }
 0x18c   : > { %v1513_v1 = vadd.f32 %v1494_v16, %v1310_v28  ;;  %v1723_v19 = vadd.f32 %v1702_v29, %v1512_v24  ;;  %v2590_v31 = vpop.f32.mrb[75].mxu0  ;;  %v1705_v32 = vpop.f32.mrb[74].mxu1  ;;  %v1900_v16 = vld [vmem:[%s3400_s19 + $0x20] sm:$0xff] }
 0x18d   : > { %v2626_v35 = vpop.f32.mrb[75].mxu1 }
 0x18e   : > { %v1724_v15 = vadd.f32 %v1705_v32, %v1513_v1 }
 0x191   : > { %v1499_v23 = vpop.f32.mrb[76].mxu0 }
 0x192   : > { %v1514_v37 = vadd.f32 %v1499_v23, %v1311_v47  ;;  %v2593_v39 = vpop.f32.mrb[77].mxu0  ;;  %v1710_v41 = vpop.f32.mrb[76].mxu1  ;;  %v1896_v47 = vld [vmem:[%s3400_s19] sm:$0xff] }
 0x193   : > { %v1502_v26 = vpop.f32.mrb[78].mxu0  ;;  %v2629_v42 = vpop.f32.mrb[77].mxu1 }
 0x194   : > { %v1515_v33 = vadd.f32 %v1502_v26, %v1312_v38  ;;  %v1725_v44 = vadd.f32 %v1710_v41, %v1514_v37  ;;  %v2594_v34 = vpop.f32.mrb[79].mxu0  ;;  %v1713_v46 = vpop.f32.mrb[78].mxu1 }
 0x195   : > { %v2630_v48 = vpop.f32.mrb[79].mxu1 }
 0x196   : > { %v1726_v27 = vadd.f32 %v1713_v46, %v1515_v33 }
 0x199   : > { %v1847_v28 = vpop.f32.mrb[80].mxu0 }
 0x19a   : > { %v1886_v50 = vadd.f32 %v1847_v28, %v1717_v59  ;;  %v1871_v52 = vpop.f32.mrb[80].mxu1  ;;  %v2649_v38 = vpop.f32.mrb[81].mxu0 }
 0x19b   : > { %v1892_v40 = vadd.f32 %v1871_v52, %v1723_v19  ;;  %v2661_v56 = vpop.f32.mrb[81].mxu1  ;;  %v1850_v43 = vpop.f32.mrb[82].mxu0  ;;  %v1901_v19 = vld [vmem:[%s3400_s19 + $0x28] sm:$0xff] }
 0x19c   : > { %v1906_v58 = vadd.f32 %v1896_v47, %v1886_v50  ;;  %v1887_v59 = vadd.f32 %v1850_v43, %v3386_v49  ;;  %v1874_v60 = vpop.f32.mrb[82].mxu1  ;;  %v2650_v45 = vpop.f32.mrb[83].mxu0 }
 0x19d   : > { %v1912_v63 = vadd.f32 %v1902_v55, %v1892_v40  ;;  %v1893_v53 = vadd.f32 %v1874_v60, %v1724_v15  ;;  %v2662_v51 = vpop.f32.mrb[83].mxu1 }
 0x19e   : > { %1916 = vst [vmem:[%s3407_s21] sm:$0xff] %v1906_v58  ;;  %v1907_v3 = vadd.f32 %v1897_v57, %v1887_v59 }
 0x19f   : > { %1922 = vst [vmem:[%s3407_s21 + $0x30] sm:$0xff] %v1912_v63  ;;  %v1913_v54 = vadd.f32 %v1903_v36, %v1893_v53 }
 0x1a0   : > { %1917 = vst [vmem:[%s3407_s21 + $0x8] sm:$0xff] %v1907_v3 }
 0x1a1   : > { %1923 = vst [vmem:[%s3407_s21 + $0x38] sm:$0xff] %v1913_v54  ;;  %v1855_v5 = vpop.f32.mrb[84].mxu0 }
 0x1a2   : > { %v1888_v61 = vadd.f32 %v1855_v5, %v3388_v7  ;;  %v1879_v49 = vpop.f32.mrb[84].mxu1  ;;  %v2653_v11 = vpop.f32.mrb[85].mxu0 }
 0x1a3   : > { %v1894_v0 = vadd.f32 %v1879_v49, %v1725_v44  ;;  %v2665_v10 = vpop.f32.mrb[85].mxu1  ;;  %v1858_v14 = vpop.f32.mrb[86].mxu0 }
 0x1a4   : > { %v1908_v2 = vadd.f32 %v1898_v6, %v1888_v61  ;;  %v1889_v18 = vadd.f32 %v1858_v14, %v3390_v62  ;;  %v1882_v13 = vpop.f32.mrb[86].mxu1  ;;  %v2654_v21 = vpop.f32.mrb[87].mxu0 }
 0x1a5   : > { %v1914_v7 = vadd.f32 %v1904_v4, %v1894_v0  ;;  %v1895_v22 = vadd.f32 %v1882_v13, %v1726_v27  ;;  %v2666_v12 = vpop.f32.mrb[87].mxu1 }
 0x1a6   : > { %1918 = vst [vmem:[%s3407_s21 + $0x10] sm:$0xff] %v1908_v2  ;;  %v1909_v24 = vadd.f32 %v1899_v17, %v1889_v18 }
 0x1a7   : > { %1924 = vst [vmem:[%s3407_s21 + $0x40] sm:$0xff] %v1914_v7  ;;  %v1915_v25 = vadd.f32 %v1905_v20, %v1895_v22 }
 0x1a8   : > { %1919 = vst [vmem:[%s3407_s21 + $0x18] sm:$0xff] %v1909_v24 }
 0x1a9   : > { %1925 = vst [vmem:[%s3407_s21 + $0x48] sm:$0xff] %v1915_v25  ;;  %v1863_v29 = vpop.f32.mrb[88].mxu0 }
 0x1aa   : > { %v1890_v30 = vadd.f32 %v1863_v29, %v3392_v9  ;;  %v2657_v62 = vpop.f32.mrb[89].mxu0 }
 0x1ab   : > { %v1866_v1 = vpop.f32.mrb[90].mxu0 }
 0x1ac   : > { %v1910_v31 = vadd.f32 %v1900_v16, %v1890_v30  ;;  %v1891_v32 = vadd.f32 %v1866_v1, %v3394_v8  ;;  %v2658_v35 = vpop.f32.mrb[91].mxu0 }
 0x1ae   : > { %1920 = vst [vmem:[%s3407_s21 + $0x20] sm:$0xff] %v1910_v31  ;;  %v1911_v15 = vadd.f32 %v1901_v19, %v1891_v32 }
 0x1b0   : > { %1921 = vst [vmem:[%s3407_s21 + $0x28] sm:$0xff] %v1911_v15 }
 0x1b1 PF: > { %s13_s12 = sadd.s32 1, %s2796_s12  }
 0x1b2   : > { %p10_p4 = scmp.ge.s32.totalorder %s13_s12, 4  }
 0x1b4   :  { %12 = sbr.rel (!%p10_p4) target bundleno = 1 (0x1), region = 73 }

</bundles_post_ra>
